<compile_context>
chip_gen: v5e
topology: v5e:2x2
jax: 0.10.0
libtpu: 0.0.40
codegen_flags: <defaults>
</compile_context>

<pallas_src>
import functools
import math

import jax
import jax.numpy as jnp
from jax.experimental import pallas as pl
from jax.experimental.pallas import tpu as pltpu

C_IN = 9      # AttentionResNet hard-codes Attention(224, 9) / BatchNorm2d(9) / conv1(9->64)
LATENT = 64   # Attention latent dim
EPS = 1e-5
LANE = 128
SUB = 8
VMEM_LIMIT = 32 * 1024 * 1024   # explicit scoped-VMEM budget, safe on v5e/v6e/v7x


def _pick_tile(dim, cap, align):
    """Largest tile <= cap that evenly divides dim and is a multiple of align.
    Falls back to the full dim (always legal: block dim == array dim)."""
    if dim <= cap:
        return dim
    start = (cap // align) * align
    for c in range(start, 0, -align):
        if dim % c == 0:
            return c
    return dim


def _row_tile(rows, channels, dtype):
    """Row tile for (rows, C) streaming kernels: ~8 MiB per block."""
    bytes_per_row = channels * jnp.dtype(dtype).itemsize
    cap = max(SUB, ((8 * 1024 * 1024) // bytes_per_row) // SUB * SUB)
    return _pick_tile(rows, cap, SUB)


def _cparams(semantics):
    return pltpu.CompilerParams(dimension_semantics=semantics,
                                vmem_limit_bytes=VMEM_LIMIT)


# ---------------------------------------------------------------------------
# Generic tiled MXU matmul (bf16 inputs, f32 accumulation), with an optional
# fused epilogue producing per-M-tile channel sums / sums of squares so the
# following BatchNorm does not have to re-read the output for statistics.
# ---------------------------------------------------------------------------
def _matmul_kernel(a_ref, b_ref, o_ref, acc_ref):
    @pl.when(pl.program_id(2) == 0)
    def _():
        acc_ref[...] = jnp.zeros_like(acc_ref)

    acc_ref[...] += jnp.dot(a_ref[...], b_ref[...],
                            preferred_element_type=jnp.float32)

    @pl.when(pl.program_id(2) == pl.num_programs(2) - 1)
    def _():
        o_ref[...] = acc_ref[...].astype(o_ref.dtype)


def _matmul_stats_kernel(a_ref, b_ref, o_ref, sum_ref, sq_ref, acc_ref):
    @pl.when(pl.program_id(2) == 0)
    def _():
        acc_ref[...] = jnp.zeros_like(acc_ref)

    acc_ref[...] += jnp.dot(a_ref[...], b_ref[...],
                            preferred_element_type=jnp.float32)

    @pl.when(pl.program_id(2) == pl.num_programs(2) - 1)
    def _():
        acc = acc_ref[...]
        o_ref[...] = acc.astype(o_ref.dtype)
        sum_ref[...] = jnp.sum(acc, axis=0, keepdims=True)
        sq_ref[...] = jnp.sum(acc * acc, axis=0, keepdims=True)


def pallas_matmul(a, b, out_dtype=jnp.bfloat16, stats=False):
    """(M, K) @ (K, N) on the MXU (bf16 in, f32 accumulate).  No K padding: if
    K % 128 != 0 the whole K is a single (full-dim) block.  With stats=True the
    epilogue also returns per-channel (sum, sum_sq) over all M rows."""
    M, K = a.shape
    K2, N = b.shape
    assert K == K2, (K, K2)
    a = a.astype(jnp.bfloat16)
    b = b.astype(jnp.bfloat16)
    bm = _pick_tile(M, 1024, SUB)
    bn = _pick_tile(N, 512, LANE)
    bk = _pick_tile(K, 1024, LANE) if K % LANE == 0 else K
    mt, nt, kt = M // bm, N // bn, K // bk
    grid = (mt, nt, kt)
    a_spec = pl.BlockSpec((bm, bk), lambda i, j, k: (i, k))
    b_spec = pl.BlockSpec((bk, bn), lambda i, j, k: (k, j))
    o_spec = pl.BlockSpec((bm, bn), lambda i, j, k: (i, j))
    cparams = _cparams(("parallel", "parallel", "arbitrary"))

    if not stats:
        return pl.pallas_call(
            _matmul_kernel,
            out_shape=jax.ShapeDtypeStruct((M, N), out_dtype),
            grid_spec=pltpu.PrefetchScalarGridSpec(
                num_scalar_prefetch=0, grid=grid,
                in_specs=[a_spec, b_spec], out_specs=o_spec,
                scratch_shapes=[pltpu.VMEM((bm, bn), jnp.float32)]),
            compiler_params=cparams,
        )(a, b)

    out, ps, pq = pl.pallas_call(
        _matmul_stats_kernel,
        out_shape=(jax.ShapeDtypeStruct((M, N), out_dtype),
                   jax.ShapeDtypeStruct((mt, 1, N), jnp.float32),
                   jax.ShapeDtypeStruct((mt, 1, N), jnp.float32)),
        grid_spec=pltpu.PrefetchScalarGridSpec(
            num_scalar_prefetch=0, grid=grid,
            in_specs=[a_spec, b_spec],
            out_specs=[o_spec,
                       pl.BlockSpec((None, 1, bn), lambda i, j, k: (i, 0, j)),
                       pl.BlockSpec((None, 1, bn), lambda i, j, k: (i, 0, j))]),
        compiler_params=cparams,
        # acc scratch goes through the grid spec to stay next to the specs:
        # (kept here for clarity -- scratch must be inside the grid spec)
    ) if False else pl.pallas_call(
        _matmul_stats_kernel,
        out_shape=(jax.ShapeDtypeStruct((M, N), out_dtype),
                   jax.ShapeDtypeStruct((mt, 1, N), jnp.float32),
                   jax.ShapeDtypeStruct((mt, 1, N), jnp.float32)),
        grid_spec=pltpu.PrefetchScalarGridSpec(
            num_scalar_prefetch=0, grid=grid,
            in_specs=[a_spec, b_spec],
            out_specs=[o_spec,
                       pl.BlockSpec((None, 1, bn), lambda i, j, k: (i, 0, j)),
                       pl.BlockSpec((None, 1, bn), lambda i, j, k: (i, 0, j))],
            scratch_shapes=[pltpu.VMEM((bm, bn), jnp.float32)]),
        compiler_params=cparams,
    )(a, b)
    ch_sum = jnp.sum(ps[:, 0, :], axis=0)
    ch_sq = jnp.sum(pq[:, 0, :], axis=0)
    return out, (ch_sum, ch_sq)


# ---------------------------------------------------------------------------
# Direct 3x3 stride-1 conv kernel (no XLA im2col): the whole image for one
# batch element is staged and zero-padded in VMEM, and the conv is computed as
# 9 shifted-slice matmuls over the flattened padded image.  Per-channel
# BatchNorm partial statistics are produced in the same pass.
# ---------------------------------------------------------------------------
def _conv3x3_s1_kernel(x_ref, w_ref, o_ref, sum_ref, sq_ref, xp_ref, acc_ref,
                       *, H, W):
    cin = x_ref.shape[1]
    Wp = W + 2
    Mp = acc_ref.shape[0]           # = H * Wp - 2 (padded-width output rows)

    # Build the zero-padded image (ring of zeros) in VMEM.
    xp_ref[...] = jnp.zeros_like(xp_ref)

    def copy_row(h, carry):
        xp_ref[pl.ds((h + 1) * Wp + 1, W), :] = x_ref[pl.ds(h * W, W), :]
        return carry
    jax.lax.fori_loop(0, H, copy_row, 0)

    # Nine shifted-slice matmuls accumulate into the f32 accumulator.  Output
    # row m corresponds to padded position (h, w) with m = h*Wp + w; columns
    # w in {W, W+1} are junk (wrap positions) and are dropped below.
    acc_ref[...] = jnp.zeros_like(acc_ref)
    for di in range(3):
        for dj in range(3):
            acc_ref[...] += jnp.dot(
                xp_ref[pl.ds(di * Wp + dj, Mp), :],
                w_ref[pl.ds((di * 3 + dj) * cin, cin), :],
                preferred_element_type=jnp.float32)

    # Compact (strip the 2 junk columns per image row), write bf16 output and
    # per-image per-channel partial sums / sums of squares for BatchNorm.
    tn = o_ref.shape[1]

    def row_out(h, carry):
        s, q = carry
        row = acc_ref[pl.ds(h * Wp, W), :]
        o_ref[pl.ds(h * W, W), :] = row.astype(o_ref.dtype)
        return (s + jnp.sum(row, axis=0, keepdims=True),
                q + jnp.sum(row * row, axis=0, keepdims=True))

    zeros = jnp.zeros((1, tn), jnp.float32)
    s, q = jax.lax.fori_loop(0, H, row_out, (zeros, zeros))
    sum_ref[...] = s
    sq_ref[...] = q


def conv3x3_direct(x, conv):
    """3x3, stride 1, pad 1 convolution.  x: (B, H, W, Cin) -> (B, H, W, Cout)
    plus per-channel (sum, sum_sq) BatchNorm statistics of the output."""
    B, H, W, cin = x.shape
    cout = conv['cout']
    Wp = W + 2
    Mp = H * Wp - 2
    HW = H * W
    x2 = x.reshape(B, HW, cin).astype(jnp.bfloat16)

    y, ps, pq = pl.pallas_call(
        functools.partial(_conv3x3_s1_kernel, H=H, W=W),
        out_shape=(jax.ShapeDtypeStruct((B, HW, cout), jnp.bfloat16),
                   jax.ShapeDtypeStruct((B, 1, cout), jnp.float32),
                   jax.ShapeDtypeStruct((B, 1, cout), jnp.float32)),
        grid_spec=pltpu.PrefetchScalarGridSpec(
            num_scalar_prefetch=0, grid=(B,),
            in_specs=[pl.BlockSpec((None, HW, cin), lambda b: (b, 0, 0)),
                      pl.BlockSpec((9 * cin, cout), lambda b: (0, 0))],
            out_specs=[pl.BlockSpec((None, HW, cout), lambda b: (b, 0, 0)),
                       pl.BlockSpec((None, 1, cout), lambda b: (b, 0, 0)),
                       pl.BlockSpec((None, 1, cout), lambda b: (b, 0, 0))],
            scratch_shapes=[pltpu.VMEM(((H + 2) * Wp, cin), jnp.bfloat16),
                            pltpu.VMEM((Mp, cout), jnp.float32)]),
        compiler_params=_cparams(("parallel",)),
    )(x2, conv['w'])
    stats = (jnp.sum(ps[:, 0, :], axis=0), jnp.sum(pq[:, 0, :], axis=0))
    return y.reshape(B, H, W, cout), stats


# ---------------------------------------------------------------------------
# Fallback convolution = im2col (layout glue, bf16) + Pallas matmul.
# Used only for the strided convs (conv1 7x7/s2, the three 3x3/s2) and the
# 1x1 convs (no patch blow-up there).
# ---------------------------------------------------------------------------
def _im2col(x, kh, kw, stride, pad):
    B, H, W, C = x.shape
    if kh == 1 and kw == 1 and pad == 0:
        xs = x[:, ::stride, ::stride, :] if stride > 1 else x
        OH, OW = xs.shape[1], xs.shape[2]
        return xs.reshape(B * OH * OW, C), OH, OW
    xp = jnp.pad(x, ((0, 0), (pad, pad), (pad, pad), (0, 0)))
    OH = (H + 2 * pad - kh) // stride + 1
    OW = (W + 2 * pad - kw) // stride + 1
    # TODO(synk): in-kernel halo gather (phase-split for stride 2) for these
    # remaining strided convs; XLA still materializes the patch tensor here.
    cols = [xp[:, i:i + stride * OH:stride, j:j + stride * OW:stride, :]
            for i in range(kh) for j in range(kw)]
    patches = jnp.stack(cols, axis=3)                     # (B, OH, OW, kh*kw, C)
    return patches.reshape(B * OH * OW, kh * kw * C), OH, OW


def conv2d(x, conv, stride, pad):
    """Returns (y_nhwc, (channel_sum, channel_sum_sq)) for the fused BN."""
    kh, kw, cin, cout = conv['kh'], conv['kw'], conv['cin'], conv['cout']
    if kh == 3 and stride == 1 and pad == 1:
        return conv3x3_direct(x, conv)
    a, OH, OW = _im2col(x.astype(jnp.bfloat16), kh, kw, stride, pad)
    out, stats = pallas_matmul(a, conv['w'], stats=True)
    return out.reshape(x.shape[0], OH, OW, cout), stats


# ---------------------------------------------------------------------------
# BatchNorm (train-mode batch statistics, like the PyTorch module in its
# default training state), with fused ReLU / bottleneck residual add.
# Statistics are normally produced by the conv kernels; the standalone stats
# pass is only used for BatchNorm2d(9) after the attention module.
# ---------------------------------------------------------------------------
def _bn_stats_kernel(x_ref, sum_ref, sq_ref):
    @pl.when(pl.program_id(0) == 0)
    def _():
        sum_ref[...] = jnp.zeros_like(sum_ref)
        sq_ref[...] = jnp.zeros_like(sq_ref)
    x = x_ref[...].astype(jnp.float32)
    sum_ref[...] += jnp.sum(x, axis=0, keepdims=True)
    sq_ref[...] += jnp.sum(x * x, axis=0, keepdims=True)


def _bn_stats(x2):
    rows, C = x2.shape
    rt = _row_tile(rows, C, x2.dtype)
    return pl.pallas_call(
        _bn_stats_kernel,
        out_shape=(jax.ShapeDtypeStruct((1, C), jnp.float32),
                   jax.ShapeDtypeStruct((1, C), jnp.float32)),
        grid_spec=pltpu.PrefetchScalarGridSpec(
            num_scalar_prefetch=0,
            grid=(rows // rt,),
            in_specs=[pl.BlockSpec((rt, C), lambda i: (i, 0))],
            out_specs=[pl.BlockSpec((1, C), lambda i: (0, 0)),
                       pl.BlockSpec((1, C), lambda i: (0, 0))]),
        compiler_params=_cparams(("arbitrary",)),
    )(x2)


def _bn_apply_kernel(x_ref, sum_ref, sq_ref, g_ref, b_ref, o_ref, *,
                     inv_count, relu):
    mean = sum_ref[...] * inv_count
    var = jnp.maximum(sq_ref[...] * inv_count - mean * mean, 0.0)
    scale = g_ref[...] * jax.lax.rsqrt(var + EPS)
    shift = b_ref[...] - mean * scale
    y = x_ref[...].astype(jnp.float32) * scale + shift
    if relu:
        y = jnp.maximum(y, 0.0)
    o_ref[...] = y.astype(o_ref.dtype)


def _bn_apply_add_relu_kernel(x_ref, r_ref, sum_ref, sq_ref, g_ref, b_ref,
                              o_ref, *, inv_count):
    mean = sum_ref[...] * inv_count
    var = jnp.maximum(sq_ref[...] * inv_count - mean * mean, 0.0)
    scale = g_ref[...] * jax.lax.rsqrt(var + EPS)
    shift = b_ref[...] - mean * scale
    y = x_ref[...].astype(jnp.float32) * scale + shift + r_ref[...].astype(jnp.float32)
    o_ref[...] = jnp.maximum(y, 0.0).astype(o_ref.dtype)


def batch_norm(x, gamma, beta, relu=False, residual=None, stats=None,
               out_dtype=jnp.bfloat16):
    """Train-mode BatchNorm over (N,H,W) per channel; optional fused ReLU and
    bottleneck residual add (added after the affine, before the ReLU).
    `stats` = (channel_sum, channel_sum_sq) precomputed by the producing conv."""
    shp = x.shape
    C = shp[-1]
    x2 = x.reshape(-1, C)
    rows = x2.shape[0]
    if stats is None:
        s, q = _bn_stats(x2)
    else:
        s = stats[0].reshape(1, C).astype(jnp.float32)
        q = stats[1].reshape(1, C).astype(jnp.float32)
    rt = _row_tile(rows, C, x2.dtype)
    grid = (rows // rt,)
    row_spec = pl.BlockSpec((rt, C), lambda i: (i, 0))
    vec_spec = pl.BlockSpec((1, C), lambda i: (0, 0))
    gamma2 = gamma.reshape(1, C).astype(jnp.float32)
    beta2 = beta.reshape(1, C).astype(jnp.float32)
    inv_count = 1.0 / float(rows)

    if residual is None:
        out = pl.pallas_call(
            functools.partial(_bn_apply_kernel, inv_count=inv_count, relu=relu),
            out_shape=jax.ShapeDtypeStruct((rows, C), out_dtype),
            grid_spec=pltpu.PrefetchScalarGridSpec(
                num_scalar_prefetch=0, grid=grid,
                in_specs=[row_spec, vec_spec, vec_spec, vec_spec, vec_spec],
                out_specs=row_spec),
            compiler_params=_cparams(("parallel",)),
        )(x2, s, q, gamma2, beta2)
    else:
        r2 = residual.reshape(-1, C)
        out = pl.pallas_call(
            functools.partial(_bn_apply_add_relu_kernel, inv_count=inv_count),
            out_shape=jax.ShapeDtypeStruct((rows, C), out_dtype),
            grid_spec=pltpu.PrefetchScalarGridSpec(
                num_scalar_prefetch=0, grid=grid,
                in_specs=[row_spec, row_spec, vec_spec, vec_spec, vec_spec, vec_spec],
                out_specs=row_spec),
            compiler_params=_cparams(("parallel",)),
        )(x2, r2, s, q, gamma2, beta2)
    return out.reshape(shp)


# ---------------------------------------------------------------------------
# Attention module kernel: (TH, W, 9) slab per grid step, bf16 output.
# TODO(synk): lane-dense (W-minor / NCHW-block) relayout of this C=9 stage.
# ---------------------------------------------------------------------------
def _attention_kernel(x_ref, w1_ref, b1_ref, w2_ref, b2_ref, o_ref):
    x = x_ref[...]                                        # (TH, W, C) float32
    th, w, c = x.shape
    # x @ w1 with C=9: 9 unrolled VPU FMAs (avoids a ragged MXU contraction).
    h = x[:, :, 0:1] * w1_ref[0:1, :]
    for ci in range(1, c):
        h = h + x[:, :, ci:ci + 1] * w1_ref[ci:ci + 1, :]
    h = jnp.maximum(h, 0.0) + b1_ref[...]                 # relu THEN +b1 (as in torch)
    s = jnp.sum(h * w2_ref[...], axis=-1, keepdims=True) + b2_ref[...]   # (TH, W, 1)
    a = jnp.exp(jnp.tanh(s))
    a = a / (jnp.sum(a, axis=1, keepdims=True) + EPS)     # normalize over W (torch dim=2)
    o_ref[...] = (x * a + x).astype(o_ref.dtype)          # weighted_input = x*a + x


def attention(x_nhwc, w1, b1, w2t, b2):
    B, H, W, C = x_nhwc.shape
    th = _pick_tile(H, 32, 1)
    grid = (B, H // th)
    return pl.pallas_call(
        _attention_kernel,
        out_shape=jax.ShapeDtypeStruct((B, H, W, C), jnp.bfloat16),
        grid_spec=pltpu.PrefetchScalarGridSpec(
            num_scalar_prefetch=0, grid=grid,
            in_specs=[
                pl.BlockSpec((None, th, W, C), lambda b, t: (b, t, 0, 0)),
                pl.BlockSpec((C, LATENT), lambda b, t: (0, 0)),
                pl.BlockSpec((1, LATENT), lambda b, t: (0, 0)),
                pl.BlockSpec((1, LATENT), lambda b, t: (0, 0)),
                pl.BlockSpec((1, 1), lambda b, t: (0, 0)),
            ],
            out_specs=pl.BlockSpec((None, th, W, C), lambda b, t: (b, t, 0, 0))),
        compiler_params=_cparams(("parallel", "parallel")),
    )(x_nhwc.astype(jnp.float32), w1,
      b1.reshape(1, LATENT), w2t.reshape(1, LATENT), b2.reshape(1, 1))


# ---------------------------------------------------------------------------
# Pooling kernels (row-tiled)
# ---------------------------------------------------------------------------
def _maxpool_kernel(x_ref, o_ref):
    x = x_ref[...]                                        # (9, rt, C)
    r = x[0]
    for t in range(1, 9):
        r = jnp.maximum(r, x[t])
    o_ref[...] = r


def max_pool_3x3_s2_p1(x):
    B, H, W, C = x.shape
    neg = float(jnp.finfo(x.dtype).min)                   # torch max-pool pads with -inf
    xp = jnp.pad(x, ((0, 0), (1, 1), (1, 1), (0, 0)), constant_values=neg)
    OH = (H + 2 - 3) // 2 + 1
    OW = (W + 2 - 3) // 2 + 1
    # TODO(synk): replace the 9 XLA-side strided taps with an in-kernel halo
    # row-slab gather (same phase-split scheme as the strided convs).
    cols = [xp[:, i:i + 2 * OH:2, j:j + 2 * OW:2, :]
            for i in range(3) for j in range(3)]
    rows = B * OH * OW
    stacked = jnp.stack(cols, axis=0).reshape(9, rows, C)
    rt = _row_tile(rows, 9 * C, x.dtype)
    out = pl.pallas_call(
        _maxpool_kernel,
        out_shape=jax.ShapeDtypeStruct((rows, C), x.dtype),
        grid_spec=pltpu.PrefetchScalarGridSpec(
            num_scalar_prefetch=0, grid=(rows // rt,),
            in_specs=[pl.BlockSpec((9, rt, C), lambda i: (0, i, 0))],
            out_specs=pl.BlockSpec((rt, C), lambda i: (i, 0))),
        compiler_params=_cparams(("parallel",)),
    )(stacked)
    return out.reshape(B, OH, OW, C)


def _gap_kernel(x_ref, o_ref, *, inv_count):
    x = x_ref[...].astype(jnp.float32)                    # (HW, C)
    o_ref[...] = jnp.sum(x, axis=0, keepdims=True) * inv_count


def global_avg_pool(x):
    B, H, W, C = x.shape
    x2 = x.reshape(B, H * W, C)
    out = pl.pallas_call(
        functools.partial(_gap_kernel, inv_count=1.0 / float(H * W)),
        out_shape=jax.ShapeDtypeStruct((B, 1, C), jnp.float32),
        grid_spec=pltpu.PrefetchScalarGridSpec(
            num_scalar_prefetch=0, grid=(B,),
            in_specs=[pl.BlockSpec((None, H * W, C), lambda b: (b, 0, 0))],
            out_specs=pl.BlockSpec((None, 1, C), lambda b: (b, 0, 0))),
        compiler_params=_cparams(("parallel",)),
    )(x2)
    return out.reshape(B, C)


# ---------------------------------------------------------------------------
# Deterministic parameter construction (synthetic, no checkpoint loading),
# with matmul-ready conv weights (bf16 (K, Cout), unpadded) built once.
# TODO(synk): fp8 (v7x) / int8 (v6e) per-channel-quantized weights for the
# weight-bandwidth-bound deep layers.
# ---------------------------------------------------------------------------
class ParamGen:
    def __init__(self, seed=0):
        self._key = jax.random.PRNGKey(seed)
        self._n = 0

    def _next(self):
        self._n += 1
        return jax.random.fold_in(self._key, self._n)

    def normal(self, shape, scale):
        return scale * jax.random.normal(self._next(), shape, jnp.float32)

    def uniform(self, shape, bound):
        return jax.random.uniform(self._next(), shape, jnp.float32, -bound, bound)


def _prep_conv(pg, k, cin, cout):
    w = pg.normal((k, k, cin, cout), math.sqrt(2.0 / (k * k * cin)))
    return {'w': w.reshape(k * k * cin, cout).astype(jnp.bfloat16),
            'kh': k, 'kw': k, 'cin': cin, 'cout': cout}


def _bn_p(c):
    return (jnp.ones((c,), jnp.float32), jnp.zeros((c,), jnp.float32))


def make_resnet50_params(pg, num_classes, in_ch):
    # TODO(synk): torchvision pretrained ResNet-50 weights cannot be loaded here;
    # the exact architecture is reproduced with deterministic synthetic init.
    p = {'conv1': _prep_conv(pg, 7, in_ch, 64), 'bn1': _bn_p(64), 'layers': []}
    inplanes = 64
    for planes, n_blocks, stride in [(64, 3, 1), (128, 4, 2), (256, 6, 2), (512, 3, 2)]:
        blocks = []
        for bi in range(n_blocks):
            s = stride if bi == 0 else 1
            blk = {
                'stride': s,
                'conv1': _prep_conv(pg, 1, inplanes, planes), 'bn1': _bn_p(planes),
                'conv2': _prep_conv(pg, 3, planes, planes),   'bn2': _bn_p(planes),
                'conv3': _prep_conv(pg, 1, planes, planes * 4), 'bn3': _bn_p(planes * 4),
            }
            if s != 1 or inplanes != planes * 4:
                blk['down_conv'] = _prep_conv(pg, 1, inplanes, planes * 4)
                blk['down_bn'] = _bn_p(planes * 4)
            blocks.append(blk)
            inplanes = planes * 4
        p['layers'].append(blocks)
    bound = 1.0 / math.sqrt(2048.0)
    p['fc_w'] = pg.uniform((2048, num_classes), bound).astype(jnp.bfloat16)
    p['fc_b'] = pg.uniform((num_classes,), bound)
    return p


def make_params(num_classes, seed=0):
    pg = ParamGen(seed)
    return {
        # Attention(224, 9): weight1 ~ U(-1/8, 1/8), weight2 ~ U(-1, 1), zero biases
        'att_w1': pg.uniform((C_IN, LATENT), 1.0 / math.sqrt(LATENT)),
        'att_b1': jnp.zeros((LATENT,), jnp.float32),
        'att_w2t': pg.uniform((LATENT,), 1.0),   # weight2 stored transposed (latent,)
        'att_b2': jnp.zeros((1,), jnp.float32),
        # BatchNorm2d(9)
        'bn_g': jnp.ones((C_IN,), jnp.float32),
        'bn_b': jnp.zeros((C_IN,), jnp.float32),
        'resnet': make_resnet50_params(ParamGen(seed + 1), num_classes, C_IN),
    }


# ---------------------------------------------------------------------------
# Forward pass
# ---------------------------------------------------------------------------
def bottleneck(x, blk):
    out, st = conv2d(x, blk['conv1'], stride=1, pad=0)
    out = batch_norm(out, *blk['bn1'], relu=True, stats=st)
    out, st = conv2d(out, blk['conv2'], stride=blk['stride'], pad=1)
    out = batch_norm(out, *blk['bn2'], relu=True, stats=st)
    out, st = conv2d(out, blk['conv3'], stride=1, pad=0)
    if 'down_conv' in blk:
        identity, dst = conv2d(x, blk['down_conv'], stride=blk['stride'], pad=0)
        identity = batch_norm(identity, *blk['down_bn'], relu=False, stats=dst)
    else:
        identity = x
    # bn3 + residual add + ReLU fused into one tiled pass.
    return batch_norm(out, *blk['bn3'], residual=identity, stats=st)


def attention_resnet_forward(x_nchw, params):
    # x = x.permute(0, 2, 3, 1)  ->  NHWC
    x = jnp.transpose(x_nchw, (0, 2, 3, 1)).astype(jnp.float32)
    x = attention(x, params['att_w1'], params['att_b1'],
                  params['att_w2t'], params['att_b2'])
    # x = x.permute(0, 3, 1, 2); x = self.bn(x)  — BatchNorm2d(9), train-mode
    # batch statistics (the PyTorch module's default state); we stay in NHWC.
    x = batch_norm(x, params['bn_g'], params['bn_b'], relu=False)
    # classifier: ResNet-50 with conv1 = Conv2d(9, 64, 7, stride=2, pad=3, bias=False)
    r = params['resnet']
    x, st = conv2d(x, r['conv1'], stride=2, pad=3)
    x = batch_norm(x, *r['bn1'], relu=True, stats=st)
    x = max_pool_3x3_s2_p1(x)
    for blocks in r['layers']:
        for blk in blocks:
            x = bottleneck(x, blk)
    feat = global_avg_pool(x)                                        # (B, 2048) f32
    logits = pallas_matmul(feat, r['fc_w'], out_dtype=jnp.float32)
    return logits + r['fc_b'][None, :]


if __name__ == "__main__":
    num_classes = 10
    B, H, W = 2, 16, 16
    x = jax.random.normal(jax.random.PRNGKey(0), (B, C_IN, H, W), jnp.float32)
    params = make_params(num_classes, seed=0)
    out = attention_resnet_forward(x, params)
    out = jax.block_until_ready(out)
    assert out.shape == (B, num_classes)
    assert bool(jnp.all(jnp.isfinite(out)))
    print("KERNEL_OK")
</pallas_src>

<mosaic_0001>
module attributes {stable_mosaic.version = 11 : i64} {
  func.func @_attention_kernel(%arg0: i32, %arg1: i32, %arg2: memref<1x16x16x9xf32, #tpu.memory_space<vmem>>, %arg3: memref<9x64xf32, #tpu.memory_space<vmem>>, %arg4: memref<1x64xf32, #tpu.memory_space<vmem>>, %arg5: memref<1x64xf32, #tpu.memory_space<vmem>>, %arg6: memref<1x1xf32, #tpu.memory_space<vmem>>, %arg7: memref<1x16x16x9xbf16, #tpu.memory_space<vmem>>) attributes {dimension_semantics = [#tpu.dimension_semantics<parallel>, #tpu.dimension_semantics<parallel>], iteration_bounds = array<i64: 2, 1>, scalar_prefetch = 0 : i64, scratch_operands = 0 : i64, tpu.core_type = #tpu.core_type<tc>, window_params = [{transform_indices = @transform_0, window_bounds = array<i64: 1, 16, 16, 9>}, {pipeline_mode = #tpu.pipeline_mode<synchronous>, transform_indices = @transform_1, window_bounds = array<i64: 9, 64>}, {pipeline_mode = #tpu.pipeline_mode<synchronous>, transform_indices = @transform_2, window_bounds = array<i64: 1, 64>}, {pipeline_mode = #tpu.pipeline_mode<synchronous>, transform_indices = @transform_3, window_bounds = array<i64: 1, 64>}, {pipeline_mode = #tpu.pipeline_mode<synchronous>, transform_indices = @transform_4, window_bounds = array<i64: 1, 1>}, {transform_indices = @transform_5, window_bounds = array<i64: 1, 16, 16, 9>}]} {
    %c0 = arith.constant 0 : index
    %c0_0 = arith.constant 0 : index
    %c0_1 = arith.constant 0 : index
    %c0_2 = arith.constant 0 : index
    %0 = vector.load %arg2[%c0, %c0_0, %c0_1, %c0_2] : memref<1x16x16x9xf32, #tpu.memory_space<vmem>>, vector<1x16x16x9xf32>
    %1 = vector.shape_cast %0 : vector<1x16x16x9xf32> to vector<16x16x9xf32>
    %2 = vector.extract_strided_slice %1 {offsets = [0, 0, 0], sizes = [16, 16, 1], strides = [1, 1, 1]} : vector<16x16x9xf32> to vector<16x16x1xf32>
    %c0_3 = arith.constant 0 : index
    %c0_4 = arith.constant 0 : index
    %3 = vector.load %arg3[%c0_3, %c0_4] : memref<9x64xf32, #tpu.memory_space<vmem>>, vector<1x64xf32>
    %4 = vector.shape_cast %3 : vector<1x64xf32> to vector<1x1x64xf32>
    %5 = vector.broadcast %2 : vector<16x16x1xf32> to vector<16x16x64xf32>
    %6 = vector.broadcast %4 : vector<1x1x64xf32> to vector<16x16x64xf32>
    %7 = arith.mulf %5, %6 : vector<16x16x64xf32>
    %8 = vector.extract_strided_slice %1 {offsets = [0, 0, 1], sizes = [16, 16, 1], strides = [1, 1, 1]} : vector<16x16x9xf32> to vector<16x16x1xf32>
    %c1 = arith.constant 1 : index
    %c0_5 = arith.constant 0 : index
    %9 = vector.load %arg3[%c1, %c0_5] : memref<9x64xf32, #tpu.memory_space<vmem>>, vector<1x64xf32>
    %10 = vector.shape_cast %9 : vector<1x64xf32> to vector<1x1x64xf32>
    %11 = vector.broadcast %8 : vector<16x16x1xf32> to vector<16x16x64xf32>
    %12 = vector.broadcast %10 : vector<1x1x64xf32> to vector<16x16x64xf32>
    %13 = arith.mulf %11, %12 : vector<16x16x64xf32>
    %14 = arith.addf %7, %13 : vector<16x16x64xf32>
    %15 = vector.extract_strided_slice %1 {offsets = [0, 0, 2], sizes = [16, 16, 1], strides = [1, 1, 1]} : vector<16x16x9xf32> to vector<16x16x1xf32>
    %c2 = arith.constant 2 : index
    %c0_6 = arith.constant 0 : index
    %16 = vector.load %arg3[%c2, %c0_6] : memref<9x64xf32, #tpu.memory_space<vmem>>, vector<1x64xf32>
    %17 = vector.shape_cast %16 : vector<1x64xf32> to vector<1x1x64xf32>
    %18 = vector.broadcast %15 : vector<16x16x1xf32> to vector<16x16x64xf32>
    %19 = vector.broadcast %17 : vector<1x1x64xf32> to vector<16x16x64xf32>
    %20 = arith.mulf %18, %19 : vector<16x16x64xf32>
    %21 = arith.addf %14, %20 : vector<16x16x64xf32>
    %22 = vector.extract_strided_slice %1 {offsets = [0, 0, 3], sizes = [16, 16, 1], strides = [1, 1, 1]} : vector<16x16x9xf32> to vector<16x16x1xf32>
    %c3 = arith.constant 3 : index
    %c0_7 = arith.constant 0 : index
    %23 = vector.load %arg3[%c3, %c0_7] : memref<9x64xf32, #tpu.memory_space<vmem>>, vector<1x64xf32>
    %24 = vector.shape_cast %23 : vector<1x64xf32> to vector<1x1x64xf32>
    %25 = vector.broadcast %22 : vector<16x16x1xf32> to vector<16x16x64xf32>
    %26 = vector.broadcast %24 : vector<1x1x64xf32> to vector<16x16x64xf32>
    %27 = arith.mulf %25, %26 : vector<16x16x64xf32>
    %28 = arith.addf %21, %27 : vector<16x16x64xf32>
    %29 = vector.extract_strided_slice %1 {offsets = [0, 0, 4], sizes = [16, 16, 1], strides = [1, 1, 1]} : vector<16x16x9xf32> to vector<16x16x1xf32>
    %c4 = arith.constant 4 : index
    %c0_8 = arith.constant 0 : index
    %30 = vector.load %arg3[%c4, %c0_8] : memref<9x64xf32, #tpu.memory_space<vmem>>, vector<1x64xf32>
    %31 = vector.shape_cast %30 : vector<1x64xf32> to vector<1x1x64xf32>
    %32 = vector.broadcast %29 : vector<16x16x1xf32> to vector<16x16x64xf32>
    %33 = vector.broadcast %31 : vector<1x1x64xf32> to vector<16x16x64xf32>
    %34 = arith.mulf %32, %33 : vector<16x16x64xf32>
    %35 = arith.addf %28, %34 : vector<16x16x64xf32>
    %36 = vector.extract_strided_slice %1 {offsets = [0, 0, 5], sizes = [16, 16, 1], strides = [1, 1, 1]} : vector<16x16x9xf32> to vector<16x16x1xf32>
    %c5 = arith.constant 5 : index
    %c0_9 = arith.constant 0 : index
    %37 = vector.load %arg3[%c5, %c0_9] : memref<9x64xf32, #tpu.memory_space<vmem>>, vector<1x64xf32>
    %38 = vector.shape_cast %37 : vector<1x64xf32> to vector<1x1x64xf32>
    %39 = vector.broadcast %36 : vector<16x16x1xf32> to vector<16x16x64xf32>
    %40 = vector.broadcast %38 : vector<1x1x64xf32> to vector<16x16x64xf32>
    %41 = arith.mulf %39, %40 : vector<16x16x64xf32>
    %42 = arith.addf %35, %41 : vector<16x16x64xf32>
    %43 = vector.extract_strided_slice %1 {offsets = [0, 0, 6], sizes = [16, 16, 1], strides = [1, 1, 1]} : vector<16x16x9xf32> to vector<16x16x1xf32>
    %c6 = arith.constant 6 : index
    %c0_10 = arith.constant 0 : index
    %44 = vector.load %arg3[%c6, %c0_10] : memref<9x64xf32, #tpu.memory_space<vmem>>, vector<1x64xf32>
    %45 = vector.shape_cast %44 : vector<1x64xf32> to vector<1x1x64xf32>
    %46 = vector.broadcast %43 : vector<16x16x1xf32> to vector<16x16x64xf32>
    %47 = vector.broadcast %45 : vector<1x1x64xf32> to vector<16x16x64xf32>
    %48 = arith.mulf %46, %47 : vector<16x16x64xf32>
    %49 = arith.addf %42, %48 : vector<16x16x64xf32>
    %50 = vector.extract_strided_slice %1 {offsets = [0, 0, 7], sizes = [16, 16, 1], strides = [1, 1, 1]} : vector<16x16x9xf32> to vector<16x16x1xf32>
    %c7 = arith.constant 7 : index
    %c0_11 = arith.constant 0 : index
    %51 = vector.load %arg3[%c7, %c0_11] : memref<9x64xf32, #tpu.memory_space<vmem>>, vector<1x64xf32>
    %52 = vector.shape_cast %51 : vector<1x64xf32> to vector<1x1x64xf32>
    %53 = vector.broadcast %50 : vector<16x16x1xf32> to vector<16x16x64xf32>
    %54 = vector.broadcast %52 : vector<1x1x64xf32> to vector<16x16x64xf32>
    %55 = arith.mulf %53, %54 : vector<16x16x64xf32>
    %56 = arith.addf %49, %55 : vector<16x16x64xf32>
    %57 = vector.extract_strided_slice %1 {offsets = [0, 0, 8], sizes = [16, 16, 1], strides = [1, 1, 1]} : vector<16x16x9xf32> to vector<16x16x1xf32>
    %c8 = arith.constant 8 : index
    %c0_12 = arith.constant 0 : index
    %58 = vector.load %arg3[%c8, %c0_12] : memref<9x64xf32, #tpu.memory_space<vmem>>, vector<1x64xf32>
    %59 = vector.shape_cast %58 : vector<1x64xf32> to vector<1x1x64xf32>
    %60 = vector.broadcast %57 : vector<16x16x1xf32> to vector<16x16x64xf32>
    %61 = vector.broadcast %59 : vector<1x1x64xf32> to vector<16x16x64xf32>
    %62 = arith.mulf %60, %61 : vector<16x16x64xf32>
    %63 = arith.addf %56, %62 : vector<16x16x64xf32>
    %cst = arith.constant 0.000000e+00 : f32
    %64 = vector.broadcast %cst : f32 to vector<16x16x64xf32>
    %65 = arith.maximumf %63, %64 : vector<16x16x64xf32>
    %c0_13 = arith.constant 0 : index
    %c0_14 = arith.constant 0 : index
    %66 = vector.load %arg4[%c0_13, %c0_14] : memref<1x64xf32, #tpu.memory_space<vmem>>, vector<1x64xf32>
    %67 = vector.shape_cast %66 : vector<1x64xf32> to vector<1x1x64xf32>
    %68 = vector.broadcast %67 : vector<1x1x64xf32> to vector<16x16x64xf32>
    %69 = arith.addf %65, %68 : vector<16x16x64xf32>
    %c0_15 = arith.constant 0 : index
    %c0_16 = arith.constant 0 : index
    %70 = vector.load %arg5[%c0_15, %c0_16] : memref<1x64xf32, #tpu.memory_space<vmem>>, vector<1x64xf32>
    %71 = vector.shape_cast %70 : vector<1x64xf32> to vector<1x1x64xf32>
    %72 = vector.broadcast %71 : vector<1x1x64xf32> to vector<16x16x64xf32>
    %73 = arith.mulf %69, %72 : vector<16x16x64xf32>
    %cst_17 = arith.constant dense<0.000000e+00> : vector<16x16xf32>
    %74 = vector.multi_reduction <add>, %73, %cst_17 [2] : vector<16x16x64xf32> to vector<16x16xf32>
    %75 = vector.shape_cast %74 : vector<16x16xf32> to vector<16x16x1xf32>
    %c0_18 = arith.constant 0 : index
    %c0_19 = arith.constant 0 : index
    %76 = vector.load %arg6[%c0_18, %c0_19] : memref<1x1xf32, #tpu.memory_space<vmem>>, vector<1x1xf32>
    %77 = vector.shape_cast %76 : vector<1x1xf32> to vector<1x1x1xf32>
    %78 = vector.broadcast %77 : vector<1x1x1xf32> to vector<16x16x1xf32>
    %79 = arith.addf %75, %78 : vector<16x16x1xf32>
    %80 = math.tanh %79 : vector<16x16x1xf32>
    %81 = math.exp %80 : vector<16x16x1xf32>
    %cst_20 = arith.constant dense<0.000000e+00> : vector<16x1xf32>
    %82 = vector.multi_reduction <add>, %81, %cst_20 [1] : vector<16x16x1xf32> to vector<16x1xf32>
    %83 = vector.shape_cast %82 : vector<16x1xf32> to vector<16x1x1xf32>
    %cst_21 = arith.constant 9.99999974E-6 : f32
    %84 = vector.broadcast %cst_21 : f32 to vector<16x1x1xf32>
    %85 = arith.addf %83, %84 : vector<16x1x1xf32>
    %86 = vector.broadcast %85 : vector<16x1x1xf32> to vector<16x16x1xf32>
    %87 = arith.divf %81, %86 : vector<16x16x1xf32>
    %88 = vector.broadcast %87 : vector<16x16x1xf32> to vector<16x16x9xf32>
    %89 = arith.mulf %1, %88 : vector<16x16x9xf32>
    %90 = arith.addf %89, %1 : vector<16x16x9xf32>
    %91 = arith.truncf %90 : vector<16x16x9xf32> to vector<16x16x9xbf16>
    %c0_22 = arith.constant 0 : index
    %c0_23 = arith.constant 0 : index
    %c0_24 = arith.constant 0 : index
    %c0_25 = arith.constant 0 : index
    %92 = vector.load %arg7[%c0_22, %c0_23, %c0_24, %c0_25] : memref<1x16x16x9xbf16, #tpu.memory_space<vmem>>, vector<1x16x16x9xbf16>
    %93 = vector.shape_cast %92 : vector<1x16x16x9xbf16> to vector<16x16x9xbf16>
    %94 = vector.shape_cast %91 : vector<16x16x9xbf16> to vector<1x16x16x9xbf16>
    tpu.vector_store %arg7[%c0_22, %c0_23, %c0_24, %c0_25], %94 {strides = array<i32>} : memref<1x16x16x9xbf16, #tpu.memory_space<vmem>>, vector<1x16x16x9xbf16>,
    return
  }
  func.func @transform_0(%arg0: i32, %arg1: i32) -> (i32, i32, i32, i32) {
    %c0_i32 = arith.constant 0 : i32
    %c0_i32_0 = arith.constant 0 : i32
    %c0_i32_1 = arith.constant 0 : i32
    return %arg0, %arg1, %c0_i32, %c0_i32_0 : i32, i32, i32, i32
  }
  func.func @transform_1(%arg0: i32, %arg1: i32) -> (i32, i32) {
    %c0_i32 = arith.constant 0 : i32
    %c0_i32_0 = arith.constant 0 : i32
    %c0_i32_1 = arith.constant 0 : i32
    return %c0_i32, %c0_i32_0 : i32, i32
  }
  func.func @transform_2(%arg0: i32, %arg1: i32) -> (i32, i32) {
    %c0_i32 = arith.constant 0 : i32
    %c0_i32_0 = arith.constant 0 : i32
    %c0_i32_1 = arith.constant 0 : i32
    return %c0_i32, %c0_i32_0 : i32, i32
  }
  func.func @transform_3(%arg0: i32, %arg1: i32) -> (i32, i32) {
    %c0_i32 = arith.constant 0 : i32
    %c0_i32_0 = arith.constant 0 : i32
    %c0_i32_1 = arith.constant 0 : i32
    return %c0_i32, %c0_i32_0 : i32, i32
  }
  func.func @transform_4(%arg0: i32, %arg1: i32) -> (i32, i32) {
    %c0_i32 = arith.constant 0 : i32
    %c0_i32_0 = arith.constant 0 : i32
    %c0_i32_1 = arith.constant 0 : i32
    return %c0_i32, %c0_i32_0 : i32, i32
  }
  func.func @transform_5(%arg0: i32, %arg1: i32) -> (i32, i32, i32, i32) {
    %c0_i32 = arith.constant 0 : i32
    %c0_i32_0 = arith.constant 0 : i32
    %c0_i32_1 = arith.constant 0 : i32
    return %arg0, %arg1, %c0_i32, %c0_i32_0 : i32, i32, i32, i32
  }
}

</mosaic_0001>

<bundles_post_ra>
// kernel: tpu_custom_call.1
= control target key start
LH: loop header
LB: loop body
LE: loop exit
PB: predicated region body
PF: predicated region fallthrough
CT: control target
= control target key end

     0   :  { %s3555_s20 = smov 0   ;;  %s3557_s21 = smov 0   ;;  %s6381_s0 = inlined_call_operand.vmem [shape: f32[2,16,16,9], index: 0, kind: input, shape index: {}]   ;;  %s6382_s1 = inlined_call_operand.vmem [shape: f32[9,64], index: 1, kind: input, shape index: {}]   ;;  %s6383_s2 = inlined_call_operand.vmem [shape: f32[1,64], index: 2, kind: input, shape index: {}]   ;;  %s6384_s3 = inlined_call_operand.vmem [shape: f32[1,64], index: 3, kind: input, shape index: {}]   ;;  %s6385_s4 = inlined_call_operand.<no memory space> [shape: f32[1,1], index: 4, kind: input, shape index: {}]   ;;  %s6386_s5 = inlined_call_operand.vmem [shape: bf16[2,16,16,9], index: 5, kind: output, shape index: {}]  }
   0x1   :  { %v10_v0 = vstv %s6385_s4  ;;  %s3559_s22 = smov 0  }
   0x2   :  { %11 = vst [vmem:[#allocation2] sm:$0x1] %v10_v0 }
   0x3 LB: > { %s29_s4 = sadd.s32 1, %s3507_s21  ;;  %p3188_p0 = scmp.ge.s32.totalorder %s3511_s22, 1  ;;  %s3511_s22 = sphi %s3559_s22, %s17_s22   ;;  %s3507_s21 = sphi %s3557_s21, %s6949_s21   ;;  %s3503_s20 = sphi %s3555_s20, %s6948_s20  }
   0x4   : > { %p31_p1 = scmp.ge.s32.totalorder %s29_s4, 2  ;;  %p211_p2 = scmp.lt.s32.totalorder %s3511_s22, 3 }
   0x6   : > { %s6951_s4 = smov (%p31_p1, %s29_s4), 0  ;;  %p212_p3 = pnand %p3188_p0, %p211_p2 }
   0x8   : > { %215 = sbr.rel (%p212_p3) target bundleno = 1260 (0x4ec), region = 40 }
   0xd   : > { %p250_p4 = scmp.lt.s32.totalorder %s3503_s20, 1  ;;  %v3513_v1 = vmov 1   ;;  %v6387_v2 = vmov 0   ;;  %v3515_v35 = vmov 2   ;;  %v6389_v57 = vmov 3  }
   0xe   : > { %3233 = vset.pattern.permute.xlu0 %v3513_v1  ;;  %3231 = vset.pattern.permute.xlu2 %v6387_v2  ;;  %vm2153_vm0 = vcmask 523264   ;;  %vm2382_vm1 = vcmask 7168  }
   0xf   : > { %3230 = vset.pattern.permute.xlu1 %v6387_v2  ;;  %s6953_s20 = smov (!%p250_p4, %s3503_s20), 1 }
  0x10   : > { %s3195_s23 = sshll.u32 %s6953_s20, 8  ;;  %s3196_s30 = sshll.u32 %s6953_s20, 7 }
  0x11   : > { %s3582_s26 = scalar_lea.vmem %s6381_s0, %s3195_s23  ;;  %s6273_s8 = scalar_lea.vmem %s6386_s5, %s3196_s30 }
  0x12   : > { %v3585_v3 = vld [vmem:[%s3582_s26 + $0x20] sm:$0xff]  ;;  %v3588_v4 = vld [vmem:[%s3582_s26 + $0x10] sm:$0xff]  ;;  %v3591_v5 = vld [vmem:[%s3582_s26 + $0x8] sm:$0xff] }
  0x13   : > { %326 = vperm.xlu2 %3231, %v3585_v3   ;;  %316 = vperm.xlu1 %3230, %v3588_v4   ;;  %v3597_v6 = vld [vmem:[%s3582_s26 + $0x28] sm:$0xff]  ;;  %v3600_v7 = vld [vmem:[%s3582_s26 + $0x18] sm:$0xff]  ;;  %v3603_v8 = vld [vmem:[%s3582_s26 + $0x30] sm:$0xff] }
  0x14   : > { %503 = vperm.xlu0 %3233, %v3591_v5   ;;  %v3609_v9 = vld [vmem:[%s3582_s26 + $0x40] sm:$0xff]  ;;  %v3612_v10 = vld [vmem:[%s3582_s26 + $0x38] sm:$0xff]  ;;  %v3615_v11 = vld [vmem:[%s3582_s26 + $0x48] sm:$0xff] }
  0x15   : > { %v3621_v12 = vld [vmem:[%s3582_s26 + $0x58] sm:$0xff]  ;;  %v3624_v13 = vld [vmem:[%s3582_s26 + $0x50] sm:$0xff]  ;;  %v3627_v14 = vld [vmem:[%s3582_s26 + $0x60] sm:$0xff] }
  0x16   : > { %v3633_v15 = vld [vmem:[%s3582_s26 + $0x70] sm:$0xff]  ;;  %v3636_v16 = vld [vmem:[%s3582_s26 + $0x68] sm:$0xff]  ;;  %v3639_v17 = vld [vmem:[%s3582_s26 + $0x78] sm:$0xff] }
  0x17   : > { %v3645_v18 = vld [vmem:[%s3582_s26 + $0x88] sm:$0xff]  ;;  %v3648_v19 = vld [vmem:[%s3582_s26 + $0x80] sm:$0xff]  ;;  %v3651_v20 = vld [vmem:[%s3582_s26 + $0x90] sm:$0xff] }
  0x18   : > { %v3657_v21 = vld [vmem:[%s3582_s26 + $0xa0] sm:$0xff]  ;;  %v3660_v22 = vld [vmem:[%s3582_s26 + $0x98] sm:$0xff]  ;;  %v3663_v23 = vld [vmem:[%s3582_s26 + $0xa8] sm:$0xff] }
  0x19   : > { %v3669_v24 = vld [vmem:[%s3582_s26 + $0xb8] sm:$0xff]  ;;  %v3672_v25 = vld [vmem:[%s3582_s26 + $0xb0] sm:$0xff]  ;;  %v3675_v26 = vld [vmem:[%s3582_s26 + $0xc0] sm:$0xff] }
  0x1a   : > { %v3681_v27 = vld [vmem:[%s3582_s26 + $0xd0] sm:$0xff]  ;;  %v3684_v28 = vld [vmem:[%s3582_s26 + $0xc8] sm:$0xff]  ;;  %v3687_v29 = vld [vmem:[%s3582_s26 + $0xd8] sm:$0xff] }
  0x1b   : > { %331 = vperm.xlu2 %3231, %v3597_v6   ;;  %321 = vperm.xlu1 %3230, %v3600_v7   ;;  %v3693_v30 = vld [vmem:[%s3582_s26 + $0xe8] sm:$0xff]  ;;  %v3696_v31 = vld [vmem:[%s3582_s26 + $0xe0] sm:$0xff]  ;;  %v3699_v32 = vld [vmem:[%s3582_s26 + $0xf0] sm:$0xff] }
  0x1c   : > { %523 = vperm.xlu0 %3233, %v3603_v8   ;;  %v3705_v33 = vld [vmem:[%s3582_s26 + $0xf8] sm:$0xff]  ;;  %v3708_v34 = vld [vmem:[%s3582_s26] sm:$0xff] }
  0x23   : > { %346 = vperm.xlu2 %3231, %v3609_v9   ;;  %341 = vperm.xlu1 %3230, %v3612_v10  }
  0x24   : > { %535 = vperm.xlu0 %3233, %v3615_v11  }
  0x2b   : > { %361 = vperm.xlu2 %3231, %v3621_v12   ;;  %356 = vperm.xlu1 %3230, %v3624_v13  }
  0x2c   : > { %547 = vperm.xlu0 %3233, %v3627_v14  }
  0x33   : > { %376 = vperm.xlu2 %3231, %v3633_v15   ;;  %371 = vperm.xlu1 %3230, %v3636_v16  }
  0x34   : > { %559 = vperm.xlu0 %3233, %v3639_v17  }
  0x3b   : > { %391 = vperm.xlu2 %3231, %v3645_v18   ;;  %386 = vperm.xlu1 %3230, %v3648_v19  }
  0x3c   : > { %571 = vperm.xlu0 %3233, %v3651_v20  }
  0x43   : > { %406 = vperm.xlu2 %3231, %v3657_v21   ;;  %401 = vperm.xlu1 %3230, %v3660_v22  }
  0x44   : > { %583 = vperm.xlu0 %3233, %v3663_v23  }
  0x4b   : > { %421 = vperm.xlu2 %3231, %v3669_v24   ;;  %416 = vperm.xlu1 %3230, %v3672_v25  }
  0x4c   : > { %595 = vperm.xlu0 %3233, %v3675_v26  }
  0x53   : > { %436 = vperm.xlu2 %3231, %v3681_v27   ;;  %431 = vperm.xlu1 %3230, %v3684_v28  }
  0x54   : > { %607 = vperm.xlu0 %3233, %v3687_v29  }
  0x5b   : > { %451 = vperm.xlu2 %3231, %v3693_v30   ;;  %446 = vperm.xlu1 %3230, %v3696_v31  }
  0x5c   : > { %619 = vperm.xlu0 %3233, %v3699_v32  }
  0x63   : > { %3232 = vset.pattern.permute.xlu2 %v3513_v1  ;;  %461 = vperm.xlu1 %3230, %v3705_v33  }
  0x64   : > { %3236 = vset.pattern.permute.xlu0 %v3515_v35  ;;  %499 = vperm.xlu2 %3232, %v3708_v34  }
  0x65   : > { %697 = vperm.xlu0 %3236, %v3591_v5  }
  0x6b   : > { %3234 = vset.pattern.permute.xlu1 %v3513_v1 }
  0x6c   : > { %507 = vperm.xlu1 %3234, %v3588_v4   ;;  %511 = vperm.xlu2 %3232, %v3600_v7  }
  0x6d   : > { %717 = vperm.xlu0 %3236, %v3603_v8   ;;  %v3719_v36 = vpop.permute.xlu2 %326 }
  0x74   : > { %515 = vperm.xlu1 %3234, %v3585_v3   ;;  %519 = vperm.xlu2 %3232, %v3597_v6  }
  0x75   : > { %729 = vperm.xlu0 %3236, %v3615_v11   ;;  %v3724_v37 = vpop.permute.xlu2 %331 }
  0x7c   : > { %527 = vperm.xlu1 %3234, %v3612_v10   ;;  %531 = vperm.xlu2 %3232, %v3609_v9  }
  0x7d   : > { %741 = vperm.xlu0 %3236, %v3627_v14   ;;  %v3729_v38 = vpop.permute.xlu2 %346 }
  0x84   : > { %539 = vperm.xlu1 %3234, %v3624_v13   ;;  %543 = vperm.xlu2 %3232, %v3621_v12  }
  0x85   : > { %753 = vperm.xlu0 %3236, %v3639_v17   ;;  %v3734_v39 = vpop.permute.xlu2 %361  ;;  %v3736_v40 = vpop.permute.xlu1 %316 }
  0x86   : > { %v3738_v41 = vpop.permute.xlu0 %503 }
  0x8c   : > { %551 = vperm.xlu1 %3234, %v3636_v16   ;;  %555 = vperm.xlu2 %3232, %v3633_v15  }
  0x8d   : > { %765 = vperm.xlu0 %3236, %v3651_v20   ;;  %v3743_v42 = vpop.permute.xlu2 %376  ;;  %v3745_v43 = vpop.permute.xlu1 %321 }
  0x8e   : > { %v3747_v44 = vpop.permute.xlu0 %523 }
  0x94   : > { %563 = vperm.xlu1 %3234, %v3648_v19   ;;  %567 = vperm.xlu2 %3232, %v3645_v18  }
  0x95   : > { %777 = vperm.xlu0 %3236, %v3663_v23   ;;  %v3752_v45 = vpop.permute.xlu2 %391  ;;  %v3754_v46 = vpop.permute.xlu1 %341 }
  0x96   : > { %v3756_v47 = vpop.permute.xlu0 %535 }
  0x9c   : > { %575 = vperm.xlu1 %3234, %v3660_v22   ;;  %579 = vperm.xlu2 %3232, %v3657_v21  }
  0x9d   : > { %789 = vperm.xlu0 %3236, %v3675_v26   ;;  %v3761_v48 = vpop.permute.xlu2 %406  ;;  %v3763_v49 = vpop.permute.xlu1 %356 }
  0x9e   : > { %v3765_v50 = vpop.permute.xlu0 %547 }
  0xa4   : > { %587 = vperm.xlu1 %3234, %v3672_v25   ;;  %591 = vperm.xlu2 %3232, %v3669_v24  }
  0xa5   : > { %801 = vperm.xlu0 %3236, %v3687_v29   ;;  %v3770_v51 = vpop.permute.xlu2 %421  ;;  %v3772_v52 = vpop.permute.xlu1 %371 }
  0xa6   : > { %v3774_v53 = vpop.permute.xlu0 %559 }
  0xac   : > { %599 = vperm.xlu1 %3234, %v3684_v28   ;;  %603 = vperm.xlu2 %3232, %v3681_v27  }
  0xad   : > { %813 = vperm.xlu0 %3236, %v3699_v32   ;;  %v3779_v54 = vpop.permute.xlu2 %436  ;;  %v3781_v55 = vpop.permute.xlu1 %386 }
  0xae   : > { %v3783_v56 = vpop.permute.xlu0 %571 }
  0xb4   : > { %611 = vperm.xlu1 %3234, %v3696_v31   ;;  %615 = vperm.xlu2 %3232, %v3693_v30  }
  0xb5   : > { %3239 = vset.pattern.permute.xlu0 %v6389_v57  ;;  %v3788_v58 = vpop.permute.xlu2 %451  ;;  %v3790_v59 = vpop.permute.xlu1 %401 }
  0xb6   : > { %891 = vperm.xlu0 %3239, %v3591_v5   ;;  %v3793_v60 = vpop.permute.xlu0 %583 }
  0xb7   : > { %6401 = vst [vmem:[#allocation3_spill] sm:$0xff] %v3793_v60 }
  0xbc   : > { %623 = vperm.xlu1 %3234, %v3705_v33   ;;  %3235 = vset.pattern.permute.xlu2 %v3515_v35 }
  0xbd   : > { %v3797_v61 = vpop.permute.xlu1 %416  ;;  %693 = vperm.xlu2 %3235, %v3708_v34  }
  0xbe   : > { %6402 = vst [vmem:[#allocation4_spill] sm:$0xff] %v3797_v61  ;;  %911 = vperm.xlu0 %3239, %v3603_v8   ;;  %v3801_v62 = vpop.permute.xlu0 %595  ;;  %v3803_v63 = vpop.permute.xlu2 %499 }
  0xbf   : > { %6403 = vst [vmem:[#allocation5_spill] sm:$0xff] %v3801_v62 }
  0xc0   : > { %6404 = vst [vmem:[#allocation6_spill] sm:$0xff] %v3803_v63 }
  0xc4   : > { %3237 = vset.pattern.permute.xlu1 %v3515_v35 }
  0xc5   : > { %701 = vperm.xlu1 %3237, %v3588_v4   ;;  %v3807_v0 = vpop.permute.xlu1 %431  ;;  %705 = vperm.xlu2 %3235, %v3600_v7  }
  0xc6   : > { %6405 = vst [vmem:[#allocation7_spill] sm:$0xff] %v3807_v0  ;;  %923 = vperm.xlu0 %3239, %v3615_v11   ;;  %v3811_v1 = vpop.permute.xlu0 %607  ;;  %v3813_v2 = vpop.permute.xlu2 %511 }
  0xc7   : > { %6406 = vst [vmem:[#allocation8_spill] sm:$0xff] %v3811_v1 }
  0xcd   : > { %709 = vperm.xlu1 %3237, %v3585_v3   ;;  %v3816_v57 = vpop.permute.xlu1 %446  ;;  %713 = vperm.xlu2 %3235, %v3597_v6  }
  0xce   : > { %6407 = vst [vmem:[#allocation9_spill] sm:$0xff] %v3816_v57  ;;  %935 = vperm.xlu0 %3239, %v3627_v14   ;;  %v3820_v35 = vpop.permute.xlu0 %619  ;;  %v3822_v63 = vpop.permute.xlu2 %519 }
  0xcf   : > { %6408 = vst [vmem:[#allocation10_spill] sm:$0xff] %v3820_v35 }
  0xd5   : > { %721 = vperm.xlu1 %3237, %v3612_v10   ;;  %v3825_v0 = vpop.permute.xlu1 %461  ;;  %725 = vperm.xlu2 %3235, %v3609_v9  }
  0xd6   : > { %6409 = vst [vmem:[#allocation11_spill] sm:$0xff] %v3825_v0  ;;  %947 = vperm.xlu0 %3239, %v3639_v17   ;;  %v3829_v1 = vpop.permute.xlu2 %531 }
  0xd7   : > { %6410 = vst [vmem:[#allocation12_spill] sm:$0xff] %v3829_v1  ;;  %v3831_v62 = vpop.permute.xlu0 %697 }
  0xd8   : > { %6411 = vst [vmem:[#allocation13_spill] sm:$0xff] %v3831_v62 }
  0xdd   : > { %733 = vperm.xlu1 %3237, %v3624_v13   ;;  %737 = vperm.xlu2 %3235, %v3621_v12  }
  0xde   : > { %959 = vperm.xlu0 %3239, %v3651_v20   ;;  %v3836_v35 = vpop.permute.xlu1 %507  ;;  %v3838_v57 = vpop.permute.xlu2 %543 }
  0xdf   : > { %6412 = vst [vmem:[#allocation14_spill] sm:$0xff] %v3836_v35  ;;  %v3840_v61 = vpop.permute.xlu0 %717 }
  0xe0   : > { %6413 = vst [vmem:[#allocation15_spill] sm:$0xff] %v3838_v57 }
  0xe1   : > { %6414 = vst [vmem:[#allocation16_spill] sm:$0xff] %v3840_v61 }
  0xe5   : > { %745 = vperm.xlu1 %3237, %v3636_v16   ;;  %749 = vperm.xlu2 %3235, %v3633_v15  }
  0xe6   : > { %971 = vperm.xlu0 %3239, %v3663_v23   ;;  %v3845_v0 = vpop.permute.xlu1 %515  ;;  %v3847_v62 = vpop.permute.xlu2 %555 }
  0xe7   : > { %6415 = vst [vmem:[#allocation17_spill] sm:$0xff] %v3845_v0  ;;  %v3849_v1 = vpop.permute.xlu0 %729 }
  0xe8   : > { %6416 = vst [vmem:[#allocation18_spill] sm:$0xff] %v3847_v62 }
  0xe9   : > { %6417 = vst [vmem:[#allocation19_spill] sm:$0xff] %v3849_v1 }
  0xed   : > { %757 = vperm.xlu1 %3237, %v3648_v19   ;;  %761 = vperm.xlu2 %3235, %v3645_v18  }
  0xee   : > { %983 = vperm.xlu0 %3239, %v3675_v26   ;;  %v3854_v57 = vpop.permute.xlu1 %527  ;;  %v3856_v61 = vpop.permute.xlu2 %567 }
  0xef   : > { %6418 = vst [vmem:[#allocation20_spill] sm:$0xff] %v3854_v57  ;;  %v3858_v35 = vpop.permute.xlu0 %741 }
  0xf0   : > { %6419 = vst [vmem:[#allocation21_spill] sm:$0xff] %v3856_v61 }
  0xf1   : > { %6420 = vst [vmem:[#allocation22_spill] sm:$0xff] %v3858_v35 }
  0xf5   : > { %769 = vperm.xlu1 %3237, %v3660_v22   ;;  %773 = vperm.xlu2 %3235, %v3657_v21  }
  0xf6   : > { %995 = vperm.xlu0 %3239, %v3687_v29   ;;  %v3863_v62 = vpop.permute.xlu1 %539  ;;  %v3865_v1 = vpop.permute.xlu2 %579 }
  0xf7   : > { %6421 = vst [vmem:[#allocation23_spill] sm:$0xff] %v3863_v62  ;;  %v3867_v0 = vpop.permute.xlu0 %753  ;;  %v6391_v62 = vmov 4  }
  0xf8   : > { %6422 = vst [vmem:[#allocation24_spill] sm:$0xff] %v3865_v1 }
  0xf9   : > { %6423 = vst [vmem:[#allocation25_spill] sm:$0xff] %v3867_v0 }
  0xfd   : > { %781 = vperm.xlu1 %3237, %v3672_v25   ;;  %785 = vperm.xlu2 %3235, %v3669_v24  }
  0xfe   : > { %1007 = vperm.xlu0 %3239, %v3699_v32   ;;  %v3872_v61 = vpop.permute.xlu1 %551  ;;  %v3874_v35 = vpop.permute.xlu2 %591 }
  0xff   : > { %6424 = vst [vmem:[#allocation26_spill] sm:$0xff] %v3872_v61  ;;  %v3876_v57 = vpop.permute.xlu0 %765 }
 0x100   : > { %6425 = vst [vmem:[#allocation27_spill] sm:$0xff] %v3874_v35 }
 0x101   : > { %6426 = vst [vmem:[#allocation28_spill] sm:$0xff] %v3876_v57 }
 0x105   : > { %793 = vperm.xlu1 %3237, %v3684_v28   ;;  %797 = vperm.xlu2 %3235, %v3681_v27  }
 0x106   : > { %3242 = vset.pattern.permute.xlu0 %v6391_v62  ;;  %v3881_v0 = vpop.permute.xlu1 %563  ;;  %v3883_v1 = vpop.permute.xlu2 %603  ;;  %v6433_v62 = vmov 3  }
 0x107   : > { %6427 = vst [vmem:[#allocation29_spill] sm:$0xff] %v3881_v0  ;;  %1085 = vperm.xlu0 %3242, %v3591_v5   ;;  %v3886_v60 = vpop.permute.xlu0 %777 }
 0x108   : > { %6428 = vst [vmem:[#allocation30_spill] sm:$0xff] %v3883_v1 }
 0x109   : > { %6429 = vst [vmem:[#allocation31_spill] sm:$0xff] %v3886_v60 }
 0x10d   : > { %805 = vperm.xlu1 %3237, %v3696_v31   ;;  %809 = vperm.xlu2 %3235, %v3693_v30  }
 0x10e   : > { %v3890_v57 = vpop.permute.xlu1 %575  ;;  %v3892_v35 = vpop.permute.xlu2 %615 }
 0x10f   : > { %6430 = vst [vmem:[#allocation32_spill] sm:$0xff] %v3890_v57  ;;  %1105 = vperm.xlu0 %3242, %v3603_v8   ;;  %v3895_v61 = vpop.permute.xlu0 %789 }
 0x110   : > { %6431 = vst [vmem:[#allocation33_spill] sm:$0xff] %v3892_v35 }
 0x111   : > { %6432 = vst [vmem:[#allocation34_spill] sm:$0xff] %v3895_v61 }
 0x115   : > { %817 = vperm.xlu1 %3237, %v3705_v33   ;;  %3238 = vset.pattern.permute.xlu2 %v6433_v62 }
 0x116   : > { %v3899_v1 = vpop.permute.xlu1 %587  ;;  %887 = vperm.xlu2 %3238, %v3708_v34  }
 0x117   : > { %6434 = vst [vmem:[#allocation35_spill] sm:$0xff] %v3899_v1  ;;  %1117 = vperm.xlu0 %3242, %v3615_v11   ;;  %v3903_v60 = vpop.permute.xlu0 %801  ;;  %v3905_v0 = vpop.permute.xlu2 %693 }
 0x118   : > { %6435 = vst [vmem:[#allocation36_spill] sm:$0xff] %v3903_v60 }
 0x119   : > { %6436 = vst [vmem:[#allocation37_spill] sm:$0xff] %v3905_v0 }
 0x11d   : > { %3240 = vset.pattern.permute.xlu1 %v6433_v62 }
 0x11e   : > { %895 = vperm.xlu1 %3240, %v3588_v4   ;;  %v3909_v35 = vpop.permute.xlu1 %599  ;;  %899 = vperm.xlu2 %3238, %v3600_v7  }
 0x11f   : > { %6437 = vst [vmem:[#allocation38_spill] sm:$0xff] %v3909_v35  ;;  %1129 = vperm.xlu0 %3242, %v3627_v14   ;;  %v3913_v61 = vpop.permute.xlu0 %813  ;;  %v3915_v1 = vpop.permute.xlu2 %705 }
 0x120   : > { %6438 = vst [vmem:[#allocation39_spill] sm:$0xff] %v3913_v61 }
 0x121   : > { %6439 = vst [vmem:[#allocation40_spill] sm:$0xff] %v3915_v1 }
 0x126   : > { %903 = vperm.xlu1 %3240, %v3585_v3   ;;  %v3918_v57 = vpop.permute.xlu1 %611  ;;  %907 = vperm.xlu2 %3238, %v3597_v6  }
 0x127   : > { %6440 = vst [vmem:[#allocation41_spill] sm:$0xff] %v3918_v57  ;;  %1141 = vperm.xlu0 %3242, %v3639_v17   ;;  %v3922_v62 = vpop.permute.xlu2 %713 }
 0x128   : > { %6441 = vst [vmem:[#allocation42_spill] sm:$0xff] %v3922_v62  ;;  %v3924_v0 = vpop.permute.xlu0 %891 }
 0x129   : > { %6442 = vst [vmem:[#allocation43_spill] sm:$0xff] %v3924_v0 }
 0x12e   : > { %915 = vperm.xlu1 %3240, %v3612_v10   ;;  %v3927_v60 = vpop.permute.xlu1 %623  ;;  %919 = vperm.xlu2 %3238, %v3609_v9  }
 0x12f   : > { %6443 = vst [vmem:[#allocation44_spill] sm:$0xff] %v3927_v60  ;;  %1153 = vperm.xlu0 %3242, %v3651_v20   ;;  %v3931_v61 = vpop.permute.xlu2 %725 }
 0x130   : > { %6444 = vst [vmem:[#allocation45_spill] sm:$0xff] %v3931_v61  ;;  %v3933_v1 = vpop.permute.xlu0 %911 }
 0x131   : > { %6445 = vst [vmem:[#allocation46_spill] sm:$0xff] %v3933_v1 }
 0x136   : > { %927 = vperm.xlu1 %3240, %v3624_v13   ;;  %931 = vperm.xlu2 %3238, %v3621_v12  }
 0x137   : > { %1165 = vperm.xlu0 %3242, %v3663_v23   ;;  %v3938_v62 = vpop.permute.xlu1 %701  ;;  %v3940_v0 = vpop.permute.xlu2 %737 }
 0x138   : > { %6446 = vst [vmem:[#allocation47_spill] sm:$0xff] %v3938_v62  ;;  %v3942_v57 = vpop.permute.xlu0 %923 }
 0x139   : > { %6447 = vst [vmem:[#allocation48_spill] sm:$0xff] %v3940_v0 }
 0x13a   : > { %6448 = vst [vmem:[#allocation49_spill] sm:$0xff] %v3942_v57 }
 0x13e   : > { %939 = vperm.xlu1 %3240, %v3636_v16   ;;  %943 = vperm.xlu2 %3238, %v3633_v15  }
 0x13f   : > { %1177 = vperm.xlu0 %3242, %v3675_v26   ;;  %v3947_v61 = vpop.permute.xlu1 %709  ;;  %v3949_v1 = vpop.permute.xlu2 %749 }
 0x140   : > { %6449 = vst [vmem:[#allocation50_spill] sm:$0xff] %v3947_v61  ;;  %v3951_v60 = vpop.permute.xlu0 %935 }
 0x141   : > { %6450 = vst [vmem:[#allocation51_spill] sm:$0xff] %v3949_v1 }
 0x142   : > { %6451 = vst [vmem:[#allocation52_spill] sm:$0xff] %v3951_v60 }
 0x146   : > { %951 = vperm.xlu1 %3240, %v3648_v19   ;;  %955 = vperm.xlu2 %3238, %v3645_v18  }
 0x147   : > { %1189 = vperm.xlu0 %3242, %v3687_v29   ;;  %v3956_v0 = vpop.permute.xlu1 %721  ;;  %v3958_v57 = vpop.permute.xlu2 %761 }
 0x148   : > { %6452 = vst [vmem:[#allocation53_spill] sm:$0xff] %v3956_v0  ;;  %v3960_v62 = vpop.permute.xlu0 %947  ;;  %v6393_v0 = vmov 5  }
 0x149   : > { %6453 = vst [vmem:[#allocation54_spill] sm:$0xff] %v3958_v57 }
 0x14a   : > { %6454 = vst [vmem:[#allocation55_spill] sm:$0xff] %v3960_v62 }
 0x14e   : > { %963 = vperm.xlu1 %3240, %v3660_v22   ;;  %967 = vperm.xlu2 %3238, %v3657_v21  }
 0x14f   : > { %1201 = vperm.xlu0 %3242, %v3699_v32   ;;  %v3965_v1 = vpop.permute.xlu1 %733  ;;  %v3967_v60 = vpop.permute.xlu2 %773 }
 0x150   : > { %6455 = vst [vmem:[#allocation56_spill] sm:$0xff] %v3965_v1  ;;  %v3969_v61 = vpop.permute.xlu0 %959 }
 0x151   : > { %6456 = vst [vmem:[#allocation57_spill] sm:$0xff] %v3967_v60 }
 0x152   : > { %6457 = vst [vmem:[#allocation58_spill] sm:$0xff] %v3969_v61 }
 0x156   : > { %975 = vperm.xlu1 %3240, %v3672_v25   ;;  %979 = vperm.xlu2 %3238, %v3669_v24  }
 0x157   : > { %3245 = vset.pattern.permute.xlu0 %v6393_v0  ;;  %v3974_v62 = vpop.permute.xlu1 %745  ;;  %v3976_v57 = vpop.permute.xlu2 %785 }
 0x158   : > { %6458 = vst [vmem:[#allocation59_spill] sm:$0xff] %v3974_v62  ;;  %1279 = vperm.xlu0 %3245, %v3591_v5   ;;  %v3979_v35 = vpop.permute.xlu0 %971 }
 0x159   : > { %6459 = vst [vmem:[#allocation60_spill] sm:$0xff] %v3976_v57 }
 0x15a   : > { %6460 = vst [vmem:[#allocation61_spill] sm:$0xff] %v3979_v35 }
 0x15e   : > { %987 = vperm.xlu1 %3240, %v3684_v28   ;;  %991 = vperm.xlu2 %3238, %v3681_v27  }
 0x15f   : > { %v3983_v61 = vpop.permute.xlu1 %757  ;;  %v3985_v60 = vpop.permute.xlu2 %797 }
 0x160   : > { %6461 = vst [vmem:[#allocation62_spill] sm:$0xff] %v3983_v61  ;;  %1299 = vperm.xlu0 %3245, %v3603_v8   ;;  %v3988_v1 = vpop.permute.xlu0 %983  ;;  %v6467_v61 = vmov 4  }
 0x161   : > { %6462 = vst [vmem:[#allocation63_spill] sm:$0xff] %v3985_v60 }
 0x162   : > { %6463 = vst [vmem:[#allocation64_spill] sm:$0xff] %v3988_v1 }
 0x166   : > { %999 = vperm.xlu1 %3240, %v3696_v31   ;;  %1003 = vperm.xlu2 %3238, %v3693_v30  }
 0x167   : > { %v3992_v0 = vpop.permute.xlu1 %769  ;;  %v3994_v57 = vpop.permute.xlu2 %809 }
 0x168   : > { %6464 = vst [vmem:[#allocation65_spill] sm:$0xff] %v3992_v0  ;;  %1311 = vperm.xlu0 %3245, %v3615_v11   ;;  %v3997_v35 = vpop.permute.xlu0 %995 }
 0x169   : > { %6465 = vst [vmem:[#allocation66_spill] sm:$0xff] %v3994_v57 }
 0x16a   : > { %6466 = vst [vmem:[#allocation67_spill] sm:$0xff] %v3997_v35 }
 0x16e   : > { %1011 = vperm.xlu1 %3240, %v3705_v33   ;;  %3241 = vset.pattern.permute.xlu2 %v6467_v61 }
 0x16f   : > { %v4001_v60 = vpop.permute.xlu1 %781  ;;  %1081 = vperm.xlu2 %3241, %v3708_v34  }
 0x170   : > { %6468 = vst [vmem:[#allocation68_spill] sm:$0xff] %v4001_v60  ;;  %1323 = vperm.xlu0 %3245, %v3627_v14   ;;  %v4005_v1 = vpop.permute.xlu0 %1007  ;;  %v4007_v62 = vpop.permute.xlu2 %887 }
 0x171   : > { %6469 = vst [vmem:[#allocation69_spill] sm:$0xff] %v4005_v1 }
 0x172   : > { %6470 = vst [vmem:[#allocation70_spill] sm:$0xff] %v4007_v62 }
 0x176   : > { %3243 = vset.pattern.permute.xlu1 %v6467_v61 }
 0x177   : > { %1089 = vperm.xlu1 %3243, %v3588_v4   ;;  %v4011_v57 = vpop.permute.xlu1 %793  ;;  %1093 = vperm.xlu2 %3241, %v3600_v7  }
 0x178   : > { %6471 = vst [vmem:[#allocation71_spill] sm:$0xff] %v4011_v57  ;;  %1335 = vperm.xlu0 %3245, %v3639_v17   ;;  %v4015_v35 = vpop.permute.xlu2 %899 }
 0x179   : > { %6472 = vst [vmem:[#allocation72_spill] sm:$0xff] %v4015_v35  ;;  %v4017_v60 = vpop.permute.xlu0 %1085 }
 0x17a   : > { %6473 = vst [vmem:[#allocation73_spill] sm:$0xff] %v4017_v60 }
 0x17f   : > { %1097 = vperm.xlu1 %3243, %v3585_v3   ;;  %v4020_v0 = vpop.permute.xlu1 %805  ;;  %1101 = vperm.xlu2 %3241, %v3597_v6  }
 0x180   : > { %6474 = vst [vmem:[#allocation74_spill] sm:$0xff] %v4020_v0  ;;  %1347 = vperm.xlu0 %3245, %v3651_v20   ;;  %v4024_v61 = vpop.permute.xlu2 %907 }
 0x181   : > { %6475 = vst [vmem:[#allocation75_spill] sm:$0xff] %v4024_v61  ;;  %v4026_v62 = vpop.permute.xlu0 %1105 }
 0x182   : > { %6476 = vst [vmem:[#allocation76_spill] sm:$0xff] %v4026_v62 }
 0x187   : > { %1109 = vperm.xlu1 %3243, %v3612_v10   ;;  %v4029_v1 = vpop.permute.xlu1 %817  ;;  %1113 = vperm.xlu2 %3241, %v3609_v9  }
 0x188   : > { %6477 = vst [vmem:[#allocation77_spill] sm:$0xff] %v4029_v1  ;;  %1359 = vperm.xlu0 %3245, %v3663_v23   ;;  %v4033_v60 = vpop.permute.xlu2 %919 }
 0x189   : > { %6478 = vst [vmem:[#allocation78_spill] sm:$0xff] %v4033_v60  ;;  %v4035_v35 = vpop.permute.xlu0 %1117 }
 0x18a   : > { %6479 = vst [vmem:[#allocation79_spill] sm:$0xff] %v4035_v35 }
 0x18f   : > { %1121 = vperm.xlu1 %3243, %v3624_v13   ;;  %1125 = vperm.xlu2 %3241, %v3621_v12  }
 0x190   : > { %1371 = vperm.xlu0 %3245, %v3675_v26   ;;  %v4040_v61 = vpop.permute.xlu1 %895  ;;  %v4042_v62 = vpop.permute.xlu2 %931 }
 0x191   : > { %6480 = vst [vmem:[#allocation80_spill] sm:$0xff] %v4040_v61  ;;  %v4044_v0 = vpop.permute.xlu0 %1129 }
 0x192   : > { %6481 = vst [vmem:[#allocation81_spill] sm:$0xff] %v4042_v62 }
 0x193   : > { %6482 = vst [vmem:[#allocation82_spill] sm:$0xff] %v4044_v0 }
 0x197   : > { %1133 = vperm.xlu1 %3243, %v3636_v16   ;;  %1137 = vperm.xlu2 %3241, %v3633_v15  }
 0x198   : > { %1383 = vperm.xlu0 %3245, %v3687_v29   ;;  %v4049_v60 = vpop.permute.xlu1 %903  ;;  %v4051_v35 = vpop.permute.xlu2 %943 }
 0x199   : > { %6483 = vst [vmem:[#allocation83_spill] sm:$0xff] %v4049_v60  ;;  %v4053_v1 = vpop.permute.xlu0 %1141  ;;  %v6395_v60 = vmov 6  }
 0x19a   : > { %6484 = vst [vmem:[#allocation84_spill] sm:$0xff] %v4051_v35 }
 0x19b   : > { %6485 = vst [vmem:[#allocation85_spill] sm:$0xff] %v4053_v1 }
 0x19f   : > { %1145 = vperm.xlu1 %3243, %v3648_v19   ;;  %1149 = vperm.xlu2 %3241, %v3645_v18  }
 0x1a0   : > { %1395 = vperm.xlu0 %3245, %v3699_v32   ;;  %v4058_v62 = vpop.permute.xlu1 %915  ;;  %v4060_v0 = vpop.permute.xlu2 %955 }
 0x1a1   : > { %6486 = vst [vmem:[#allocation86_spill] sm:$0xff] %v4058_v62  ;;  %v4062_v61 = vpop.permute.xlu0 %1153 }
 0x1a2   : > { %6487 = vst [vmem:[#allocation87_spill] sm:$0xff] %v4060_v0 }
 0x1a3   : > { %6488 = vst [vmem:[#allocation88_spill] sm:$0xff] %v4062_v61 }
 0x1a7   : > { %1157 = vperm.xlu1 %3243, %v3660_v22   ;;  %1161 = vperm.xlu2 %3241, %v3657_v21  }
 0x1a8   : > { %3248 = vset.pattern.permute.xlu0 %v6395_v60  ;;  %v4067_v1 = vpop.permute.xlu1 %927  ;;  %v4069_v35 = vpop.permute.xlu2 %967 }
 0x1a9   : > { %6489 = vst [vmem:[#allocation89_spill] sm:$0xff] %v4067_v1  ;;  %1473 = vperm.xlu0 %3248, %v3591_v5   ;;  %v4072_v57 = vpop.permute.xlu0 %1165 }
 0x1aa   : > { %6490 = vst [vmem:[#allocation90_spill] sm:$0xff] %v4069_v35 }
 0x1ab   : > { %6491 = vst [vmem:[#allocation91_spill] sm:$0xff] %v4072_v57 }
 0x1af   : > { %1169 = vperm.xlu1 %3243, %v3672_v25   ;;  %1173 = vperm.xlu2 %3241, %v3669_v24  }
 0x1b0   : > { %v4076_v61 = vpop.permute.xlu1 %939  ;;  %v4078_v0 = vpop.permute.xlu2 %979 }
 0x1b1   : > { %6492 = vst [vmem:[#allocation92_spill] sm:$0xff] %v4076_v61  ;;  %1493 = vperm.xlu0 %3248, %v3603_v8   ;;  %v4081_v62 = vpop.permute.xlu0 %1177 }
 0x1b2   : > { %6493 = vst [vmem:[#allocation93_spill] sm:$0xff] %v4078_v0 }
 0x1b3   : > { %6494 = vst [vmem:[#allocation94_spill] sm:$0xff] %v4081_v62 }
 0x1b7   : > { %1181 = vperm.xlu1 %3243, %v3684_v28   ;;  %1185 = vperm.xlu2 %3241, %v3681_v27  }
 0x1b8   : > { %v4085_v60 = vpop.permute.xlu1 %951  ;;  %v4087_v35 = vpop.permute.xlu2 %991 }
 0x1b9   : > { %6495 = vst [vmem:[#allocation95_spill] sm:$0xff] %v4085_v60  ;;  %1505 = vperm.xlu0 %3248, %v3615_v11   ;;  %v4090_v57 = vpop.permute.xlu0 %1189  ;;  %v6501_v60 = vmov 5  }
 0x1ba   : > { %6496 = vst [vmem:[#allocation96_spill] sm:$0xff] %v4087_v35 }
 0x1bb   : > { %6497 = vst [vmem:[#allocation97_spill] sm:$0xff] %v4090_v57 }
 0x1bf   : > { %1193 = vperm.xlu1 %3243, %v3696_v31   ;;  %1197 = vperm.xlu2 %3241, %v3693_v30  }
 0x1c0   : > { %v4094_v0 = vpop.permute.xlu1 %963  ;;  %v4096_v61 = vpop.permute.xlu2 %1003 }
 0x1c1   : > { %6498 = vst [vmem:[#allocation98_spill] sm:$0xff] %v4094_v0  ;;  %1517 = vperm.xlu0 %3248, %v3627_v14   ;;  %v4099_v62 = vpop.permute.xlu0 %1201 }
 0x1c2   : > { %6499 = vst [vmem:[#allocation99_spill] sm:$0xff] %v4096_v61 }
 0x1c3   : > { %6500 = vst [vmem:[#allocation100_spill] sm:$0xff] %v4099_v62 }
 0x1c7   : > { %1205 = vperm.xlu1 %3243, %v3705_v33   ;;  %3244 = vset.pattern.permute.xlu2 %v6501_v60 }
 0x1c8   : > { %v4103_v35 = vpop.permute.xlu1 %975  ;;  %1275 = vperm.xlu2 %3244, %v3708_v34  }
 0x1c9   : > { %6502 = vst [vmem:[#allocation101_spill] sm:$0xff] %v4103_v35  ;;  %1529 = vperm.xlu0 %3248, %v3639_v17   ;;  %v4107_v57 = vpop.permute.xlu2 %1081 }
 0x1ca   : > { %6503 = vst [vmem:[#allocation102_spill] sm:$0xff] %v4107_v57  ;;  %v4109_v1 = vpop.permute.xlu0 %1279 }
 0x1cb   : > { %6504 = vst [vmem:[#allocation103_spill] sm:$0xff] %v4109_v1 }
 0x1cf   : > { %3246 = vset.pattern.permute.xlu1 %v6501_v60 }
 0x1d0   : > { %1283 = vperm.xlu1 %3246, %v3588_v4   ;;  %v4113_v61 = vpop.permute.xlu1 %987  ;;  %1287 = vperm.xlu2 %3244, %v3600_v7  }
 0x1d1   : > { %6505 = vst [vmem:[#allocation104_spill] sm:$0xff] %v4113_v61  ;;  %1541 = vperm.xlu0 %3248, %v3651_v20   ;;  %v4117_v62 = vpop.permute.xlu2 %1093 }
 0x1d2   : > { %6506 = vst [vmem:[#allocation105_spill] sm:$0xff] %v4117_v62  ;;  %v4119_v35 = vpop.permute.xlu0 %1299 }
 0x1d3   : > { %6507 = vst [vmem:[#allocation106_spill] sm:$0xff] %v4119_v35 }
 0x1d8   : > { %1291 = vperm.xlu1 %3246, %v3585_v3   ;;  %v4122_v0 = vpop.permute.xlu1 %999  ;;  %1295 = vperm.xlu2 %3244, %v3597_v6  }
 0x1d9   : > { %6508 = vst [vmem:[#allocation107_spill] sm:$0xff] %v4122_v0  ;;  %1553 = vperm.xlu0 %3248, %v3663_v23   ;;  %v4126_v60 = vpop.permute.xlu2 %1101 }
 0x1da   : > { %6509 = vst [vmem:[#allocation108_spill] sm:$0xff] %v4126_v60  ;;  %v4128_v1 = vpop.permute.xlu0 %1311 }
 0x1db   : > { %6510 = vst [vmem:[#allocation109_spill] sm:$0xff] %v4128_v1 }
 0x1e0   : > { %1303 = vperm.xlu1 %3246, %v3612_v10   ;;  %v4131_v57 = vpop.permute.xlu1 %1011  ;;  %1307 = vperm.xlu2 %3244, %v3609_v9  }
 0x1e1   : > { %6511 = vst [vmem:[#allocation110_spill] sm:$0xff] %v4131_v57  ;;  %1565 = vperm.xlu0 %3248, %v3675_v26   ;;  %v4135_v35 = vpop.permute.xlu2 %1113 }
 0x1e2   : > { %6512 = vst [vmem:[#allocation111_spill] sm:$0xff] %v4135_v35  ;;  %v4137_v62 = vpop.permute.xlu0 %1323 }
 0x1e3   : > { %6513 = vst [vmem:[#allocation112_spill] sm:$0xff] %v4137_v62 }
 0x1e8   : > { %1315 = vperm.xlu1 %3246, %v3624_v13   ;;  %1319 = vperm.xlu2 %3244, %v3621_v12  }
 0x1e9   : > { %1577 = vperm.xlu0 %3248, %v3687_v29   ;;  %v4142_v60 = vpop.permute.xlu1 %1089  ;;  %v4144_v1 = vpop.permute.xlu2 %1125 }
 0x1ea   : > { %6514 = vst [vmem:[#allocation113_spill] sm:$0xff] %v4142_v60  ;;  %v4146_v0 = vpop.permute.xlu0 %1335  ;;  %v6397_v60 = vmov 7  }
 0x1eb   : > { %6515 = vst [vmem:[#allocation114_spill] sm:$0xff] %v4144_v1 }
 0x1ec   : > { %6516 = vst [vmem:[#allocation115_spill] sm:$0xff] %v4146_v0 }
 0x1f0   : > { %1327 = vperm.xlu1 %3246, %v3636_v16   ;;  %1331 = vperm.xlu2 %3244, %v3633_v15  }
 0x1f1   : > { %1589 = vperm.xlu0 %3248, %v3699_v32   ;;  %v4151_v35 = vpop.permute.xlu1 %1097  ;;  %v4153_v62 = vpop.permute.xlu2 %1137 }
 0x1f2   : > { %6517 = vst [vmem:[#allocation116_spill] sm:$0xff] %v4151_v35  ;;  %v4155_v57 = vpop.permute.xlu0 %1347 }
 0x1f3   : > { %6518 = vst [vmem:[#allocation117_spill] sm:$0xff] %v4153_v62 }
 0x1f4   : > { %6519 = vst [vmem:[#allocation118_spill] sm:$0xff] %v4155_v57 }
 0x1f8   : > { %1339 = vperm.xlu1 %3246, %v3648_v19   ;;  %1343 = vperm.xlu2 %3244, %v3645_v18  }
 0x1f9   : > { %3251 = vset.pattern.permute.xlu0 %v6397_v60  ;;  %v4160_v0 = vpop.permute.xlu1 %1109  ;;  %v4162_v1 = vpop.permute.xlu2 %1149 }
 0x1fa   : > { %6520 = vst [vmem:[#allocation119_spill] sm:$0xff] %v4160_v0  ;;  %1667 = vperm.xlu0 %3251, %v3591_v5   ;;  %v4165_v61 = vpop.permute.xlu0 %1359 }
 0x1fb   : > { %6521 = vst [vmem:[#allocation120_spill] sm:$0xff] %v4162_v1 }
 0x1fc   : > { %6522 = vst [vmem:[#allocation121_spill] sm:$0xff] %v4165_v61 }
 0x200   : > { %1351 = vperm.xlu1 %3246, %v3660_v22   ;;  %1355 = vperm.xlu2 %3244, %v3657_v21  }
 0x201   : > { %v4169_v57 = vpop.permute.xlu1 %1121  ;;  %v4171_v62 = vpop.permute.xlu2 %1161 }
 0x202   : > { %6523 = vst [vmem:[#allocation122_spill] sm:$0xff] %v4169_v57  ;;  %1687 = vperm.xlu0 %3251, %v3603_v8   ;;  %v4174_v35 = vpop.permute.xlu0 %1371 }
 0x203   : > { %6524 = vst [vmem:[#allocation123_spill] sm:$0xff] %v4171_v62 }
 0x204   : > { %6525 = vst [vmem:[#allocation124_spill] sm:$0xff] %v4174_v35 }
 0x208   : > { %1363 = vperm.xlu1 %3246, %v3672_v25   ;;  %1367 = vperm.xlu2 %3244, %v3669_v24  }
 0x209   : > { %v4178_v60 = vpop.permute.xlu1 %1133  ;;  %v4180_v1 = vpop.permute.xlu2 %1173 }
 0x20a   : > { %6526 = vst [vmem:[#allocation125_spill] sm:$0xff] %v4178_v60  ;;  %1699 = vperm.xlu0 %3251, %v3615_v11   ;;  %v4183_v61 = vpop.permute.xlu0 %1383 }
 0x20b   : > { %6527 = vst [vmem:[#allocation126_spill] sm:$0xff] %v4180_v1 }
 0x20c   : > { %6528 = vst [vmem:[#allocation127_spill] sm:$0xff] %v4183_v61 }
 0x210   : > { %1375 = vperm.xlu1 %3246, %v3684_v28   ;;  %1379 = vperm.xlu2 %3244, %v3681_v27  }
 0x211   : > { %v4187_v57 = vpop.permute.xlu1 %1145  ;;  %v4189_v0 = vpop.permute.xlu2 %1185 }
 0x212   : > { %6529 = vst [vmem:[#allocation128_spill] sm:$0xff] %v4187_v57  ;;  %1711 = vperm.xlu0 %3251, %v3627_v14   ;;  %v4192_v35 = vpop.permute.xlu0 %1395  ;;  %v6535_v57 = vmov 6  }
 0x213   : > { %6530 = vst [vmem:[#allocation129_spill] sm:$0xff] %v4189_v0 }
 0x214   : > { %6531 = vst [vmem:[#allocation130_spill] sm:$0xff] %v4192_v35 }
 0x218   : > { %1387 = vperm.xlu1 %3246, %v3696_v31   ;;  %1391 = vperm.xlu2 %3244, %v3693_v30  }
 0x219   : > { %v4196_v60 = vpop.permute.xlu1 %1157  ;;  %v4198_v1 = vpop.permute.xlu2 %1197 }
 0x21a   : > { %6532 = vst [vmem:[#allocation131_spill] sm:$0xff] %v4196_v60  ;;  %1723 = vperm.xlu0 %3251, %v3639_v17  }
 0x21b   : > { %6533 = vst [vmem:[#allocation132_spill] sm:$0xff] %v4198_v1  ;;  %v4201_v61 = vpop.permute.xlu0 %1473 }
 0x21c   : > { %6534 = vst [vmem:[#allocation133_spill] sm:$0xff] %v4201_v61 }
 0x220   : > { %1399 = vperm.xlu1 %3246, %v3705_v33   ;;  %3247 = vset.pattern.permute.xlu2 %v6535_v57 }
 0x221   : > { %v4205_v0 = vpop.permute.xlu1 %1169  ;;  %1469 = vperm.xlu2 %3247, %v3708_v34  }
 0x222   : > { %6536 = vst [vmem:[#allocation134_spill] sm:$0xff] %v4205_v0  ;;  %1735 = vperm.xlu0 %3251, %v3651_v20   ;;  %v4209_v35 = vpop.permute.xlu2 %1275 }
 0x223   : > { %6537 = vst [vmem:[#allocation135_spill] sm:$0xff] %v4209_v35  ;;  %v4211_v62 = vpop.permute.xlu0 %1493 }
 0x224   : > { %6538 = vst [vmem:[#allocation136_spill] sm:$0xff] %v4211_v62 }
 0x228   : > { %3249 = vset.pattern.permute.xlu1 %v6535_v57 }
 0x229   : > { %1477 = vperm.xlu1 %3249, %v3588_v4   ;;  %v4215_v1 = vpop.permute.xlu1 %1181  ;;  %1481 = vperm.xlu2 %3247, %v3600_v7  }
 0x22a   : > { %6539 = vst [vmem:[#allocation137_spill] sm:$0xff] %v4215_v1  ;;  %1747 = vperm.xlu0 %3251, %v3663_v23   ;;  %v4219_v61 = vpop.permute.xlu2 %1287 }
 0x22b   : > { %6540 = vst [vmem:[#allocation138_spill] sm:$0xff] %v4219_v61  ;;  %v4221_v0 = vpop.permute.xlu0 %1505 }
 0x22c   : > { %6541 = vst [vmem:[#allocation139_spill] sm:$0xff] %v4221_v0 }
 0x231   : > { %1485 = vperm.xlu1 %3249, %v3585_v3   ;;  %v4224_v60 = vpop.permute.xlu1 %1193  ;;  %1489 = vperm.xlu2 %3247, %v3597_v6  }
 0x232   : > { %6542 = vst [vmem:[#allocation140_spill] sm:$0xff] %v4224_v60  ;;  %1759 = vperm.xlu0 %3251, %v3675_v26   ;;  %v4228_v57 = vpop.permute.xlu2 %1295 }
 0x233   : > { %6543 = vst [vmem:[#allocation141_spill] sm:$0xff] %v4228_v57  ;;  %v4230_v62 = vpop.permute.xlu0 %1517 }
 0x234   : > { %6544 = vst [vmem:[#allocation142_spill] sm:$0xff] %v4230_v62 }
 0x239   : > { %1497 = vperm.xlu1 %3249, %v3612_v10   ;;  %v4233_v35 = vpop.permute.xlu1 %1205  ;;  %1501 = vperm.xlu2 %3247, %v3609_v9  }
 0x23a   : > { %6545 = vst [vmem:[#allocation143_spill] sm:$0xff] %v4233_v35  ;;  %1771 = vperm.xlu0 %3251, %v3687_v29   ;;  %v4237_v0 = vpop.permute.xlu2 %1307  ;;  %v6399_v35 = vmov 8  }
 0x23b   : > { %6546 = vst [vmem:[#allocation144_spill] sm:$0xff] %v4237_v0  ;;  %v4239_v61 = vpop.permute.xlu0 %1529 }
 0x23c   : > { %6547 = vst [vmem:[#allocation145_spill] sm:$0xff] %v4239_v61 }
 0x241   : > { %1509 = vperm.xlu1 %3249, %v3624_v13   ;;  %1513 = vperm.xlu2 %3247, %v3621_v12  }
 0x242   : > { %1783 = vperm.xlu0 %3251, %v3699_v32   ;;  %v4244_v57 = vpop.permute.xlu1 %1283  ;;  %v4246_v62 = vpop.permute.xlu2 %1319 }
 0x243   : > { %6548 = vst [vmem:[#allocation146_spill] sm:$0xff] %v4244_v57  ;;  %v4248_v60 = vpop.permute.xlu0 %1541 }
 0x244   : > { %6549 = vst [vmem:[#allocation147_spill] sm:$0xff] %v4246_v62 }
 0x245   : > { %6550 = vst [vmem:[#allocation148_spill] sm:$0xff] %v4248_v60 }
 0x249   : > { %1521 = vperm.xlu1 %3249, %v3636_v16   ;;  %1525 = vperm.xlu2 %3247, %v3633_v15  }
 0x24a   : > { %3254 = vset.pattern.permute.xlu0 %v6399_v35  ;;  %v4253_v61 = vpop.permute.xlu1 %1291  ;;  %v4255_v0 = vpop.permute.xlu2 %1331 }
 0x24b   : > { %6551 = vst [vmem:[#allocation149_spill] sm:$0xff] %v4253_v61  ;;  %1861 = vperm.xlu0 %3254, %v3591_v5   ;;  %v4258_v1 = vpop.permute.xlu0 %1553 }
 0x24c   : > { %6552 = vst [vmem:[#allocation150_spill] sm:$0xff] %v4255_v0 }
 0x24d   : > { %6553 = vst [vmem:[#allocation151_spill] sm:$0xff] %v4258_v1 }
 0x251   : > { %1533 = vperm.xlu1 %3249, %v3648_v19   ;;  %1537 = vperm.xlu2 %3247, %v3645_v18  }
 0x252   : > { %v4262_v60 = vpop.permute.xlu1 %1303  ;;  %v4264_v62 = vpop.permute.xlu2 %1343 }
 0x253   : > { %6554 = vst [vmem:[#allocation152_spill] sm:$0xff] %v4262_v60  ;;  %1881 = vperm.xlu0 %3254, %v3603_v8   ;;  %v4267_v57 = vpop.permute.xlu0 %1565 }
 0x254   : > { %6555 = vst [vmem:[#allocation153_spill] sm:$0xff] %v4264_v62 }
 0x255   : > { %6556 = vst [vmem:[#allocation154_spill] sm:$0xff] %v4267_v57 }
 0x259   : > { %1545 = vperm.xlu1 %3249, %v3660_v22   ;;  %1549 = vperm.xlu2 %3247, %v3657_v21  }
 0x25a   : > { %v4271_v35 = vpop.permute.xlu1 %1315  ;;  %v4273_v0 = vpop.permute.xlu2 %1355 }
 0x25b   : > { %6557 = vst [vmem:[#allocation155_spill] sm:$0xff] %v4271_v35  ;;  %1893 = vperm.xlu0 %3254, %v3615_v11   ;;  %v4276_v1 = vpop.permute.xlu0 %1577 }
 0x25c   : > { %6558 = vst [vmem:[#allocation156_spill] sm:$0xff] %v4273_v0 }
 0x25d   : > { %6559 = vst [vmem:[#allocation157_spill] sm:$0xff] %v4276_v1 }
 0x261   : > { %1557 = vperm.xlu1 %3249, %v3672_v25   ;;  %1561 = vperm.xlu2 %3247, %v3669_v24  }
 0x262   : > { %v4280_v62 = vpop.permute.xlu1 %1327  ;;  %v4282_v60 = vpop.permute.xlu2 %1367 }
 0x263   : > { %6560 = vst [vmem:[#allocation158_spill] sm:$0xff] %v4280_v62  ;;  %1905 = vperm.xlu0 %3254, %v3627_v14   ;;  %v4285_v57 = vpop.permute.xlu0 %1589 }
 0x264   : > { %6561 = vst [vmem:[#allocation159_spill] sm:$0xff] %v4282_v60 }
 0x265   : > { %6562 = vst [vmem:[#allocation160_spill] sm:$0xff] %v4285_v57 }
 0x269   : > { %1569 = vperm.xlu1 %3249, %v3684_v28   ;;  %1573 = vperm.xlu2 %3247, %v3681_v27  }
 0x26a   : > { %v4289_v35 = vpop.permute.xlu1 %1339  ;;  %v4291_v61 = vpop.permute.xlu2 %1379 }
 0x26b   : > { %6563 = vst [vmem:[#allocation161_spill] sm:$0xff] %v4289_v35  ;;  %1917 = vperm.xlu0 %3254, %v3639_v17   ;;  %v6568_v35 = vmov 7  }
 0x26c   : > { %6564 = vst [vmem:[#allocation162_spill] sm:$0xff] %v4291_v61  ;;  %v4294_v1 = vpop.permute.xlu0 %1667 }
 0x26d   : > { %6565 = vst [vmem:[#allocation163_spill] sm:$0xff] %v4294_v1 }
 0x271   : > { %1581 = vperm.xlu1 %3249, %v3696_v31   ;;  %1585 = vperm.xlu2 %3247, %v3693_v30  }
 0x272   : > { %v4298_v62 = vpop.permute.xlu1 %1351  ;;  %v4300_v60 = vpop.permute.xlu2 %1391 }
 0x273   : > { %6566 = vst [vmem:[#allocation164_spill] sm:$0xff] %v4300_v60  ;;  %1929 = vperm.xlu0 %3254, %v3651_v20  }
 0x274   : > { %v4303_v57 = vpop.permute.xlu0 %1687 }
 0x275   : > { %6567 = vst [vmem:[#allocation165_spill] sm:$0xff] %v4303_v57 }
 0x279   : > { %1593 = vperm.xlu1 %3249, %v3705_v33   ;;  %3250 = vset.pattern.permute.xlu2 %v6568_v35 }
 0x27a   : > { %v4307_v61 = vpop.permute.xlu1 %1363  ;;  %1663 = vperm.xlu2 %3250, %v3708_v34  }
 0x27b   : > { %6569 = vst [vmem:[#allocation166_spill] sm:$0xff] %v4307_v61  ;;  %1941 = vperm.xlu0 %3254, %v3663_v23   ;;  %v4311_v1 = vpop.permute.xlu2 %1469 }
 0x27c   : > { %6570 = vst [vmem:[#allocation167_spill] sm:$0xff] %v4311_v1  ;;  %v4313_v0 = vpop.permute.xlu0 %1699 }
 0x27d   : > { %6571 = vst [vmem:[#allocation168_spill] sm:$0xff] %v4313_v0  ;;  %v6682_v0 = vld [vmem:[#allocation60_spill] sm:$0xff] }
 0x281   : > { %3252 = vset.pattern.permute.xlu1 %v6568_v35 }
 0x282   : > { %1671 = vperm.xlu1 %3252, %v3588_v4   ;;  %v4317_v60 = vpop.permute.xlu1 %1375  ;;  %1675 = vperm.xlu2 %3250, %v3600_v7  }
 0x283   : > { %6572 = vst [vmem:[#allocation169_spill] sm:$0xff] %v4317_v60  ;;  %1953 = vperm.xlu0 %3254, %v3675_v26   ;;  %v4321_v57 = vpop.permute.xlu2 %1481  ;;  %v6763_v60 = vld [vmem:[#allocation109_spill] sm:$0xff] }
 0x284   : > { %6573 = vst [vmem:[#allocation170_spill] sm:$0xff] %v4321_v57  ;;  %v4323_v61 = vpop.permute.xlu0 %1711 }
 0x285   : > { %6574 = vst [vmem:[#allocation171_spill] sm:$0xff] %v4323_v61 }
 0x28a   : > { %1679 = vperm.xlu1 %3252, %v3585_v3   ;;  %v4326_v23 = vpop.permute.xlu1 %1387  ;;  %1683 = vperm.xlu2 %3250, %v3597_v6   ;;  %v6581_v6 = vmov 0  }
 0x28b   : > { %6575 = vst [vmem:[#allocation172_spill] sm:$0xff] %v4326_v23  ;;  %1965 = vperm.xlu0 %3254, %v3687_v29   ;;  %v4330_v35 = vpop.permute.xlu2 %1489 }
 0x28c   : > { %6576 = vst [vmem:[#allocation173_spill] sm:$0xff] %v4330_v35  ;;  %v4332_v4 = vpop.permute.xlu0 %1723 }
 0x28d   : > { %6577 = vst [vmem:[#allocation174_spill] sm:$0xff] %v4332_v4 }
 0x292   : > { %1691 = vperm.xlu1 %3252, %v3612_v10   ;;  %v4335_v7 = vpop.permute.xlu1 %1399  ;;  %1695 = vperm.xlu2 %3250, %v3609_v9  }
 0x293   : > { %6578 = vst [vmem:[#allocation175_spill] sm:$0xff] %v4335_v7  ;;  %1977 = vperm.xlu0 %3254, %v3699_v32   ;;  %v4339_v26 = vpop.permute.xlu2 %1501 }
 0x294   : > { %6579 = vst [vmem:[#allocation176_spill] sm:$0xff] %v4339_v26  ;;  %v4341_v3 = vpop.permute.xlu0 %1735  ;;  %v6623_v26 = vld [vmem:[#allocation17_spill] sm:$0xff] }
 0x295   : > { %6580 = vst [vmem:[#allocation177_spill] sm:$0xff] %v4341_v3 }
 0x29a   : > { %1703 = vperm.xlu1 %3252, %v3624_v13   ;;  %1707 = vperm.xlu2 %3250, %v3621_v12  }
 0x29b   : > { %3256 = vset.pattern.permute.xlu0 %v6581_v6  ;;  %v4346_v29 = vpop.permute.xlu1 %1477  ;;  %v4348_v4 = vpop.permute.xlu2 %1513 }
 0x29c   : > { %6582 = vst [vmem:[#allocation178_spill] sm:$0xff] %v4346_v29  ;;  %v4350_v10 = vpop.permute.xlu0 %1747  ;;  %306 = vperm.xlu0 %3256, %v3708_v34  }
 0x29d   : > { %6583 = vst [vmem:[#allocation179_spill] sm:$0xff] %v4348_v4 }
 0x29e   : > { %6584 = vst [vmem:[#allocation180_spill] sm:$0xff] %v4350_v10 }
 0x2a2   : > { %1715 = vperm.xlu1 %3252, %v3636_v16   ;;  %1719 = vperm.xlu2 %3250, %v3633_v15  }
 0x2a3   : > { %v4355_v9 = vpop.permute.xlu1 %1485  ;;  %v4357_v32 = vpop.permute.xlu2 %1525 }
 0x2a4   : > { %6585 = vst [vmem:[#allocation181_spill] sm:$0xff] %v4355_v9  ;;  %v4359_v13 = vpop.permute.xlu0 %1759  ;;  %311 = vperm.xlu0 %3256, %v3591_v5   ;;  %v6612_v9 = vld [vmem:[#allocation6_spill] sm:$0xff] }
 0x2a5   : > { %6586 = vst [vmem:[#allocation182_spill] sm:$0xff] %v4357_v32 }
 0x2a6   : > { %6587 = vst [vmem:[#allocation183_spill] sm:$0xff] %v4359_v13 }
 0x2aa   : > { %1727 = vperm.xlu1 %3252, %v3648_v19   ;;  %1731 = vperm.xlu2 %3250, %v3645_v18  }
 0x2ab   : > { %v4364_v12 = vpop.permute.xlu1 %1497  ;;  %v4366_v10 = vpop.permute.xlu2 %1537 }
 0x2ac   : > { %6588 = vst [vmem:[#allocation184_spill] sm:$0xff] %v4364_v12  ;;  %v4368_v4 = vpop.permute.xlu0 %1771  ;;  %336 = vperm.xlu0 %3256, %v3603_v8  }
 0x2ad   : > { %6589 = vst [vmem:[#allocation185_spill] sm:$0xff] %v4366_v10  ;;  %v3433_v10 = vld [vmem:[%s3582_s26 + $0x18] sm:$0xff] }
 0x2ae   : > { %6590 = vst [vmem:[#allocation186_spill] sm:$0xff] %v4368_v4 }
 0x2b2   : > { %1739 = vperm.xlu1 %3252, %v3660_v22   ;;  %1743 = vperm.xlu2 %3250, %v3657_v21  }
 0x2b3   : > { %v4373_v15 = vpop.permute.xlu1 %1509  ;;  %v4375_v16 = vpop.permute.xlu2 %1549 }
 0x2b4   : > { %6591 = vst [vmem:[#allocation187_spill] sm:$0xff] %v4373_v15  ;;  %v4377_v5 = vpop.permute.xlu0 %1783  ;;  %351 = vperm.xlu0 %3256, %v3615_v11  }
 0x2b5   : > { %6592 = vst [vmem:[#allocation188_spill] sm:$0xff] %v4377_v5 }
 0x2ba   : > { %1751 = vperm.xlu1 %3252, %v3672_v25   ;;  %1755 = vperm.xlu2 %3250, %v3669_v24  }
 0x2bb   : > { %v4382_v18 = vpop.permute.xlu1 %1521  ;;  %v4384_v19 = vpop.permute.xlu2 %1561 }
 0x2bc   : > { %6593 = vst [vmem:[#allocation189_spill] sm:$0xff] %v4382_v18  ;;  %366 = vperm.xlu0 %3256, %v3627_v14  }
 0x2bd   : > { %v4387_v8 = vpop.permute.xlu0 %1861 }
 0x2c2   : > { %1763 = vperm.xlu1 %3252, %v3684_v28   ;;  %1767 = vperm.xlu2 %3250, %v3681_v27   ;;  %v6596_v27 = vmov 8  }
 0x2c3   : > { %v4391_v21 = vpop.permute.xlu1 %1533  ;;  %v4393_v11 = vpop.permute.xlu2 %1573 }
 0x2c4   : > { %381 = vperm.xlu0 %3256, %v3639_v17   ;;  %v4412_v17 = vld [vmem:[%s6382_s1] ss:$0 sm:$0xff] }
 0x2c5   : > { %v4396_v22 = vpop.permute.xlu0 %1881  ;;  %v4429_v5 = vmul.f32 %v4412_v17, %v3719_v36  ;;  %v470_v18 = vmul.f32 %v4412_v17, %v3724_v37  ;;  %v476_v4 = vmul.f32 %v4412_v17, %v3734_v39  ;;  %v4445_v36 = vmul.f32 %v4412_v17, %v3743_v42 }
 0x2c6   : > { %6594 = vst [vmem:[#allocation190_spill] sm:$0xff] %v4396_v22  ;;  %v468_v37 = vmul.f32 %v4412_v17, %v3745_v43  ;;  %v4455_v39 = vmul.f32 %v4412_v17, %v3752_v45  ;;  %v4467_v42 = vmul.f32 %v4412_v17, %v3761_v48  ;;  %v4471_v43 = vmul.f32 %v4412_v17, %v3763_v49 }
 0x2c7   : > { %v4480_v45 = vmul.f32 %v4412_v17, %v3770_v51  ;;  %v478_v49 = vmul.f32 %v4412_v17, %v3772_v52  ;;  %v4496_v51 = vmul.f32 %v4412_v17, %v3779_v54  ;;  %v4509_v52 = vmul.f32 %v4412_v17, %v3788_v58  ;;  %v6608_v58 = vld [vmem:[#allocation4_spill] sm:$0xff] }
 0x2c8   : > { %v4530_v22 = vmul.f32 %v4412_v17, %v6608_v58 }
 0x2ca   : > { %1775 = vperm.xlu1 %3252, %v3696_v31   ;;  %1779 = vperm.xlu2 %3250, %v3693_v30   ;;  %v4420_v30 = vld [vmem:[%s6382_s1 + $0x1] ss:$0 sm:$0xff] }
 0x2cb   : > { %v4400_v14 = vpop.permute.xlu1 %1545  ;;  %v4402_v24 = vpop.permute.xlu2 %1585  ;;  %v4441_v15 = vmul.f32 %v4420_v30, %v3738_v41  ;;  %v4463_v41 = vmul.f32 %v4420_v30, %v3756_v47  ;;  %v3432_v47 = vld [vmem:[%s3582_s26 + $0x10] sm:$0xff]  ;;  %v632_v54 = vmul.f32 %v4420_v30, %v3822_v63 }
 0x2cc   : > { %396 = vperm.xlu0 %3256, %v3651_v20   ;;  %v3431_v20 = vld [vmem:[%s3582_s26 + $0xa8] sm:$0xff] }
 0x2cd   : > { %v4405_v25 = vpop.permute.xlu0 %1893  ;;  %v6611_v63 = vld [vmem:[#allocation12_spill] sm:$0xff] }
 0x2ce   : > { %6595 = vst [vmem:[#allocation191_spill] sm:$0xff] %v4405_v25  ;;  %v635_v13 = vmul.f32 %v4420_v30, %v6611_v63  ;;  %v6617_v63 = vld [vmem:[#allocation10_spill] sm:$0xff] }
 0x2d2   : > { %1787 = vperm.xlu1 %3252, %v3705_v33   ;;  %3253 = vset.pattern.permute.xlu2 %v6596_v27 }
 0x2d3   : > { %v4414_v28 = vpop.permute.xlu1 %1557  ;;  %1857 = vperm.xlu2 %3253, %v3708_v34   ;;  %v473_v34 = vmul.f32 %v4412_v17, %v3729_v38  ;;  %v4451_v38 = vmul.f32 %v4420_v30, %v3747_v44  ;;  %v4476_v44 = vmul.f32 %v4420_v30, %v3765_v50  ;;  %v4492_v50 = vmul.f32 %v4420_v30, %v3774_v53 }
 0x2d4   : > { %411 = vperm.xlu0 %3256, %v3431_v20   ;;  %v4423_v31 = vpop.permute.xlu2 %1663  ;;  %v467_v20 = vmul.f32 %v4412_v17, %v3736_v40  ;;  %v4459_v40 = vmul.f32 %v4412_v17, %v3754_v46  ;;  %v630_v46 = vmul.f32 %v4420_v30, %v3813_v2  ;;  %v481_v2 = vmul.f32 %v4412_v17, %v3781_v55  ;;  %v4520_v55 = vld [vmem:[%s6382_s1 + $0x2] ss:$0 sm:$0xff] }
 0x2d5   : > { %6597 = vst [vmem:[#allocation192_spill] sm:$0xff] %v4423_v31  ;;  %v4425_v33 = vpop.permute.xlu0 %1905  ;;  %v4513_v53 = vmul.f32 %v4412_v17, %v3790_v59  ;;  %v6609_v59 = vld [vmem:[#allocation5_spill] sm:$0xff]  ;;  %v6627_v31 = vld [vmem:[#allocation16_spill] sm:$0xff] }
 0x2d6   : > { %6598 = vst [vmem:[#allocation193_spill] sm:$0xff] %v4425_v33  ;;  %v4534_v32 = vmul.f32 %v4420_v30, %v6609_v59  ;;  %v4550_v58 = vadd.f32 %v630_v46, %v468_v37  ;;  %v6616_v33 = vld [vmem:[#allocation9_spill] sm:$0xff]  ;;  %v6621_v37 = vld [vmem:[#allocation11_spill] sm:$0xff]  ;;  %v4586_v25 = vmul.f32 %v4520_v55, %v6627_v31 }
 0x2d7   : > { %6599 = vst [vmem:[#allocation194_spill] sm:$0xff] %v4451_v38  ;;  %v4554_v59 = vmul.f32 %v4412_v17, %v6616_v33  ;;  %v4568_v46 = vmul.f32 %v4412_v17, %v6621_v37 }
 0x2d8   : > { %6600 = vst [vmem:[#allocation195_spill] sm:$0xff] %v4476_v44  ;;  %v6710_v44 = vld [vmem:[#allocation80_spill] sm:$0xff] }
 0x2d9   : > { %6602 = vst [vmem:[#allocation197_spill] sm:$0xff] %v4492_v50 }
 0x2da   : > { %3255 = vset.pattern.permute.xlu1 %v6596_v27  ;;  %v3434_v27 = vld [vmem:[%s3582_s26 + $0xc0] sm:$0xff]  ;;  %6610 = vst [vmem:[#allocation4_spill] sm:$0xff] %v4534_v32  ;;  %v4558_v32 = vmul.f32 %v4420_v30, %v6617_v63  ;;  %v631_v63 = vmul.f32 %v4420_v30, %v6623_v26  ;;  %v6630_v26 = vld [vmem:[#allocation24_spill] sm:$0xff] }
 0x2db   : > { %1865 = vperm.xlu1 %3255, %v3432_v47   ;;  %v4485_v48 = vpop.permute.xlu1 %1569  ;;  %1869 = vperm.xlu2 %3253, %v3433_v10   ;;  %v4505_v10 = vmul.f32 %v4420_v30, %v3783_v56  ;;  %v6606_v56 = vld [vmem:[#allocation3_spill] sm:$0xff]  ;;  %6628 = vst [vmem:[#allocation6_spill] sm:$0xff] %v4586_v25 }
 0x2dc   : > { %6601 = vst [vmem:[#allocation196_spill] sm:$0xff] %v4485_v48  ;;  %426 = vperm.xlu0 %3256, %v3434_v27   ;;  %v4501_v47 = vpop.permute.xlu2 %1675  ;;  %v4526_v12 = vmul.f32 %v4420_v30, %v6606_v56  ;;  %v6614_v56 = vld [vmem:[#allocation8_spill] sm:$0xff]  ;;  %v6633_v25 = vld [vmem:[#allocation27_spill] sm:$0xff] }
 0x2dd   : > { %6603 = vst [vmem:[#allocation198_spill] sm:$0xff] %v4501_v47  ;;  %v4522_v27 = vpop.permute.xlu0 %1917  ;;  %v650_v61 = vmul.f32 %v4420_v30, %v6633_v25  ;;  %v3446_v48 = vld [vmem:[%s3582_s26 + $0x88] sm:$0xff] }
 0x2de   : > { %6604 = vst [vmem:[#allocation199_spill] sm:$0xff] %v4505_v10  ;;  %v4540_v10 = vmul.f32 %v4420_v30, %v6612_v9  ;;  %v6619_v9 = vld [vmem:[#allocation14_spill] sm:$0xff] }
 0x2df   : > { %6605 = vst [vmem:[#allocation200_spill] sm:$0xff] %v4522_v27  ;;  %v6613_v27 = vld [vmem:[#allocation7_spill] sm:$0xff]  ;;  %v629_v29 = vmul.f32 %v4420_v30, %v6619_v9  ;;  %v6624_v9 = vld [vmem:[#allocation18_spill] sm:$0xff] }
 0x2e0   : > { %6607 = vst [vmem:[#allocation3_spill] sm:$0xff] %v4526_v12  ;;  %v4544_v47 = vmul.f32 %v4412_v17, %v6613_v27  ;;  %v4548_v12 = vmul.f32 %v4420_v30, %v6614_v56  ;;  %v6620_v27 = vld [vmem:[#allocation15_spill] sm:$0xff]  ;;  %v4564_v56 = vadd.f32 %v632_v54, %v470_v18  ;;  %v641_v50 = vmul.f32 %v4420_v30, %v6624_v9  ;;  %v6626_v54 = vld [vmem:[#allocation21_spill] sm:$0xff] }
 0x2e1   : > { %6618 = vst [vmem:[#allocation12_spill] sm:$0xff] %v4558_v32  ;;  %v638_v3 = vmul.f32 %v4420_v30, %v6620_v27  ;;  %v4576_v32 = vadd.f32 %v635_v13, %v473_v34  ;;  %v6625_v27 = vld [vmem:[#allocation20_spill] sm:$0xff]  ;;  %v644_v37 = vmul.f32 %v4420_v30, %v6626_v54  ;;  %v647_v13 = vmul.f32 %v4420_v30, %v6630_v26  ;;  %v3435_v34 = vld [vmem:[%s3582_s26 + $0x20] sm:$0xff] }
 0x2e2   : > { %6615 = vst [vmem:[#allocation5_spill] sm:$0xff] %v4548_v12  ;;  %v6622_v12 = vld [vmem:[#allocation13_spill] sm:$0xff]  ;;  %v634_v18 = vmul.f32 %v4420_v30, %v6625_v27  ;;  %v3436_v9 = vld [vmem:[%s3582_s26 + $0x28] sm:$0xff]  ;;  %v4596_v27 = vadd.f32 %v629_v29, %v467_v20  ;;  %v6632_v54 = vld [vmem:[#allocation26_spill] sm:$0xff]  ;;  %v663_v26 = vadd.f32 %v631_v63, %v4429_v5  ;;  %v673_v25 = vadd.f32 %v641_v50, %v4445_v36 }
 0x2e3   : > { %v4572_v33 = vmul.f32 %v4520_v55, %v6622_v12  ;;  %v6629_v12 = vld [vmem:[#allocation23_spill] sm:$0xff]  ;;  %1873 = vperm.xlu1 %3255, %v3435_v34   ;;  %v4593_v35 = vpop.permute.xlu1 %1581  ;;  %1877 = vperm.xlu2 %3253, %v3436_v9   ;;  %v4598_v23 = vadd.f32 %v638_v3, %v476_v4  ;;  %v640_v31 = vmul.f32 %v4420_v30, %v6632_v54  ;;  %v6636_v29 = vld [vmem:[#allocation29_spill] sm:$0xff]  ;;  %v6637_v3 = vld [vmem:[#allocation30_spill] sm:$0xff] }
 0x2e4   : > { %v637_v7 = vmul.f32 %v4420_v30, %v6629_v12  ;;  %6631 = vst [vmem:[#allocation7_spill] sm:$0xff] %v4593_v35  ;;  %v3437_v12 = vld [vmem:[%s3582_s26 + $0xd8] sm:$0xff]  ;;  %v4605_v1 = vpop.permute.xlu2 %1683  ;;  %v6635_v34 = vld [vmem:[#allocation19_spill] sm:$0xff]  ;;  %v643_v4 = vmul.f32 %v4420_v30, %v6636_v29  ;;  %v653_v20 = vmul.f32 %v4420_v30, %v6637_v3  ;;  %v4620_v54 = vadd.f32 %v634_v18, %v4459_v40  ;;  %v6643_v36 = vld [vmem:[#allocation32_spill] sm:$0xff] }
 0x2e5   : > { %441 = vperm.xlu0 %3256, %v3437_v12   ;;  %6634 = vst [vmem:[#allocation8_spill] sm:$0xff] %v4605_v1  ;;  %v4610_v35 = vmul.f32 %v4520_v55, %v6635_v34  ;;  %v4616_v9 = vpop.permute.xlu0 %1929  ;;  %v6639_v12 = vld [vmem:[#allocation22_spill] sm:$0xff]  ;;  %v4627_v63 = vadd.f32 %v644_v37, %v4455_v39  ;;  %v6641_v29 = vld [vmem:[#allocation25_spill] sm:$0xff]  ;;  %v646_v40 = vmul.f32 %v4420_v30, %v6643_v36  ;;  %v6644_v18 = vld [vmem:[#allocation28_spill] sm:$0xff] }
 0x2e6   : > { %6638 = vst [vmem:[#allocation9_spill] sm:$0xff] %v4616_v9  ;;  %v4624_v5 = vmul.f32 %v4520_v55, %v6639_v12  ;;  %v4630_v34 = vadd.f32 %v637_v7, %v4471_v43  ;;  %v4634_v3 = vmul.f32 %v4520_v55, %v6641_v29  ;;  %v4637_v9 = vadd.f32 %v647_v13, %v4467_v42  ;;  %v6646_v43 = vld [vmem:[#allocation33_spill] sm:$0xff]  ;;  %v6647_v42 = vld [vmem:[#allocation31_spill] sm:$0xff]  ;;  %v6650_v36 = vld [vmem:[#allocation34_spill] sm:$0xff] }
 0x2e7   : > { %v4641_v50 = vadd.f32 %v640_v31, %v478_v49  ;;  %v4645_v39 = vmul.f32 %v4520_v55, %v6644_v18  ;;  %v4648_v7 = vadd.f32 %v650_v61, %v4480_v45  ;;  %v656_v37 = vmul.f32 %v4420_v30, %v6646_v43  ;;  %v6649_v31 = vld [vmem:[#allocation35_spill] sm:$0xff]  ;;  %v6652_v45 = vld [vmem:[#allocation38_spill] sm:$0xff]  ;;  %v6653_v43 = vld [vmem:[#allocation40_spill] sm:$0xff] }
 0x2e8   : > { %6640 = vst [vmem:[#allocation10_spill] sm:$0xff] %v4624_v5  ;;  %v4652_v12 = vadd.f32 %v643_v4, %v481_v2  ;;  %v4656_v13 = vmul.f32 %v4520_v55, %v6647_v42  ;;  %v4659_v49 = vadd.f32 %v653_v20, %v4496_v51  ;;  %v649_v29 = vmul.f32 %v4420_v30, %v6649_v31  ;;  %v6654_v4 = vld [vmem:[#allocation41_spill] sm:$0xff]  ;;  %v4679_v20 = vld [vmem:[%s6382_s1 + $0x3] ss:$0 sm:$0xff]  ;;  %v6655_v31 = vld [vmem:[#allocation42_spill] sm:$0xff] }
 0x2e9   : > { %6642 = vst [vmem:[#allocation14_spill] sm:$0xff] %v4634_v3  ;;  %v4665_v61 = vmul.f32 %v4520_v55, %v6650_v36  ;;  %v652_v18 = vmul.f32 %v4420_v30, %v6652_v45  ;;  %v824_v2 = vmul.f32 %v4520_v55, %v6653_v43  ;;  %v655_v42 = vmul.f32 %v4420_v30, %v6654_v4  ;;  %v6660_v3 = vld [vmem:[#allocation37_spill] sm:$0xff] }
 0x2ea   : > { %6645 = vst [vmem:[#allocation15_spill] sm:$0xff] %v4645_v39  ;;  %v4674_v51 = vadd.f32 %v646_v40, %v4513_v53  ;;  %v826_v36 = vmul.f32 %v4520_v55, %v6655_v31  ;;  %v3439_v39 = vld [vmem:[%s3582_s26 + $0x40] sm:$0xff]  ;;  %v4690_v53 = vadd.f32 %v656_v37, %v4509_v52  ;;  %v6658_v40 = vld [vmem:[#allocation36_spill] sm:$0xff]  ;;  %v4698_v1 = vmul.f32 %v4520_v55, %v6660_v3  ;;  %v6661_v31 = vld [vmem:[#allocation45_spill] sm:$0xff] }
 0x2eb   : > { %6648 = vst [vmem:[#allocation11_spill] sm:$0xff] %v4656_v13  ;;  %v3438_v13 = vld [vmem:[%s3582_s26 + $0x38] sm:$0xff]  ;;  %v4686_v43 = vpop.permute.xlu1 %1593  ;;  %1889 = vperm.xlu2 %3253, %v3439_v39   ;;  %v4694_v4 = vmul.f32 %v4520_v55, %v6658_v40  ;;  %v681_v39 = vadd.f32 %v649_v29, %v4530_v22  ;;  %v6665_v37 = vld [vmem:[#allocation47_spill] sm:$0xff] }
 0x2ec   : > { %6651 = vst [vmem:[#allocation13_spill] sm:$0xff] %v4665_v61  ;;  %v6656_v61 = vld [vmem:[#allocation44_spill] sm:$0xff]  ;;  %1885 = vperm.xlu1 %3255, %v3438_v13   ;;  %v4703_v13 = vpop.permute.xlu2 %1695  ;;  %v823_v40 = vmul.f32 %v4520_v55, %v6665_v37  ;;  %v6668_v22 = vld [vmem:[#allocation50_spill] sm:$0xff]  ;;  %v4730_v37 = vadd.f32 %v826_v36, %v4564_v56 }
 0x2ed   : > { %v658_v45 = vmul.f32 %v4420_v30, %v6656_v61  ;;  %6657 = vst [vmem:[#allocation17_spill] sm:$0xff] %v4686_v43  ;;  %v829_v30 = vmul.f32 %v4520_v55, %v6661_v31  ;;  %v3440_v61 = vld [vmem:[%s3582_s26 + $0xf0] sm:$0xff]  ;;  %v6663_v43 = vld [vmem:[#allocation39_spill] sm:$0xff]  ;;  %v4714_v5 = vpop.permute.xlu0 %1941  ;;  %v684_v31 = vadd.f32 %v652_v18, %v4544_v47  ;;  %v825_v29 = vmul.f32 %v4520_v55, %v6668_v22  ;;  %v6671_v18 = vld [vmem:[#allocation46_spill] sm:$0xff] }
 0x2ee   : > { %6659 = vst [vmem:[#allocation18_spill] sm:$0xff] %v4694_v4  ;;  %456 = vperm.xlu0 %3256, %v3440_v61   ;;  %v4708_v52 = vmul.f32 %v4520_v55, %v6663_v43  ;;  %v6666_v4 = vld [vmem:[#allocation48_spill] sm:$0xff]  ;;  %v4718_v61 = vadd.f32 %v824_v2, %v4550_v58  ;;  %v6669_v43 = vld [vmem:[#allocation43_spill] sm:$0xff]  ;;  %v6674_v56 = vld [vmem:[#allocation54_spill] sm:$0xff] }
 0x2ef   : > { %6662 = vst [vmem:[#allocation20_spill] sm:$0xff] %v4703_v13  ;;  %v832_v3 = vmul.f32 %v4520_v55, %v6666_v4  ;;  %v4721_v13 = vadd.f32 %v655_v42, %v4554_v59  ;;  %v4733_v4 = vadd.f32 %v658_v45, %v4568_v46  ;;  %v6670_v47 = vld [vmem:[#allocation51_spill] sm:$0xff]  ;;  %v4739_v59 = vmul.f32 %v4679_v20, %v6671_v18  ;;  %v6673_v42 = vld [vmem:[#allocation53_spill] sm:$0xff]  ;;  %v6677_v18 = vld [vmem:[#allocation56_spill] sm:$0xff] }
 0x2f0   : > { %6664 = vst [vmem:[#allocation21_spill] sm:$0xff] %v4708_v52  ;;  %v4727_v52 = vmul.f32 %v4679_v20, %v6669_v43  ;;  %v835_v58 = vmul.f32 %v4520_v55, %v6670_v47  ;;  %v4742_v2 = vadd.f32 %v829_v30, %v4576_v32  ;;  %v828_v22 = vmul.f32 %v4520_v55, %v6673_v42  ;;  %v6675_v45 = vld [vmem:[#allocation49_spill] sm:$0xff] }
 0x2f1   : > { %6667 = vst [vmem:[#allocation16_spill] sm:$0xff] %v4714_v5  ;;  %v838_v36 = vmul.f32 %v4520_v55, %v6674_v56  ;;  %v4749_v46 = vadd.f32 %v823_v40, %v4596_v27  ;;  %v4753_v43 = vmul.f32 %v4679_v20, %v6675_v45  ;;  %v4756_v47 = vadd.f32 %v832_v3, %v4598_v23  ;;  %v6678_v5 = vld [vmem:[#allocation52_spill] sm:$0xff]  ;;  %v6680_v56 = vld [vmem:[#allocation57_spill] sm:$0xff]  ;;  %v6681_v40 = vld [vmem:[#allocation59_spill] sm:$0xff] }
 0x2f2   : > { %6672 = vst [vmem:[#allocation23_spill] sm:$0xff] %v4739_v59  ;;  %v831_v32 = vmul.f32 %v4520_v55, %v6677_v18  ;;  %v4760_v30 = vadd.f32 %v825_v29, %v663_v26  ;;  %v4764_v42 = vmul.f32 %v4679_v20, %v6678_v5  ;;  %v841_v27 = vmul.f32 %v4520_v55, %v6680_v56  ;;  %v6683_v3 = vld [vmem:[#allocation62_spill] sm:$0xff]  ;;  %v3441_v26 = vld [vmem:[%s3582_s26 + $0x50] sm:$0xff] }
 0x2f3   : > { %6676 = vst [vmem:[#allocation24_spill] sm:$0xff] %v4753_v43  ;;  %v834_v59 = vmul.f32 %v4520_v55, %v6681_v40  ;;  %v4770_v45 = vadd.f32 %v835_v58, %v673_v25  ;;  %v844_v23 = vmul.f32 %v4520_v55, %v6682_v0  ;;  %v837_v18 = vmul.f32 %v4520_v55, %v6683_v3  ;;  %v3442_v29 = vld [vmem:[%s3582_s26 + $0x58] sm:$0xff]  ;;  %v6686_v58 = vld [vmem:[#allocation63_spill] sm:$0xff]  ;;  %v6773_v43 = vld [vmem:[#allocation120_spill] sm:$0xff] }
 0x2f4   : > { %6679 = vst [vmem:[#allocation26_spill] sm:$0xff] %v4764_v42  ;;  %1897 = vperm.xlu1 %3255, %v3441_v26   ;;  %1901 = vperm.xlu2 %3253, %v3442_v29   ;;  %v4779_v5 = vadd.f32 %v828_v22, %v4620_v54  ;;  %v6684_v42 = vld [vmem:[#allocation55_spill] sm:$0xff]  ;;  %v4786_v25 = vadd.f32 %v838_v36, %v4627_v63  ;;  %v4790_v40 = vpop.permute.xlu1 %1671  ;;  %v4792_v3 = vpop.permute.xlu2 %1707  ;;  %v6689_v29 = vld [vmem:[#allocation58_spill] sm:$0xff]  ;;  %v6691_v22 = vld [vmem:[#allocation65_spill] sm:$0xff] }
 0x2f5   : > { %v4783_v56 = vmul.f32 %v4679_v20, %v6684_v42  ;;  %v847_v0 = vmul.f32 %v4520_v55, %v6686_v58  ;;  %6687 = vst [vmem:[#allocation19_spill] sm:$0xff] %v4790_v40  ;;  %v4795_v26 = vadd.f32 %v831_v32, %v4630_v34  ;;  %v4799_v54 = vmul.f32 %v4679_v20, %v6689_v29  ;;  %v4805_v36 = vpop.permute.xlu0 %1953  ;;  %v6694_v34 = vld [vmem:[#allocation61_spill] sm:$0xff]  ;;  %v6696_v29 = vld [vmem:[#allocation68_spill] sm:$0xff] }
 0x2f6   : > { %6688 = vst [vmem:[#allocation29_spill] sm:$0xff] %v4792_v3  ;;  %v840_v42 = vmul.f32 %v4520_v55, %v6691_v22  ;;  %v4808_v58 = vadd.f32 %v841_v27, %v4637_v9  ;;  %v4811_v3 = vadd.f32 %v834_v59, %v4641_v50  ;;  %v4815_v32 = vmul.f32 %v4679_v20, %v6694_v34  ;;  %v6699_v27 = vld [vmem:[#allocation71_spill] sm:$0xff] }
 0x2f7   : > { %6685 = vst [vmem:[#allocation27_spill] sm:$0xff] %v4783_v56  ;;  %v6692_v56 = vld [vmem:[#allocation66_spill] sm:$0xff]  ;;  %v843_v40 = vmul.f32 %v4520_v55, %v6696_v29  ;;  %v4820_v22 = vadd.f32 %v844_v23, %v4648_v7  ;;  %v846_v50 = vmul.f32 %v4520_v55, %v6699_v27  ;;  %v4832_v59 = vadd.f32 %v847_v0, %v4659_v49  ;;  %v6700_v34 = vld [vmem:[#allocation67_spill] sm:$0xff]  ;;  %v6704_v27 = vld [vmem:[#allocation69_spill] sm:$0xff] }
 0x2f8   : > { %6690 = vst [vmem:[#allocation30_spill] sm:$0xff] %v4799_v54  ;;  %v850_v63 = vmul.f32 %v4520_v55, %v6692_v56  ;;  %v4823_v56 = vadd.f32 %v837_v18, %v4652_v12  ;;  %v4836_v29 = vmul.f32 %v4679_v20, %v6700_v34  ;;  %v4841_v7 = vld [vmem:[%s6382_s1 + $0x4] ss:$0 sm:$0xff]  ;;  %v6702_v12 = vld [vmem:[#allocation72_spill] sm:$0xff]  ;;  %v6703_v18 = vld [vmem:[#allocation74_spill] sm:$0xff]  ;;  %v4848_v49 = vadd.f32 %v840_v42, %v4674_v51 }
 0x2f9   : > { %6693 = vst [vmem:[#allocation22_spill] sm:$0xff] %v4805_v36  ;;  %v6697_v36 = vld [vmem:[#allocation64_spill] sm:$0xff]  ;;  %v1018_v23 = vmul.f32 %v4679_v20, %v6702_v12  ;;  %v4855_v34 = vmul.f32 %v4679_v20, %v6704_v27  ;;  %v6707_v54 = vld [vmem:[#allocation70_spill] sm:$0xff]  ;;  %v1017_v27 = vmul.f32 %v4679_v20, %v6710_v44 }
 0x2fa   : > { %6695 = vst [vmem:[#allocation25_spill] sm:$0xff] %v4815_v32  ;;  %v4827_v9 = vmul.f32 %v4679_v20, %v6697_v36  ;;  %v849_v36 = vmul.f32 %v4520_v55, %v6703_v18  ;;  %v4851_v0 = vadd.f32 %v850_v63, %v4690_v53  ;;  %v4859_v32 = vadd.f32 %v843_v40, %v681_v39  ;;  %v6708_v18 = vld [vmem:[#allocation77_spill] sm:$0xff]  ;;  %v6709_v42 = vld [vmem:[#allocation78_spill] sm:$0xff]  ;;  %v3443_v39 = vld [vmem:[%s3582_s26 + $0x68] sm:$0xff] }
 0x2fb   : > { %6701 = vst [vmem:[#allocation28_spill] sm:$0xff] %v4836_v29  ;;  %v6706_v29 = vld [vmem:[#allocation75_spill] sm:$0xff]  ;;  %v4863_v12 = vmul.f32 %v4679_v20, %v6707_v54  ;;  %v852_v51 = vmul.f32 %v4520_v55, %v6708_v18  ;;  %v1023_v53 = vmul.f32 %v4679_v20, %v6709_v42  ;;  %v4869_v63 = vadd.f32 %v846_v50, %v684_v31  ;;  %v3444_v40 = vld [vmem:[%s3582_s26 + $0x70] sm:$0xff] }
 0x2fc   : > { %6698 = vst [vmem:[#allocation32_spill] sm:$0xff] %v4827_v9  ;;  %v1020_v9 = vmul.f32 %v4679_v20, %v6706_v29  ;;  %1909 = vperm.xlu1 %3255, %v3443_v39   ;;  %1913 = vperm.xlu2 %3253, %v3444_v40   ;;  %v6712_v54 = vld [vmem:[#allocation73_spill] sm:$0xff]  ;;  %v4882_v55 = vadd.f32 %v1018_v23, %v4718_v61  ;;  %v6713_v50 = vld [vmem:[#allocation83_spill] sm:$0xff]  ;;  %v4889_v18 = vpop.permute.xlu1 %1679  ;;  %v6716_v42 = vld [vmem:[#allocation76_spill] sm:$0xff] }
 0x2fd   : > { %6705 = vst [vmem:[#allocation33_spill] sm:$0xff] %v4855_v34  ;;  %v6711_v34 = vld [vmem:[#allocation81_spill] sm:$0xff]  ;;  %v4879_v38 = vmul.f32 %v4841_v7, %v6712_v54  ;;  %v4885_v31 = vadd.f32 %v849_v36, %v4721_v13  ;;  %v1019_v44 = vmul.f32 %v4679_v20, %v6713_v50  ;;  %v4895_v39 = vmul.f32 %v4841_v7, %v6716_v42  ;;  %v6718_v54 = vld [vmem:[#allocation84_spill] sm:$0xff]  ;;  %v6719_v23 = vld [vmem:[#allocation86_spill] sm:$0xff]  ;;  %v4904_v36 = vpop.permute.xlu0 %1965 }
 0x2fe   : > { %v1026_v29 = vmul.f32 %v4679_v20, %v6711_v34  ;;  %6714 = vst [vmem:[#allocation31_spill] sm:$0xff] %v4889_v18  ;;  %v4891_v34 = vpop.permute.xlu2 %1719  ;;  %v4898_v40 = vadd.f32 %v1020_v9, %v4730_v37  ;;  %v1029_v61 = vmul.f32 %v4679_v20, %v6718_v54  ;;  %v1022_v13 = vmul.f32 %v4679_v20, %v6719_v23  ;;  %v6721_v18 = vld [vmem:[#allocation79_spill] sm:$0xff] }
 0x2ff   : > { %6715 = vst [vmem:[#allocation35_spill] sm:$0xff] %v4891_v34  ;;  %v4907_v50 = vadd.f32 %v852_v51, %v4733_v4  ;;  %v4911_v34 = vmul.f32 %v4841_v7, %v6721_v18  ;;  %v4914_v42 = vadd.f32 %v1023_v53, %v4742_v2  ;;  %v6723_v37 = vld [vmem:[#allocation87_spill] sm:$0xff]  ;;  %v4919_v54 = vadd.f32 %v1017_v27, %v4749_v46  ;;  %v6726_v51 = vld [vmem:[#allocation89_spill] sm:$0xff]  ;;  %v6729_v46 = vld [vmem:[#allocation90_spill] sm:$0xff] }
 0x300   : > { %6717 = vst [vmem:[#allocation34_spill] sm:$0xff] %v4895_v39  ;;  %v1032_v9 = vmul.f32 %v4679_v20, %v6723_v37  ;;  %v6724_v39 = vld [vmem:[#allocation82_spill] sm:$0xff]  ;;  %v4926_v4 = vadd.f32 %v1026_v29, %v4756_v47  ;;  %v1025_v18 = vmul.f32 %v4679_v20, %v6726_v51  ;;  %v4931_v2 = vadd.f32 %v1019_v44, %v4760_v30  ;;  %v6727_v53 = vld [vmem:[#allocation85_spill] sm:$0xff]  ;;  %v6731_v51 = vld [vmem:[#allocation88_spill] sm:$0xff] }
 0x301   : > { %6720 = vst [vmem:[#allocation38_spill] sm:$0xff] %v4904_v36  ;;  %v4923_v23 = vmul.f32 %v4841_v7, %v6724_v39  ;;  %v4935_v37 = vmul.f32 %v4841_v7, %v6727_v53  ;;  %v1035_v27 = vmul.f32 %v4679_v20, %v6729_v46  ;;  %v6730_v39 = vld [vmem:[#allocation92_spill] sm:$0xff]  ;;  %v4942_v47 = vadd.f32 %v1029_v61, %v4770_v45  ;;  %v6733_v44 = vld [vmem:[#allocation93_spill] sm:$0xff]  ;;  %v6734_v46 = vld [vmem:[#allocation91_spill] sm:$0xff] }
 0x302   : > { %6722 = vst [vmem:[#allocation40_spill] sm:$0xff] %v4911_v34  ;;  %v1028_v36 = vmul.f32 %v4679_v20, %v6730_v39  ;;  %v4945_v29 = vadd.f32 %v1022_v13, %v4779_v5  ;;  %v4949_v30 = vmul.f32 %v4841_v7, %v6731_v51  ;;  %v1038_v53 = vmul.f32 %v4679_v20, %v6733_v44  ;;  %v6736_v39 = vld [vmem:[#allocation95_spill] sm:$0xff]  ;;  %v6737_v61 = vld [vmem:[#allocation96_spill] sm:$0xff]  ;;  %v6738_v51 = vld [vmem:[#allocation98_spill] sm:$0xff] }
 0x303   : > { %6725 = vst [vmem:[#allocation41_spill] sm:$0xff] %v4923_v23  ;;  %v4958_v23 = vmul.f32 %v4841_v7, %v6734_v46  ;;  %v1031_v45 = vmul.f32 %v4679_v20, %v6736_v39  ;;  %v1041_v5 = vmul.f32 %v4679_v20, %v6737_v61  ;;  %v4965_v13 = vadd.f32 %v1025_v18, %v4795_v26  ;;  %v6739_v44 = vld [vmem:[#allocation99_spill] sm:$0xff]  ;;  %v6742_v26 = vld [vmem:[#allocation101_spill] sm:$0xff] }
 0x304   : > { %6728 = vst [vmem:[#allocation42_spill] sm:$0xff] %v4935_v37  ;;  %v4954_v37 = vadd.f32 %v1032_v9, %v4786_v25  ;;  %v1044_v25 = vmul.f32 %v4679_v20, %v6739_v44  ;;  %v3445_v9 = vld [vmem:[%s3582_s26 + $0x80] sm:$0xff]  ;;  %1925 = vperm.xlu2 %3253, %v3446_v48   ;;  %v1067_v46 = vadd.f32 %v1035_v27, %v4808_v58  ;;  %v6747_v58 = vld [vmem:[#allocation104_spill] sm:$0xff] }
 0x305   : > { %6732 = vst [vmem:[#allocation44_spill] sm:$0xff] %v4949_v30  ;;  %v1034_v30 = vmul.f32 %v4679_v20, %v6738_v51  ;;  %1921 = vperm.xlu1 %3255, %v3445_v9   ;;  %v4975_v39 = vadd.f32 %v1028_v36, %v4811_v3  ;;  %v1037_v18 = vmul.f32 %v4679_v20, %v6742_v26  ;;  %v4983_v51 = vpop.permute.xlu1 %1691  ;;  %v6745_v9 = vld [vmem:[#allocation97_spill] sm:$0xff]  ;;  %v4995_v3 = vld [vmem:[%s6382_s1 + $0x5] ss:$0 sm:$0xff]  ;;  %v5001_v26 = vpop.permute.xlu0 %1977 }
 0x306   : > { %6735 = vst [vmem:[#allocation36_spill] sm:$0xff] %v4958_v23  ;;  %v6740_v23 = vld [vmem:[#allocation94_spill] sm:$0xff]  ;;  %v4985_v57 = vpop.permute.xlu2 %1731  ;;  %v1070_v44 = vadd.f32 %v1038_v53, %v4820_v22  ;;  %v4990_v48 = vmul.f32 %v4841_v7, %v6745_v9  ;;  %v1040_v36 = vmul.f32 %v4679_v20, %v6747_v58  ;;  %v5007_v22 = vadd.f32 %v1041_v5, %v4832_v59  ;;  %v6750_v53 = vld [vmem:[#allocation105_spill] sm:$0xff]  ;;  %v6752_v58 = vld [vmem:[#allocation100_spill] sm:$0xff] }
 0x307   : > { %v4979_v61 = vmul.f32 %v4841_v7, %v6740_v23  ;;  %6743 = vst [vmem:[#allocation45_spill] sm:$0xff] %v4983_v51  ;;  %v6748_v23 = vld [vmem:[#allocation123_spill] sm:$0xff]  ;;  %v1212_v9 = vmul.f32 %v4841_v7, %v6750_v53  ;;  %v5014_v51 = vadd.f32 %v1034_v30, %v4848_v49  ;;  %v6754_v59 = vld [vmem:[#allocation156_spill] sm:$0xff]  ;;  %v5031_v5 = vadd.f32 %v1037_v18, %v4859_v32  ;;  %v6755_v49 = vld [vmem:[#allocation102_spill] sm:$0xff] }
 0x308   : > { %6744 = vst [vmem:[#allocation39_spill] sm:$0xff] %v4985_v57  ;;  %v1229_v27 = vmul.f32 %v4841_v7, %v6748_v23  ;;  %v5018_v23 = vmul.f32 %v4841_v7, %v6752_v58  ;;  %v5035_v30 = vmul.f32 %v4841_v7, %v6755_v49  ;;  %v6759_v58 = vld [vmem:[#allocation103_spill] sm:$0xff]  ;;  %v6760_v49 = vld [vmem:[#allocation106_spill] sm:$0xff] }
 0x309   : > { %6741 = vst [vmem:[#allocation37_spill] sm:$0xff] %v4979_v61  ;;  %v5004_v61 = vadd.f32 %v1031_v45, %v4823_v56  ;;  %v5026_v56 = vld [vmem:[%s6382_s1 + $0x6] ss:$0 sm:$0xff]  ;;  %v1423_v45 = vmul.f32 %v4995_v3, %v6754_v59  ;;  %v5046_v59 = vadd.f32 %v1040_v36, %v4869_v63  ;;  %v5052_v34 = vmul.f32 %v4995_v3, %v6760_v49 }
 0x30a   : > { %6746 = vst [vmem:[#allocation47_spill] sm:$0xff] %v4990_v48  ;;  %v6751_v48 = vld [vmem:[#allocation107_spill] sm:$0xff]  ;;  %v1261_v32 = vadd.f32 %v1229_v27, %v1067_v46  ;;  %v1617_v18 = vmul.f32 %v5026_v56, %v4375_v16  ;;  %v5064_v63 = vmul.f32 %v4995_v3, %v6763_v60  ;;  %v6765_v46 = vld [vmem:[#allocation113_spill] sm:$0xff]  ;;  %v6766_v60 = vld [vmem:[#allocation114_spill] sm:$0xff] }
 0x30b   : > { %6749 = vst [vmem:[#allocation48_spill] sm:$0xff] %v5001_v26  ;;  %v1043_v57 = vmul.f32 %v4679_v20, %v6751_v48  ;;  %v5021_v26 = vadd.f32 %v1044_v25, %v4851_v0  ;;  %v6757_v48 = vld [vmem:[#allocation108_spill] sm:$0xff]  ;;  %v6758_v25 = vld [vmem:[#allocation110_spill] sm:$0xff]  ;;  %v1211_v16 = vmul.f32 %v4841_v7, %v6765_v46  ;;  %v5071_v27 = vld [vmem:[%s6382_s1 + $0x7] ss:$0 sm:$0xff]  ;;  %v1220_v49 = vmul.f32 %v4841_v7, %v6766_v60 }
 0x30c   : > { %6753 = vst [vmem:[#allocation50_spill] sm:$0xff] %v5018_v23  ;;  %v1214_v0 = vmul.f32 %v4841_v7, %v6757_v48  ;;  %v1046_v53 = vmul.f32 %v4679_v20, %v6758_v25  ;;  %v5043_v23 = vmul.f32 %v4995_v3, %v6759_v58  ;;  %v5055_v48 = vadd.f32 %v1212_v9, %v4882_v55  ;;  %v6762_v25 = vld [vmem:[#allocation111_spill] sm:$0xff]  ;;  %v3447_v55 = vld [vmem:[%s3582_s26 + $0x98] sm:$0xff] }
 0x30d   : > { %6756 = vst [vmem:[#allocation43_spill] sm:$0xff] %v5035_v30  ;;  %v5058_v20 = vadd.f32 %v1043_v57, %v4885_v31  ;;  %v1217_v58 = vmul.f32 %v4841_v7, %v6762_v25  ;;  %v1455_v36 = vadd.f32 %v1423_v45, %v1261_v32  ;;  %1933 = vperm.xlu1 %3255, %v3447_v55   ;;  %v3448_v57 = vld [vmem:[%s3582_s26 + $0xa0] sm:$0xff]  ;;  %v6767_v25 = vld [vmem:[#allocation116_spill] sm:$0xff]  ;;  %v5085_v32 = vpop.permute.xlu1 %1703 }
 0x30e   : > { %6761 = vst [vmem:[#allocation51_spill] sm:$0xff] %v5052_v34  ;;  %1937 = vperm.xlu2 %3253, %v3448_v57   ;;  %v5076_v31 = vadd.f32 %v1214_v0, %v4898_v40  ;;  %v5079_v9 = vadd.f32 %v1046_v53, %v4907_v50  ;;  %v1213_v45 = vmul.f32 %v4841_v7, %v6767_v25  ;;  %v1744_v46 = vpop.permute.xlu2 %1743  ;;  %v6769_v34 = vld [vmem:[#allocation117_spill] sm:$0xff]  ;;  %v6771_v50 = vld [vmem:[#allocation112_spill] sm:$0xff]  ;;  %v6772_v25 = vld [vmem:[#allocation119_spill] sm:$0xff] }
 0x30f   : > { %6764 = vst [vmem:[#allocation46_spill] sm:$0xff] %v5064_v63  ;;  %v1223_v55 = vmul.f32 %v4841_v7, %v6769_v34  ;;  %v6770_v63 = vld [vmem:[#allocation126_spill] sm:$0xff]  ;;  %v1649_v40 = vadd.f32 %v1617_v18, %v1455_v36  ;;  %v1811_v0 = vmul.f32 %v5071_v27, %v1744_v46  ;;  %v5094_v53 = vmul.f32 %v4995_v3, %v6771_v50  ;;  %v5103_v34 = vpop.permute.xlu0 %306  ;;  %v6774_v18 = vld [vmem:[#allocation115_spill] sm:$0xff] }
 0x310   : > { %6768 = vst [vmem:[#allocation53_spill] sm:$0xff] %v5085_v32  ;;  %v1232_v57 = vmul.f32 %v4841_v7, %v6770_v63  ;;  %v5097_v60 = vadd.f32 %v1217_v58, %v4914_v42  ;;  %v1216_v32 = vmul.f32 %v4841_v7, %v6772_v25  ;;  %v1226_v30 = vmul.f32 %v4841_v7, %v6773_v43  ;;  %v6776_v46 = vld [vmem:[#allocation159_spill] sm:$0xff]  ;;  %v6778_v25 = vld [vmem:[#allocation118_spill] sm:$0xff] }
 0x311   : > { %v5106_v63 = vadd.f32 %v1211_v16, %v4919_v54  ;;  %v5110_v36 = vmul.f32 %v4995_v3, %v6774_v18  ;;  %v1426_v50 = vmul.f32 %v4995_v3, %v6776_v46  ;;  %v5114_v42 = vadd.f32 %v1811_v0, %v1649_v40  ;;  %v6780_v16 = vld [vmem:[#allocation122_spill] sm:$0xff]  ;;  %v6781_v40 = vld [vmem:[#allocation125_spill] sm:$0xff] }
 0x312   : > { %v5117_v58 = vadd.f32 %v1220_v49, %v4926_v4  ;;  %v5120_v43 = vadd.f32 %v1213_v45, %v4931_v2  ;;  %v5124_v54 = vmul.f32 %v4995_v3, %v6778_v25  ;;  %v1219_v18 = vmul.f32 %v4841_v7, %v6780_v16  ;;  %v6782_v49 = vld [vmem:[#allocation121_spill] sm:$0xff]  ;;  %v6784_v16 = vld [vmem:[#allocation128_spill] sm:$0xff] }
 0x313   : > { %6775 = vst [vmem:[#allocation54_spill] sm:$0xff] %v5110_v36  ;;  %v5129_v36 = vadd.f32 %v1223_v55, %v4942_v47  ;;  %v1222_v0 = vmul.f32 %v4841_v7, %v6781_v40  ;;  %v1264_v46 = vadd.f32 %v1232_v57, %v1070_v44  ;;  %v1620_v4 = vmul.f32 %v5026_v56, %v4384_v19  ;;  %v6785_v55 = vld [vmem:[#allocation124_spill] sm:$0xff]  ;;  %v6787_v44 = vld [vmem:[#allocation129_spill] sm:$0xff] }
 0x314   : > { %6777 = vst [vmem:[#allocation49_spill] sm:$0xff] %v5114_v42  ;;  %v5136_v2 = vadd.f32 %v1216_v32, %v4945_v29  ;;  %v5140_v45 = vmul.f32 %v4995_v3, %v6782_v49  ;;  %v5143_v25 = vadd.f32 %v1226_v30, %v4954_v37  ;;  %v1225_v47 = vmul.f32 %v4841_v7, %v6784_v16  ;;  %v3449_v29 = vld [vmem:[%s3582_s26 + $0xb0] sm:$0xff]  ;;  %v3450_v32 = vld [vmem:[%s3582_s26 + $0xb8] sm:$0xff]  ;;  %v6788_v37 = vld [vmem:[#allocation127_spill] sm:$0xff] }
 0x315   : > { %6779 = vst [vmem:[#allocation56_spill] sm:$0xff] %v5124_v54  ;;  %v5149_v40 = vmul.f32 %v4995_v3, %v6785_v55  ;;  %v1235_v19 = vmul.f32 %v4841_v7, %v6787_v44  ;;  %v1458_v57 = vadd.f32 %v1426_v50, %v1264_v46  ;;  %1945 = vperm.xlu1 %3255, %v3449_v29   ;;  %v6790_v16 = vld [vmem:[#allocation131_spill] sm:$0xff]  ;;  %v6791_v55 = vld [vmem:[#allocation132_spill] sm:$0xff]  ;;  %v6794_v44 = vld [vmem:[#allocation134_spill] sm:$0xff] }
 0x316   : > { %6783 = vst [vmem:[#allocation52_spill] sm:$0xff] %v5140_v45  ;;  %1949 = vperm.xlu2 %3253, %v3450_v32   ;;  %v5156_v49 = vadd.f32 %v1219_v18, %v4965_v13  ;;  %v5160_v30 = vmul.f32 %v4995_v3, %v6788_v37  ;;  %v1228_v42 = vmul.f32 %v4841_v7, %v6790_v16  ;;  %v5166_v45 = vpop.permute.xlu1 %1715  ;;  %v1756_v50 = vpop.permute.xlu2 %1755  ;;  %v6795_v37 = vld [vmem:[#allocation130_spill] sm:$0xff] }
 0x317   : > { %6786 = vst [vmem:[#allocation57_spill] sm:$0xff] %v5149_v40  ;;  %v1238_v40 = vmul.f32 %v4841_v7, %v6791_v55  ;;  %v5169_v46 = vadd.f32 %v1222_v0, %v4975_v39  ;;  %v1231_v13 = vmul.f32 %v4841_v7, %v6794_v44  ;;  %v1652_v18 = vadd.f32 %v1620_v4, %v1458_v57  ;;  %v312_v39 = vpop.permute.xlu0 %311  ;;  %v6799_v44 = vld [vmem:[#allocation133_spill] sm:$0xff] }
 0x318   : > { %6789 = vst [vmem:[#allocation59_spill] sm:$0xff] %v5160_v30  ;;  %v1814_v29 = vmul.f32 %v5071_v27, %v1756_v50  ;;  %v1257_v32 = vadd.f32 %v1225_v47, %v5004_v61  ;;  %v5177_v16 = vmul.f32 %v4995_v3, %v6795_v37  ;;  %v6796_v30 = vld [vmem:[#allocation137_spill] sm:$0xff]  ;;  %v1267_v0 = vadd.f32 %v1235_v19, %v5007_v22  ;;  %v6800_v19 = vld [vmem:[#allocation135_spill] sm:$0xff] }
 0x319   : > { %6792 = vst [vmem:[#allocation60_spill] sm:$0xff] %v5166_v45  ;;  %v1234_v55 = vmul.f32 %v4841_v7, %v6796_v30  ;;  %v6797_v45 = vld [vmem:[#allocation161_spill] sm:$0xff]  ;;  %v466_v61 = vmul.f32 %v4412_v17, %v312_v39  ;;  %v1260_v47 = vadd.f32 %v1228_v42, %v5014_v51  ;;  %v1270_v50 = vadd.f32 %v1238_v40, %v5021_v26  ;;  %v6801_v26 = vld [vmem:[#allocation136_spill] sm:$0xff] }
 0x31a   : > { %6793 = vst [vmem:[#allocation62_spill] sm:$0xff] %v5169_v46  ;;  %v1419_v54 = vmul.f32 %v4995_v3, %v6797_v45  ;;  %v6798_v46 = vld [vmem:[#allocation162_spill] sm:$0xff]  ;;  %v5186_v57 = vadd.f32 %v1814_v29, %v1652_v18  ;;  %v1598_v30 = vmul.f32 %v5026_v56, %v6799_v44  ;;  %v1613_v45 = vmul.f32 %v5026_v56, %v4391_v21  ;;  %v6803_v29 = vld [vmem:[#allocation140_spill] sm:$0xff] }
 0x31b   : > { %v1429_v4 = vmul.f32 %v4995_v3, %v6798_v46  ;;  %v5196_v22 = vadd.f32 %v1231_v13, %v5031_v5  ;;  %v5200_v46 = vmul.f32 %v4995_v3, %v6800_v19  ;;  %v1623_v18 = vmul.f32 %v5026_v56, %v4393_v11  ;;  %v6802_v21 = vld [vmem:[#allocation138_spill] sm:$0xff]  ;;  %v3451_v11 = vld [vmem:[%s3582_s26 + $0xc8] sm:$0xff] }
 0x31c   : > { %v660_v51 = vadd.f32 %v4441_v15, %v466_v61  ;;  %v5207_v42 = vmul.f32 %v5026_v56, %v6801_v26  ;;  %v5210_v40 = vadd.f32 %v1234_v55, %v5046_v59  ;;  %v1406_v5 = vmul.f32 %v4995_v3, %v6802_v21  ;;  %v3452_v15 = vld [vmem:[%s3582_s26 + $0xd0] sm:$0xff]  ;;  %v6805_v26 = vld [vmem:[#allocation143_spill] sm:$0xff] }
 0x31d   : > { %v1451_v13 = vadd.f32 %v1419_v54, %v1257_v32  ;;  %v1237_v37 = vmul.f32 %v4841_v7, %v6803_v29  ;;  %v1461_v39 = vadd.f32 %v1429_v4, %v1267_v0  ;;  %1957 = vperm.xlu1 %3255, %v3451_v11   ;;  %v6804_v61 = vld [vmem:[#allocation141_spill] sm:$0xff]  ;;  %v1240_v59 = vmul.f32 %v4841_v7, %v6805_v26  ;;  %v6807_v7 = vld [vmem:[#allocation144_spill] sm:$0xff] }
 0x31e   : > { %v854_v44 = vadd.f32 %v4572_v33, %v660_v51  ;;  %1961 = vperm.xlu2 %3253, %v3452_v15   ;;  %v1408_v19 = vmul.f32 %v4995_v3, %v6804_v61  ;;  %v465_v54 = vmul.f32 %v4412_v17, %v5103_v34  ;;  %v1728_v32 = vpop.permute.xlu1 %1727  ;;  %v1768_v21 = vpop.permute.xlu2 %1767  ;;  %v6806_v51 = vld [vmem:[#allocation139_spill] sm:$0xff]  ;;  %v5233_v15 = vadd.f32 %v1406_v5, %v5055_v48  ;;  %v6809_v5 = vld [vmem:[#allocation142_spill] sm:$0xff] }
 0x31f   : > { %v1645_v55 = vadd.f32 %v1613_v45, %v1451_v13  ;;  %v1655_v29 = vadd.f32 %v1623_v18, %v1461_v39  ;;  %v1807_v33 = vmul.f32 %v5071_v27, %v1728_v32  ;;  %v1817_v4 = vmul.f32 %v5071_v27, %v1768_v21  ;;  %v5239_v18 = vpop.permute.xlu0 %336  ;;  %v6810_v21 = vld [vmem:[#allocation145_spill] sm:$0xff] }
 0x320   : > { %v1048_v0 = vadd.f32 %v4727_v52, %v854_v44  ;;  %v5230_v11 = vmul.f32 %v5026_v56, %v6806_v51  ;;  %v1411_v45 = vmul.f32 %v4995_v3, %v6807_v7  ;;  %v1422_v34 = vmul.f32 %v4995_v3, %v4298_v62  ;;  %v6808_v52 = vld [vmem:[#allocation164_spill] sm:$0xff]  ;;  %v6814_v51 = vld [vmem:[#allocation149_spill] sm:$0xff] }
 0x321   : > { %v1432_v13 = vmul.f32 %v4995_v3, %v6808_v52  ;;  %v5244_v44 = vadd.f32 %v1807_v33, %v1645_v55  ;;  %v5246_v61 = vadd.f32 %v1817_v4, %v1655_v29  ;;  %v5249_v48 = vadd.f32 %v1237_v37, %v5058_v20 }
 0x322   : > { %v1242_v39 = vadd.f32 %v4879_v38, %v1048_v0  ;;  %v5253_v26 = vmul.f32 %v5026_v56, %v6809_v5  ;;  %v1616_v62 = vmul.f32 %v5026_v56, %v4400_v14  ;;  %v659_v32 = vadd.f32 %v4540_v10, %v465_v54  ;;  %v6811_v14 = vld [vmem:[#allocation146_spill] sm:$0xff]  ;;  %v3454_v54 = vld [vmem:[%s3582_s26 + $0xe8] sm:$0xff] }
 0x323   : > { %v5259_v38 = vadd.f32 %v1408_v19, %v5076_v31  ;;  %v5262_v55 = vadd.f32 %v1240_v59, %v5079_v9  ;;  %v1626_v20 = vmul.f32 %v5026_v56, %v4402_v24  ;;  %v5269_v29 = vmul.f32 %v5026_v56, %v6810_v21  ;;  %v5279_v9 = vld [vmem:[%s6382_s1 + $0x8] ss:$0 sm:$0xff]  ;;  %v3453_v59 = vld [vmem:[%s3582_s26 + $0xe0] sm:$0xff]  ;;  %v6815_v21 = vld [vmem:[#allocation148_spill] sm:$0xff] }
 0x324   : > { %v1436_v37 = vadd.f32 %v5043_v23, %v1242_v39  ;;  %v5272_v0 = vadd.f32 %v1411_v45, %v5097_v60  ;;  %v1405_v10 = vmul.f32 %v4995_v3, %v6811_v14  ;;  %v1454_v31 = vadd.f32 %v1422_v34, %v1260_v47  ;;  %v6812_v19 = vld [vmem:[#allocation163_spill] sm:$0xff] }
 0x325   : > { %v1792_v24 = vmul.f32 %v5071_v27, %v6812_v19  ;;  %v1464_v23 = vadd.f32 %v1432_v13, %v1270_v50  ;;  %1969 = vperm.xlu1 %3255, %v3453_v59   ;;  %v6813_v60 = vld [vmem:[#allocation147_spill] sm:$0xff]  ;;  %v1407_v47 = vmul.f32 %v4995_v3, %v6814_v51  ;;  %v853_v45 = vadd.f32 %v4698_v1, %v659_v32  ;;  %v6817_v19 = vld [vmem:[#allocation166_spill] sm:$0xff]  ;;  %v6819_v59 = vld [vmem:[#allocation152_spill] sm:$0xff] }
 0x326   : > { %1973 = vperm.xlu2 %3253, %v3454_v54   ;;  %v1630_v33 = vadd.f32 %v1598_v30, %v1436_v37  ;;  %v1414_v4 = vmul.f32 %v4995_v3, %v6813_v60  ;;  %v1648_v7 = vadd.f32 %v1616_v62, %v1454_v31  ;;  %v1740_v34 = vpop.permute.xlu1 %1739  ;;  %v1780_v52 = vpop.permute.xlu2 %1779  ;;  %v5294_v30 = vmul.f32 %v5026_v56, %v6815_v21  ;;  %v6816_v37 = vld [vmem:[#allocation150_spill] sm:$0xff]  ;;  %v6824_v21 = vld [vmem:[#allocation43_spill] sm:$0xff] }
 0x327   : > { %v1658_v39 = vadd.f32 %v1626_v20, %v1464_v23  ;;  %v1810_v5 = vmul.f32 %v5071_v27, %v1740_v34  ;;  %v1820_v50 = vmul.f32 %v5071_v27, %v1780_v52  ;;  %v1417_v14 = vmul.f32 %v4995_v3, %v6816_v37  ;;  %v352_v32 = vpop.permute.xlu0 %351 }
 0x328   : > { %v1824_v13 = vadd.f32 %v1792_v24, %v1630_v33  ;;  %v1425_v62 = vmul.f32 %v4995_v3, %v6817_v19  ;;  %v1986_v1 = vmul.f32 %v5279_v9, %v4387_v8  ;;  %v5303_v20 = vadd.f32 %v1405_v10, %v5106_v63  ;;  %v5318_v8 = vld [vmem:[%s6383_s2] ss:$0 sm:$0xff] }
 0x329   : > { %v5305_v31 = vadd.f32 %v1810_v5, %v1648_v7  ;;  %v5307_v24 = vadd.f32 %v1820_v50, %v1658_v39  ;;  %v474_v23 = vmul.f32 %v4412_v17, %v352_v32  ;;  %v1410_v54 = vmul.f32 %v4995_v3, %v6819_v59  ;;  %v6820_v7 = vld [vmem:[#allocation151_spill] sm:$0xff]  ;;  %v3455_v50 = vld [vmem:[%s3582_s26 + $0xf8] sm:$0xff] }
 0x32a   : > { %v1619_v33 = vmul.f32 %v5026_v56, %v4414_v28  ;;  %v1047_v60 = vadd.f32 %v4863_v12, %v853_v45  ;;  %v2018_v63 = vadd.f32 %v1986_v1, %v1824_v13  ;;  %v5321_v10 = vadd.f32 %v1414_v4, %v5117_v58  ;;  %v6821_v45 = vld [vmem:[#allocation153_spill] sm:$0xff]  ;;  %v5340_v58 = vld [vmem:[%s6384_s3] ss:$0 sm:$0xff]  ;;  %v6825_v1 = vld [vmem:[#allocation24_spill] sm:$0xff] }
 0x32b   : > { %6818 = vst [vmem:[#allocation55_spill] sm:$0xff] %v5307_v24  ;;  %v5324_v51 = vadd.f32 %v1407_v47, %v5120_v43  ;;  %v5328_v34 = vmul.f32 %v5026_v56, %v6820_v7  ;;  %v668_v28 = vadd.f32 %v4463_v41, %v474_v23  ;;  %v5332_v12 = vadd.f32 %v1417_v14, %v5129_v36  ;;  %v6822_v43 = vld [vmem:[#allocation154_spill] sm:$0xff]  ;;  %v6823_v47 = vld [vmem:[#allocation155_spill] sm:$0xff] }
 0x32c   : > { %v1420_v52 = vmul.f32 %v4995_v3, %v6821_v45  ;;  %v1457_v39 = vadd.f32 %v1425_v62, %v5196_v22  ;;  %v2050_v5 = vmax.f32 %v2018_v63, 0.0  ;;  %v5344_v4 = vmul.f32 %v5026_v56, %v6822_v43  ;;  %v6831_v43 = vld [vmem:[#allocation196_spill] sm:$0xff] }
 0x32d   : > { %v1413_v41 = vmul.f32 %v4995_v3, %v6823_v47  ;;  %v862_v36 = vadd.f32 %v4610_v35, %v668_v28  ;;  %1981 = vperm.xlu1 %3255, %v3455_v50   ;;  %v5352_v22 = vadd.f32 %v1410_v54, %v5136_v2  ;;  %v1241_v37 = vadd.f32 %v6824_v21, %v1047_v60  ;;  %v6826_v2 = vld [vmem:[#allocation157_spill] sm:$0xff]  ;;  %v6828_v28 = vld [vmem:[#allocation40_spill] sm:$0xff]  ;;  %v6832_v21 = vld [vmem:[#allocation158_spill] sm:$0xff] }
 0x32e   : > { %3258 = vset.pattern.permute.xlu2 %v6581_v6  ;;  %v1651_v13 = vadd.f32 %v1619_v33, %v1457_v39  ;;  %v1752_v14 = vpop.permute.xlu1 %1751  ;;  %v2086_v19 = vadd.f32 %v5318_v8, %v2050_v5  ;;  %v471_v62 = vmul.f32 %v4412_v17, %v5239_v18  ;;  %v1858_v23 = vpop.permute.xlu2 %1857  ;;  %v5361_v59 = vadd.f32 %v1420_v52, %v5143_v25  ;;  %v6827_v33 = vld [vmem:[#allocation169_spill] sm:$0xff]  ;;  %v6830_v52 = vld [vmem:[#allocation170_spill] sm:$0xff] }
 0x32f   : > { %v1056_v32 = vadd.f32 %v6825_v1, %v862_v36  ;;  %v1813_v35 = vmul.f32 %v5071_v27, %v1752_v14  ;;  %v5365_v54 = vmul.f32 %v5026_v56, %v6826_v2  ;;  %v1428_v60 = vmul.f32 %v4995_v3, %v6827_v33  ;;  %v367_v63 = vpop.permute.xlu0 %366  ;;  %v6835_v1 = vld [vmem:[#allocation195_spill] sm:$0xff]  ;;  %v6837_v33 = vld [vmem:[#allocation168_spill] sm:$0xff] }
 0x330   : > { %v2122_v7 = vmul.f32 %v5340_v58, %v2086_v19  ;;  %v5371_v18 = vadd.f32 %v1413_v41, %v5156_v49  ;;  %v477_v25 = vmul.f32 %v4412_v17, %v367_v63  ;;  %v1600_v5 = vmul.f32 %v5026_v56, %v6830_v52  ;;  %v6833_v41 = vld [vmem:[#allocation194_spill] sm:$0xff]  ;;  %v6840_v52 = vld [vmem:[#allocation172_spill] sm:$0xff] }
 0x331   : > { %v1250_v45 = vadd.f32 %v6828_v28, %v1056_v32  ;;  %v5374_v39 = vadd.f32 %v1813_v35, %v1651_v13  ;;  %v1622_v47 = vmul.f32 %v5026_v56, %v6831_v43  ;;  %v1435_v36 = vadd.f32 %v5200_v46, %v1241_v37  ;;  %v6834_v13 = vld [vmem:[#allocation46_spill] sm:$0xff]  ;;  %v6836_v35 = vld [vmem:[#allocation165_spill] sm:$0xff]  ;;  %v6838_v37 = vld [vmem:[#allocation167_spill] sm:$0xff] }
 0x332   : > { %v2157_v50 = vsel %vm2153_vm0, %v2122_v7, 0.0  ;;  %v5385_v49 = vmul.f32 %v4995_v3, %v6832_v21  ;;  %v665_v14 = vadd.f32 %v6833_v41, %v471_v62  ;;  %v671_v32 = vadd.f32 %v6835_v1, %v477_v25  ;;  %v6839_v28 = vld [vmem:[#allocation171_spill] sm:$0xff]  ;;  %v6841_v25 = vld [vmem:[#allocation10_spill] sm:$0xff]  ;;  %v6842_v41 = vld [vmem:[#allocation173_spill] sm:$0xff] }
 0x333   : > { %6829 = vst [vmem:[#allocation63_spill] sm:$0xff] %v5374_v39  ;;  %v1444_v19 = vadd.f32 %v6834_v13, %v1250_v45  ;;  %2158 = vadd.xlane.f32.xlu0 %v2157_v50  ;;  %v5392_v2 = vmul.f32 %v5071_v27, %v6836_v35  ;;  %v1800_v46 = vmul.f32 %v5071_v27, %v6837_v33 }
 0x334   : > { %v1597_v63 = vmul.f32 %v5026_v56, %v6838_v37  ;;  %v1460_v7 = vadd.f32 %v1428_v60, %v5210_v40  ;;  %v1803_v62 = vmul.f32 %v5071_v27, %v6839_v28  ;;  %v1431_v45 = vmul.f32 %v4995_v3, %v6840_v52  ;;  %v6843_v60 = vld [vmem:[#allocation6_spill] sm:$0xff] }
 0x335   : > { %v865_v43 = vadd.f32 %v6841_v25, %v671_v32  ;;  %v1638_v50 = vadd.f32 %v5230_v11, %v1444_v19  ;;  %3257 = vset.pattern.permute.xlu1 %v6581_v6  ;;  %v1632_v21 = vadd.f32 %v1600_v5, %v5233_v15  ;;  %v1602_v13 = vmul.f32 %v5026_v56, %v6842_v41  ;;  %v6844_v37 = vld [vmem:[#allocation26_spill] sm:$0xff]  ;;  %v6845_v25 = vld [vmem:[#allocation175_spill] sm:$0xff]  ;;  %v6847_v5 = vld [vmem:[#allocation192_spill] sm:$0xff] }
 0x336   : > { %v1654_v1 = vadd.f32 %v1622_v47, %v1460_v7  ;;  %v1629_v35 = vadd.f32 %v1597_v63, %v1435_v36  ;;  %v1764_v40 = vpop.permute.xlu1 %1763  ;;  %v859_v33 = vadd.f32 %v6843_v60, %v665_v14  ;;  %v1870_v39 = vpop.permute.xlu2 %1869  ;;  %v1434_v11 = vmul.f32 %v4995_v3, %v6845_v25  ;;  %v6846_v6 = vld [vmem:[#allocation191_spill] sm:$0xff]  ;;  %v6848_v63 = vld [vmem:[#allocation41_spill] sm:$0xff] }
 0x337   : > { %v1059_v28 = vadd.f32 %v6844_v37, %v865_v43  ;;  %v1816_v52 = vmul.f32 %v5071_v27, %v1764_v40  ;;  %v1832_v32 = vadd.f32 %v1800_v46, %v1638_v50  ;;  %v1994_v15 = vmul.f32 %v5279_v9, %v6846_v6  ;;  %v382_v36 = vpop.permute.xlu0 %381  ;;  %v6850_v50 = vld [vmem:[#allocation174_spill] sm:$0xff]  ;;  %v6851_v41 = vld [vmem:[#allocation7_spill] sm:$0xff] }
 0x338   : > { %v1791_v19 = vmul.f32 %v5071_v27, %v6847_v5  ;;  %v1985_v47 = vmul.f32 %v5279_v9, %v1858_v23  ;;  %v1463_v14 = vadd.f32 %v1431_v45, %v5249_v48  ;;  %v480_v46 = vmul.f32 %v4412_v17, %v382_v36  ;;  %v6852_v25 = vld [vmem:[#allocation23_spill] sm:$0xff]  ;;  %v6853_v45 = vld [vmem:[#allocation197_spill] sm:$0xff]  ;;  %v6855_v36 = vld [vmem:[#allocation8_spill] sm:$0xff] }
 0x339   : > { %v1253_v7 = vadd.f32 %v6848_v63, %v1059_v28  ;;  %v5421_v43 = vadd.f32 %v1816_v52, %v1654_v1  ;;  %v1806_v3 = vmul.f32 %v5071_v27, %v6850_v50  ;;  %v1625_v40 = vmul.f32 %v5026_v56, %v6851_v41  ;;  %v6854_v52 = vld [vmem:[#allocation176_spill] sm:$0xff] }
 0x33a   : > { %v1823_v60 = vadd.f32 %v1791_v19, %v1629_v35  ;;  %v5428_v37 = vadd.f32 %v1994_v15, %v1832_v32  ;;  %v1634_v23 = vadd.f32 %v1602_v13, %v5259_v38  ;;  %v1053_v6 = vadd.f32 %v6852_v25, %v859_v33  ;;  %v6856_v35 = vld [vmem:[#allocation177_spill] sm:$0xff]  ;;  %v6857_v38 = vld [vmem:[#allocation178_spill] sm:$0xff]  ;;  %v6859_v19 = vld [vmem:[#allocation179_spill] sm:$0xff] }
 0x33b   : > { %6849 = vst [vmem:[#allocation58_spill] sm:$0xff] %v5421_v43  ;;  %v1447_v48 = vadd.f32 %v5094_v53, %v1253_v7  ;;  %v674_v1 = vadd.f32 %v6853_v45, %v480_v46  ;;  %v1466_v28 = vadd.f32 %v1434_v11, %v5262_v55  ;;  %v1605_v5 = vmul.f32 %v5026_v56, %v6854_v52  ;;  %v6858_v33 = vld [vmem:[#allocation14_spill] sm:$0xff]  ;;  %v6860_v11 = vld [vmem:[#allocation193_spill] sm:$0xff]  ;;  %v6863_v52 = vld [vmem:[#allocation27_spill] sm:$0xff] }
 0x33c   : > { %v1796_v63 = vmul.f32 %v5071_v27, %v6855_v36  ;;  %v2017_v50 = vadd.f32 %v1985_v47, %v1823_v60  ;;  %v5441_v32 = vmul.f32 %v5071_v27, %v6856_v35  ;;  %v1599_v13 = vmul.f32 %v5026_v56, %v6857_v38  ;;  %v6861_v46 = vld [vmem:[#allocation198_spill] sm:$0xff] }
 0x33d   : > { %v868_v53 = vadd.f32 %v6858_v33, %v674_v1  ;;  %v1641_v15 = vadd.f32 %v5253_v26, %v1447_v48  ;;  %v1608_v55 = vmul.f32 %v5026_v56, %v6859_v19  ;;  %v1997_v7 = vmul.f32 %v5279_v9, %v6860_v11  ;;  %v6862_v25 = vld [vmem:[#allocation34_spill] sm:$0xff] }
 0x33e   : > { %v1794_v47 = vmul.f32 %v5071_v27, %v6861_v46  ;;  %v1657_v41 = vadd.f32 %v1625_v40, %v1463_v14  ;;  %v1776_v60 = vpop.permute.xlu1 %1775  ;;  %v1247_v45 = vadd.f32 %v6862_v25, %v1053_v6  ;;  %v1878_v1 = vpop.permute.xlu2 %1877  ;;  %v1828_v26 = vadd.f32 %v1796_v63, %v1634_v23  ;;  %v6864_v43 = vld [vmem:[#allocation42_spill] sm:$0xff]  ;;  %v6866_v23 = vld [vmem:[#allocation17_spill] sm:$0xff]  ;;  %v6869_v25 = vld [vmem:[#allocation199_spill] sm:$0xff] }
 0x33f   : > { %v1062_v36 = vadd.f32 %v6863_v52, %v868_v53  ;;  %v1819_v35 = vmul.f32 %v5071_v27, %v1776_v60  ;;  %v1835_v38 = vadd.f32 %v1803_v62, %v1641_v15  ;;  %v2049_v48 = vmax.f32 %v2017_v50, 0.0  ;;  %v397_v19 = vpop.permute.xlu0 %396  ;;  %v6865_v53 = vld [vmem:[#allocation180_spill] sm:$0xff]  ;;  %v6867_v15 = vld [vmem:[#allocation51_spill] sm:$0xff] }
 0x340   : > { %v1988_v33 = vmul.f32 %v5279_v9, %v1870_v39  ;;  %v1990_v11 = vmul.f32 %v5279_v9, %v1878_v1  ;;  %v483_v14 = vmul.f32 %v4412_v17, %v397_v19  ;;  %v1637_v6 = vadd.f32 %v1605_v5, %v5272_v0 }
 0x341   : > { %v1256_v24 = vadd.f32 %v6864_v43, %v1062_v36  ;;  %v5459_v46 = vadd.f32 %v1819_v35, %v1657_v41  ;;  %v5462_v40 = vadd.f32 %v1997_v7, %v1835_v38  ;;  %v5467_v62 = vmul.f32 %v5071_v27, %v6865_v53  ;;  %v6868_v43 = vld [vmem:[#allocation54_spill] sm:$0xff]  ;;  %v6870_v7 = vld [vmem:[#allocation20_spill] sm:$0xff]  ;;  %v6871_v38 = vld [vmem:[#allocation15_spill] sm:$0xff] }
 0x342   : > { %v1628_v39 = vmul.f32 %v5026_v56, %v6866_v23  ;;  %v2022_v63 = vadd.f32 %v1990_v11, %v1828_v26  ;;  %v1826_v50 = vadd.f32 %v1794_v47, %v1632_v21  ;;  %v1441_v60 = vadd.f32 %v6867_v15, %v1247_v45  ;;  %v6872_v47 = vld [vmem:[#allocation181_spill] sm:$0xff]  ;;  %v6873_v45 = vld [vmem:[#allocation200_spill] sm:$0xff] }
 0x343   : > { %v1450_v41 = vadd.f32 %v6868_v43, %v1256_v24  ;;  %v677_v52 = vadd.f32 %v6869_v25, %v483_v14  ;;  %v1631_v17 = vadd.f32 %v1599_v13, %v5303_v20  ;;  %v1799_v0 = vmul.f32 %v5071_v27, %v6870_v7  ;;  %v6874_v14 = vld [vmem:[#allocation30_spill] sm:$0xff] }
 0x344   : > { %v2085_v5 = vadd.f32 %v5318_v8, %v2049_v48  ;;  %v2054_v36 = vmax.f32 %v2022_v63, 0.0  ;;  %v1640_v35 = vadd.f32 %v1608_v55, %v5321_v10  ;;  %v2020_v1 = vadd.f32 %v1988_v33, %v1826_v50  ;;  %v5498_v25 = vld [vmem:[%s6382_s1] ss:$0 sm:$0xff] }
 0x345   : > { %v871_v26 = vadd.f32 %v6871_v38, %v677_v52  ;;  %v1644_v21 = vadd.f32 %v5269_v29, %v1450_v41  ;;  %v1601_v24 = vmul.f32 %v5026_v56, %v6872_v47  ;;  %v2000_v19 = vmul.f32 %v5279_v9, %v6873_v45  ;;  %v6879_v38 = vld [vmem:[#allocation3_spill] sm:$0xff] }
 0x346   : > { %v1660_v20 = vadd.f32 %v1628_v39, %v1466_v28  ;;  %v2090_v13 = vadd.f32 %v5318_v8, %v2054_v36  ;;  %v1788_v11 = vpop.permute.xlu1 %1787  ;;  %v1890_v10 = vpop.permute.xlu2 %1889  ;;  %v1635_v55 = vadd.f32 %v5207_v42, %v1441_v60  ;;  %v1831_v23 = vadd.f32 %v1799_v0, %v1637_v6  ;;  %v6875_v39 = vld [vmem:[#allocation44_spill] sm:$0xff]  ;;  %v6877_v0 = vld [vmem:[#allocation29_spill] sm:$0xff]  ;;  %v6880_v47 = vld [vmem:[#allocation183_spill] sm:$0xff] }
 0x347   : > { %v1065_v48 = vadd.f32 %v6874_v14, %v871_v26  ;;  %v1822_v53 = vmul.f32 %v5071_v27, %v1788_v11  ;;  %v1838_v33 = vadd.f32 %v1806_v3, %v1644_v21  ;;  %v412_v29 = vpop.permute.xlu0 %411  ;;  %v1993_v63 = vmul.f32 %v5279_v9, %v1890_v10  ;;  %v6876_v3 = vld [vmem:[#allocation19_spill] sm:$0xff]  ;;  %v6878_v36 = vld [vmem:[#allocation56_spill] sm:$0xff]  ;;  %v6882_v11 = vld [vmem:[#allocation190_spill] sm:$0xff] }
 0x348   : > { %v2126_v50 = vmul.f32 %v5340_v58, %v2090_v13  ;;  %v2121_v15 = vmul.f32 %v5340_v58, %v2085_v5  ;;  %v2052_v28 = vmax.f32 %v2020_v1, 0.0  ;;  %v486_v42 = vmul.f32 %v5498_v25, %v412_v29 }
 0x349   : > { %v1259_v43 = vadd.f32 %v6875_v39, %v1065_v48  ;;  %v5493_v41 = vadd.f32 %v1822_v53, %v1660_v20  ;;  %v1793_v6 = vmul.f32 %v5071_v27, %v6876_v3  ;;  %v2025_v60 = vadd.f32 %v1993_v63, %v1831_v23  ;;  %v6881_v20 = vld [vmem:[#allocation182_spill] sm:$0xff]  ;;  %v6883_v53 = vld [vmem:[#allocation11_spill] sm:$0xff] }
 0x34a   : > { %v2169_v52 = vsel %vm2153_vm0, %v2126_v50, 0.0  ;;  %v5504_v7 = vadd.f32 %v2000_v19, %v1838_v33  ;;  %v1802_v5 = vmul.f32 %v5071_v27, %v6877_v0  ;;  %v680_v26 = vadd.f32 %v6879_v38, %v486_v42  ;;  %v6888_v38 = vld [vmem:[#allocation35_spill] sm:$0xff] }
 0x34b   : > { %v1453_v1 = vadd.f32 %v6878_v36, %v1259_v43  ;;  %2170 = vadd.xlane.f32.xlu0 %v2169_v52  ;;  %v1829_v21 = vadd.f32 %v5392_v2, %v1635_v55  ;;  %v5513_v45 = vmul.f32 %v5071_v27, %v6880_v47  ;;  %v1611_v13 = vmul.f32 %v5026_v56, %v6881_v20  ;;  %v6884_v55 = vld [vmem:[#allocation9_spill] sm:$0xff] }
 0x34c   : > { %v1991_v19 = vmul.f32 %v5279_v9, %v6882_v11  ;;  %v2057_v14 = vmax.f32 %v2025_v60, 0.0  ;;  %v2088_v48 = vadd.f32 %v5318_v8, %v2052_v28  ;;  %v874_v10 = vadd.f32 %v6883_v53, %v680_v26  ;;  %v6885_v43 = vld [vmem:[#allocation25_spill] sm:$0xff]  ;;  %v6889_v11 = vld [vmem:[#allocation52_spill] sm:$0xff] }
 0x34d   : > { %v2154_v33 = vsel %vm2153_vm0, %v2121_v15, 0.0  ;;  %v1647_v23 = vadd.f32 %v5294_v30, %v1453_v1  ;;  %v1633_v2 = vadd.f32 %v1601_v24, %v5324_v51  ;;  %v2003_v29 = vmul.f32 %v5279_v9, %v6884_v55  ;;  %v6886_v15 = vld [vmem:[#allocation31_spill] sm:$0xff] }
 0x34e   : > { %v1825_v63 = vadd.f32 %v1793_v6, %v1631_v17  ;;  %v2093_v50 = vadd.f32 %v5318_v8, %v2057_v14  ;;  %v1834_v39 = vadd.f32 %v1802_v5, %v1640_v35  ;;  %v1068_v42 = vadd.f32 %v6885_v43, %v874_v10  ;;  %v1866_v3 = vpop.permute.xlu1 %1865  ;;  %v1902_v28 = vpop.permute.xlu2 %1901  ;;  %v6887_v6 = vld [vmem:[#allocation36_spill] sm:$0xff]  ;;  %v6894_v43 = vld [vmem:[#allocation13_spill] sm:$0xff] }
 0x34f   : > { %2155 = vadd.xlane.f32.xlu2 %v2154_v33  ;;  %v2023_v60 = vadd.f32 %v1991_v19, %v1829_v21  ;;  %v1841_v52 = vadd.f32 %v5441_v32, %v1647_v23  ;;  %v1795_v30 = vmul.f32 %v5071_v27, %v6886_v15  ;;  %v1987_v51 = vmul.f32 %v5279_v9, %v1866_v3  ;;  %v427_v24 = vpop.permute.xlu0 %426  ;;  %v6890_v14 = vld [vmem:[#allocation4_spill] sm:$0xff]  ;;  %v6892_v23 = vld [vmem:[#allocation185_spill] sm:$0xff] }
 0x350   : > { %v1996_v0 = vmul.f32 %v5279_v9, %v1902_v28  ;;  %v2129_v17 = vmul.f32 %v5340_v58, %v2093_v50  ;;  %v1262_v36 = vadd.f32 %v6887_v6, %v1068_v42  ;;  %v489_v35 = vmul.f32 %v5498_v25, %v427_v24  ;;  %v6891_v33 = vld [vmem:[#allocation184_spill] sm:$0xff]  ;;  %v6895_v15 = vld [vmem:[#allocation45_spill] sm:$0xff] }
 0x351   : > { %v2124_v5 = vmul.f32 %v5340_v58, %v2088_v48  ;;  %v5537_v1 = vadd.f32 %v2003_v29, %v1841_v52  ;;  %v1805_v32 = vmul.f32 %v5071_v27, %v6888_v38  ;;  %v2019_v26 = vadd.f32 %v1987_v51, %v1825_v63  ;;  %v6893_v63 = vld [vmem:[#allocation16_spill] sm:$0xff] }
 0x352   : > { %v2028_v21 = vadd.f32 %v1996_v0, %v1834_v39  ;;  %v2178_v47 = vsel %vm2153_vm0, %v2129_v17, 0.0  ;;  %v1643_v20 = vadd.f32 %v1611_v13, %v5332_v12  ;;  %v1456_v19 = vadd.f32 %v6889_v11, %v1262_v36  ;;  %v6896_v24 = vld [vmem:[#allocation32_spill] sm:$0xff] }
 0x353   : > { %v683_v53 = vadd.f32 %v6890_v14, %v489_v35  ;;  %2179 = vadd.xlane.f32.xlu0 %v2178_v47  ;;  %v2055_v10 = vmax.f32 %v2023_v60, 0.0  ;;  %v1604_v48 = vmul.f32 %v5026_v56, %v6891_v33  ;;  %v1614_v55 = vmul.f32 %v5026_v56, %v6892_v23  ;;  %v6900_v23 = vld [vmem:[#allocation5_spill] sm:$0xff] }
 0x354   : > { %v2051_v29 = vmax.f32 %v2019_v26, 0.0  ;;  %v2060_v50 = vmax.f32 %v2028_v21, 0.0  ;;  %v2006_v39 = vmul.f32 %v5279_v9, %v6893_v63  ;;  %v2163_v12 = vsel %vm2153_vm0, %v2124_v5, 0.0  ;;  %v6898_v21 = vld [vmem:[#allocation37_spill] sm:$0xff] }
 0x355   : > { %v877_v42 = vadd.f32 %v6894_v43, %v683_v53  ;;  %v1650_v13 = vadd.f32 %v5328_v34, %v1456_v19  ;;  %v1827_v3 = vadd.f32 %v1795_v30, %v1633_v2  ;;  %v1837_v28 = vadd.f32 %v1805_v32, %v1643_v20  ;;  %v6897_v32 = vld [vmem:[#allocation39_spill] sm:$0xff] }
 0x356   : > { %v2087_v60 = vadd.f32 %v5318_v8, %v2051_v29  ;;  %v2096_v52 = vadd.f32 %v5318_v8, %v2060_v50  ;;  %v1798_v51 = vmul.f32 %v5071_v27, %v6895_v15  ;;  %v1874_v17 = vpop.permute.xlu1 %1873  ;;  %v1914_v6 = vpop.permute.xlu2 %1913  ;;  %v2091_v36 = vadd.f32 %v5318_v8, %v2055_v10  ;;  %v6899_v10 = vld [vmem:[#allocation57_spill] sm:$0xff]  ;;  %v6903_v15 = vld [vmem:[#allocation22_spill] sm:$0xff] }
 0x357   : > { %2164 = vadd.xlane.f32.xlu2 %v2163_v12  ;;  %v1071_v0 = vadd.f32 %v6896_v24, %v877_v42  ;;  %v1844_v35 = vadd.f32 %v5467_v62, %v1650_v13  ;;  %v1989_v34 = vmul.f32 %v5279_v9, %v1874_v17  ;;  %v442_v2 = vpop.permute.xlu0 %441  ;;  %v1999_v30 = vmul.f32 %v5279_v9, %v1914_v6  ;;  %v6901_v12 = vld [vmem:[#allocation187_spill] sm:$0xff] }
 0x358   : > { %v2123_v5 = vmul.f32 %v5340_v58, %v2087_v60  ;;  %v2132_v38 = vmul.f32 %v5340_v58, %v2096_v52  ;;  %v1808_v26 = vmul.f32 %v5071_v27, %v6897_v32  ;;  %v492_v20 = vmul.f32 %v5498_v25, %v442_v2 }
 0x359   : > { %v1265_v47 = vadd.f32 %v6898_v21, %v1071_v0  ;;  %v5569_v11 = vadd.f32 %v2006_v39, %v1844_v35  ;;  %v2021_v19 = vadd.f32 %v1989_v34, %v1827_v3  ;;  %v2031_v62 = vadd.f32 %v1999_v30, %v1837_v28  ;;  %v6902_v3 = vld [vmem:[#allocation18_spill] sm:$0xff] }
 0x35a   : > { %v2160_v14 = vsel %vm2153_vm0, %v2123_v5, 0.0  ;;  %v2187_v53 = vsel %vm2153_vm0, %v2132_v38, 0.0  ;;  %v686_v29 = vadd.f32 %v6900_v23, %v492_v20  ;;  %v2127_v50 = vmul.f32 %v5340_v58, %v2091_v36  ;;  %v6905_v5 = vld [vmem:[#allocation47_spill] sm:$0xff] }
 0x35b   : > { %v1459_v33 = vadd.f32 %v6899_v10, %v1265_v47  ;;  %2161 = vadd.xlane.f32.xlu1 %v2160_v14  ;;  %2188 = vadd.xlane.f32.xlu0 %v2187_v53  ;;  %v1636_v63 = vadd.f32 %v1604_v48, %v5352_v22  ;;  %v1646_v43 = vadd.f32 %v1614_v55, %v5361_v59  ;;  %v2053_v39 = vmax.f32 %v2021_v19, 0.0  ;;  %v6904_v48 = vld [vmem:[#allocation28_spill] sm:$0xff]  ;;  %v6907_v53 = vld [vmem:[#allocation59_spill] sm:$0xff] }
 0x35c   : > { %v2063_v42 = vmax.f32 %v2031_v62, 0.0  ;;  %v1607_v13 = vmul.f32 %v5026_v56, %v6901_v12  ;;  %v880_v28 = vadd.f32 %v6902_v3, %v686_v29  ;;  %v2058_v60 = vmax.f32 %v5428_v37, 0.0  ;;  %v6906_v62 = vld [vmem:[#allocation53_spill] sm:$0xff] }
 0x35d   : > { %v1653_v52 = vadd.f32 %v5344_v4, %v1459_v33  ;;  %v2009_v24 = vmul.f32 %v5279_v9, %v6903_v15  ;;  %v1830_v0 = vadd.f32 %v1798_v51, %v1636_v63  ;;  %v2089_v17 = vadd.f32 %v5318_v8, %v2053_v39  ;;  %v6908_v33 = vld [vmem:[#allocation12_spill] sm:$0xff]  ;;  %v6910_v39 = vld [vmem:[#allocation21_spill] sm:$0xff] }
 0x35e   : > { %v2099_v22 = vadd.f32 %v5318_v8, %v2063_v42  ;;  %v1840_v59 = vadd.f32 %v1808_v26, %v1646_v43  ;;  %v1074_v55 = vadd.f32 %v6904_v48, %v880_v28  ;;  %v1886_v6 = vpop.permute.xlu1 %1885  ;;  %v1926_v36 = vpop.permute.xlu2 %1925  ;;  %v2172_v35 = vsel %vm2153_vm0, %v2127_v50, 0.0  ;;  %v6912_v15 = vld [vmem:[#allocation189_spill] sm:$0xff] }
 0x35f   : > { %v1847_v34 = vadd.f32 %v5513_v45, %v1653_v52  ;;  %v1992_v37 = vmul.f32 %v5279_v9, %v1886_v6  ;;  %v2002_v2 = vmul.f32 %v5279_v9, %v1926_v36  ;;  %v2125_v51 = vmul.f32 %v5340_v58, %v2089_v17 }
 0x360   : > { %v457_v4 = vpop.permute.xlu0 %456  ;;  %v2135_v30 = vmul.f32 %v5340_v58, %v2099_v22  ;;  %v1268_v38 = vadd.f32 %v6905_v5, %v1074_v55  ;;  %v2094_v26 = vadd.f32 %v5318_v8, %v2058_v60  ;;  %v1801_v14 = vmul.f32 %v5071_v27, %v6906_v62  ;;  %v6911_v60 = vld [vmem:[#allocation160_spill] sm:$0xff]  ;;  %v6916_v5 = vld [vmem:[#allocation49_spill] sm:$0xff] }
 0x361   : > { %v495_v32 = vmul.f32 %v5498_v25, %v457_v4  ;;  %v5597_v21 = vadd.f32 %v2009_v24, %v1847_v34  ;;  %v2024_v47 = vadd.f32 %v1992_v37, %v1830_v0  ;;  %v2034_v20 = vadd.f32 %v2002_v2, %v1840_v59  ;;  %v6909_v25 = vld [vmem:[#allocation186_spill] sm:$0xff]  ;;  %v6914_v59 = vld [vmem:[#allocation33_spill] sm:$0xff] }
 0x362   : > { %v2166_v45 = vsel %vm2153_vm0, %v2125_v51, 0.0  ;;  %v2196_v19 = vsel %vm2153_vm0, %v2135_v30, 0.0  ;;  %v1462_v10 = vadd.f32 %v6907_v53, %v1268_v38  ;;  %v1818_v29 = vmul.f32 %v5071_v27, %v6909_v25  ;;  %v6915_v34 = vld [vmem:[#allocation50_spill] sm:$0xff] }
 0x363   : > { %v689_v23 = vadd.f32 %v6908_v33, %v495_v32  ;;  %2173 = vadd.xlane.f32.xlu1 %v2172_v35  ;;  %2167 = vadd.xlane.f32.xlu2 %v2166_v45  ;;  %v1639_v50 = vadd.f32 %v1607_v13, %v5371_v18  ;;  %v2056_v63 = vmax.f32 %v2024_v47, 0.0  ;;  %v2066_v43 = vmax.f32 %v2034_v20, 0.0  ;;  %v6913_v13 = vld [vmem:[#allocation38_spill] sm:$0xff]  ;;  %v6918_v45 = vld [vmem:[#allocation60_spill] sm:$0xff] }
 0x364   : > { %2197 = vadd.xlane.f32.xlu0 %v2196_v19  ;;  %v2130_v12 = vmul.f32 %v5340_v58, %v2094_v26  ;;  %v2061_v3 = vmax.f32 %v5462_v40, 0.0  ;;  %v1656_v28 = vadd.f32 %v5365_v54, %v1462_v10  ;;  %v1627_v52 = vmul.f32 %v5026_v56, %v6911_v60  ;;  %v6917_v47 = vld [vmem:[#allocation62_spill] sm:$0xff] }
 0x365   : > { %v883_v42 = vadd.f32 %v6910_v39, %v689_v23  ;;  %v1610_v24 = vmul.f32 %v5026_v56, %v6912_v15  ;;  %v2092_v0 = vadd.f32 %v5318_v8, %v2056_v63  ;;  %v2102_v18 = vadd.f32 %v5318_v8, %v2066_v43  ;;  %v6920_v43 = vld [vmem:[#allocation48_spill] sm:$0xff] }
 0x366   : > { %v2012_v17 = vmul.f32 %v5279_v9, %v6913_v13  ;;  %v1833_v22 = vadd.f32 %v1801_v14, %v1639_v50  ;;  %v1898_v55 = vpop.permute.xlu1 %1897  ;;  %v1850_v6 = vadd.f32 %v1818_v29, %v1656_v28  ;;  %v2181_v4 = vsel %vm2153_vm0, %v2130_v12, 0.0  ;;  %v6919_v14 = vld [vmem:[#allocation188_spill] sm:$0xff] }
 0x367   : > { %v1077_v48 = vadd.f32 %v6914_v59, %v883_v42  ;;  %v1995_v54 = vmul.f32 %v5279_v9, %v1898_v55  ;;  %v2128_v35 = vmul.f32 %v5340_v58, %v2092_v0  ;;  %v2138_v56 = vmul.f32 %v5340_v58, %v2102_v18 }
 0x368   : > { %v1938_v40 = vpop.permute.xlu2 %1937  ;;  %v2097_v2 = vadd.f32 %v5318_v8, %v2061_v3  ;;  %v5628_v51 = vadd.f32 %v2012_v17, %v1850_v6  ;;  %v1448_v20 = vadd.f32 %v5385_v49, %v6917_v47  ;;  %v1804_v19 = vmul.f32 %v5071_v27, %v6918_v45 }
 0x369   : > { %v2005_v36 = vmul.f32 %v5279_v9, %v1938_v40  ;;  %v1271_v37 = vadd.f32 %v6915_v34, %v1077_v48  ;;  %v2027_v30 = vadd.f32 %v1995_v54, %v1833_v22  ;;  %v2175_v32 = vsel %vm2153_vm0, %v2128_v35, 0.0 }
 0x36a   : > { %v2205_v26 = vsel %vm2153_vm0, %v2138_v56, 0.0  ;;  %v1821_v53 = vmul.f32 %v5071_v27, %v6919_v14  ;;  %v1642_v23 = vadd.f32 %v1610_v24, %v1448_v20  ;;  %v2133_v25 = vmul.f32 %v5340_v58, %v2097_v2 }
 0x36b   : > { %v2037_v38 = vadd.f32 %v2005_v36, %v6916_v5  ;;  %v1465_v62 = vadd.f32 %v5177_v16, %v1271_v37  ;;  %2182 = vadd.xlane.f32.xlu1 %v2181_v4  ;;  %2176 = vadd.xlane.f32.xlu2 %v2175_v32  ;;  %v2059_v10 = vmax.f32 %v2027_v30, 0.0  ;;  %v2064_v29 = vmax.f32 %v5504_v7, 0.0 }
 0x36c   : > { %2206 = vadd.xlane.f32.xlu0 %v2205_v26  ;;  %v2015_v16 = vmul.f32 %v5279_v9, %v6920_v43  ;;  %v1836_v39 = vadd.f32 %v1804_v19, %v1642_v23  ;;  %v2067_v55 = vmax.f32 %v5537_v1, 0.0  ;;  %v2070_v47 = vmax.f32 %v5569_v11, 0.0  ;;  %v6921_v23 = vld [vmem:[#allocation55_spill] sm:$0xff] }
 0x36d   : > { %v2069_v33 = vmax.f32 %v2037_v38, 0.0  ;;  %v1659_v50 = vadd.f32 %v1627_v52, %v1465_v62  ;;  %v2095_v49 = vadd.f32 %v5318_v8, %v2059_v10  ;;  %v2190_v52 = vsel %vm2153_vm0, %v2133_v25, 0.0 }
 0x36e   : > { %v1910_v42 = vpop.permute.xlu1 %1909  ;;  %v2100_v15 = vadd.f32 %v5318_v8, %v2064_v29  ;;  %v2103_v4 = vadd.f32 %v5318_v8, %v2067_v55  ;;  %v6923_v55 = vld [vmem:[#allocation58_spill] sm:$0xff] }
 0x36f   : > { %v2105_v63 = vadd.f32 %v5318_v8, %v2069_v33  ;;  %v1853_v27 = vadd.f32 %v1821_v53, %v1659_v50  ;;  %v1998_v3 = vmul.f32 %v5279_v9, %v1910_v42  ;;  %v2131_v60 = vmul.f32 %v5340_v58, %v2095_v49 }
 0x370   : > { %v1950_v12 = vpop.permute.xlu2 %1949  ;;  %v2136_v48 = vmul.f32 %v5340_v58, %v2100_v15  ;;  %v2139_v26 = vmul.f32 %v5340_v58, %v2103_v4  ;;  %v2106_v33 = vadd.f32 %v5318_v8, %v2070_v47  ;;  %v2073_v42 = vmax.f32 %v5597_v21, 0.0 }
 0x371   : > { %v2008_v28 = vmul.f32 %v5279_v9, %v1950_v12  ;;  %v2141_v7 = vmul.f32 %v5340_v58, %v2105_v63  ;;  %v5652_v24 = vadd.f32 %v2015_v16, %v1853_v27  ;;  %v2030_v0 = vadd.f32 %v1998_v3, %v1836_v39 }
 0x372   : > { %v2184_v13 = vsel %vm2153_vm0, %v2131_v60, 0.0  ;;  %v2199_v37 = vsel %vm2153_vm0, %v2136_v48, 0.0  ;;  %v2208_v10 = vsel %vm2153_vm0, %v2139_v26, 0.0  ;;  %v2142_v43 = vmul.f32 %v5340_v58, %v2106_v33  ;;  %v6922_v60 = vld [vmem:[#allocation63_spill] sm:$0xff] }
 0x373   : > { %v2040_v18 = vadd.f32 %v2008_v28, %v5186_v57  ;;  %v2214_v17 = vsel %vm2153_vm0, %v2141_v7, 0.0  ;;  %2191 = vadd.xlane.f32.xlu1 %v2190_v52  ;;  %2185 = vadd.xlane.f32.xlu2 %v2184_v13  ;;  %v2062_v22 = vmax.f32 %v2030_v0, 0.0  ;;  %v2109_v0 = vadd.f32 %v5318_v8, %v2073_v42 }
 0x374   : > { %2215 = vadd.xlane.f32.xlu0 %v2214_v17  ;;  %v2217_v28 = vsel %vm2153_vm0, %v2142_v43, 0.0  ;;  %v2076_v17 = vmax.f32 %v5628_v51, 0.0 }
 0x375   : > { %v2072_v59 = vmax.f32 %v2040_v18, 0.0  ;;  %v2098_v40 = vadd.f32 %v5318_v8, %v2062_v22  ;;  %v2145_v13 = vmul.f32 %v5340_v58, %v2109_v0 }
 0x377   : > { %v2108_v6 = vadd.f32 %v5318_v8, %v2072_v59  ;;  %v1922_v54 = vpop.permute.xlu1 %1921  ;;  %v2134_v56 = vmul.f32 %v5340_v58, %v2098_v40 }
 0x378   : > { %v1962_v36 = vpop.permute.xlu2 %1961  ;;  %v2001_v57 = vmul.f32 %v5279_v9, %v1922_v54 }
 0x379   : > { %v2011_v35 = vmul.f32 %v5279_v9, %v1962_v36  ;;  %v2144_v34 = vmul.f32 %v5340_v58, %v2108_v6  ;;  %v2193_v30 = vsel %vm2153_vm0, %v2134_v56, 0.0  ;;  %v2226_v6 = vsel %vm2153_vm0, %v2145_v13, 0.0 }
 0x37a   : > { %v2033_v1 = vadd.f32 %v2001_v57, %v5244_v44  ;;  %v2112_v36 = vadd.f32 %v5318_v8, %v2076_v17  ;;  %v2079_v56 = vmax.f32 %v5652_v24, 0.0 }
 0x37b   : > { %v2043_v2 = vadd.f32 %v2011_v35, %v5246_v61  ;;  %v2223_v5 = vsel %vm2153_vm0, %v2144_v34, 0.0  ;;  %2200 = vadd.xlane.f32.xlu1 %v2199_v37  ;;  %2194 = vadd.xlane.f32.xlu2 %v2193_v30 }
 0x37c   : > { %v2065_v38 = vmax.f32 %v2033_v1, 0.0  ;;  %2224 = vadd.xlane.f32.xlu0 %v2223_v5  ;;  %v2148_v51 = vmul.f32 %v5340_v58, %v2112_v36  ;;  %v2115_v5 = vadd.f32 %v5318_v8, %v2079_v56 }
 0x37d   : > { %v2075_v32 = vmax.f32 %v2043_v2, 0.0 }
 0x37e   : > { %v2101_v20 = vadd.f32 %v5318_v8, %v2065_v38  ;;  %v2235_v2 = vsel %vm2153_vm0, %v2148_v51, 0.0  ;;  %v2151_v24 = vmul.f32 %v5340_v58, %v2115_v5 }
 0x37f   : > { %v2111_v45 = vadd.f32 %v5318_v8, %v2075_v32  ;;  %v1934_v44 = vpop.permute.xlu1 %1933 }
 0x380   : > { %v1974_v19 = vpop.permute.xlu2 %1973  ;;  %v2004_v61 = vmul.f32 %v5279_v9, %v1934_v44  ;;  %v2137_v14 = vmul.f32 %v5340_v58, %v2101_v20 }
 0x381   : > { %v2014_v62 = vmul.f32 %v5279_v9, %v1974_v19  ;;  %v2147_v53 = vmul.f32 %v5340_v58, %v2111_v45  ;;  %v2244_v45 = vsel %vm2153_vm0, %v2151_v24, 0.0 }
 0x382   : > { %v2036_v11 = vadd.f32 %v2004_v61, %v5305_v31  ;;  %v2202_v29 = vsel %vm2153_vm0, %v2137_v14, 0.0 }
 0x383   : > { %v2046_v25 = vadd.f32 %v2014_v62, %v6921_v23  ;;  %v2232_v50 = vsel %vm2153_vm0, %v2147_v53, 0.0  ;;  %2209 = vadd.xlane.f32.xlu1 %v2208_v10  ;;  %2203 = vadd.xlane.f32.xlu2 %v2202_v29  ;;  %v5725_v53 = vld [vmem:[#allocation2] ss:$0 sm:$0xff] }
 0x384   : > { %v2068_v49 = vmax.f32 %v2036_v11, 0.0  ;;  %2233 = vadd.xlane.f32.xlu0 %v2232_v50 }
 0x385   : > { %v2078_v63 = vmax.f32 %v2046_v25, 0.0 }
 0x386   : > { %v2104_v16 = vadd.f32 %v5318_v8, %v2068_v49 }
 0x387   : > { %v2114_v39 = vadd.f32 %v5318_v8, %v2078_v63  ;;  %v1946_v31 = vpop.permute.xlu1 %1945 }
 0x388   : > { %v2007_v12 = vmul.f32 %v5279_v9, %v1946_v31  ;;  %v2140_v27 = vmul.f32 %v5340_v58, %v2104_v16 }
 0x389   : > { %v2150_v3 = vmul.f32 %v5340_v58, %v2114_v39 }
 0x38a   : > { %v2039_v7 = vadd.f32 %v2007_v12, %v6922_v60  ;;  %v2211_v52 = vsel %vm2153_vm0, %v2140_v27, 0.0 }
 0x38b   : > { %v2241_v15 = vsel %vm2153_vm0, %v2150_v3, 0.0  ;;  %2218 = vadd.xlane.f32.xlu1 %v2217_v28  ;;  %2212 = vadd.xlane.f32.xlu2 %v2211_v52 }
 0x38c   : > { %v2071_v21 = vmax.f32 %v2039_v7, 0.0  ;;  %2242 = vadd.xlane.f32.xlu0 %v2241_v15 }
 0x38e   : > { %v2107_v18 = vadd.f32 %v5318_v8, %v2071_v21 }
 0x38f   : > { %v1958_v22 = vpop.permute.xlu1 %1957 }
 0x390   : > { %v2010_v59 = vmul.f32 %v5279_v9, %v1958_v22  ;;  %v2143_v48 = vmul.f32 %v5340_v58, %v2107_v18 }
 0x392   : > { %v2042_v40 = vadd.f32 %v2010_v59, %v6923_v55  ;;  %v2220_v54 = vsel %vm2153_vm0, %v2143_v48, 0.0 }
 0x393   : > { %2227 = vadd.xlane.f32.xlu1 %v2226_v6  ;;  %2221 = vadd.xlane.f32.xlu2 %v2220_v54 }
 0x394   : > { %v2074_v57 = vmax.f32 %v2042_v40, 0.0 }
 0x396   : > { %v2110_v35 = vadd.f32 %v5318_v8, %v2074_v57 }
 0x397   : > { %v1970_v34 = vpop.permute.xlu1 %1969 }
 0x398   : > { %v2013_v37 = vmul.f32 %v5279_v9, %v1970_v34  ;;  %v2146_v4 = vmul.f32 %v5340_v58, %v2110_v35 }
 0x39a   : > { %v2045_v1 = vadd.f32 %v2013_v37, %v5459_v46  ;;  %v2229_v30 = vsel %vm2153_vm0, %v2146_v4, 0.0 }
 0x39b   : > { %2236 = vadd.xlane.f32.xlu1 %v2235_v2  ;;  %2230 = vadd.xlane.f32.xlu2 %v2229_v30 }
 0x39c   : > { %v2077_v38 = vmax.f32 %v2045_v1, 0.0 }
 0x39e   : > { %v2113_v32 = vadd.f32 %v5318_v8, %v2077_v38 }
 0x39f   : > { %v1982_v26 = vpop.permute.xlu1 %1981 }
 0x3a0   : > { %v2016_v47 = vmul.f32 %v5279_v9, %v1982_v26  ;;  %v2149_v20 = vmul.f32 %v5340_v58, %v2113_v32 }
 0x3a2   : > { %v2048_v46 = vadd.f32 %v2016_v47, %v5493_v41  ;;  %v2238_v44 = vsel %vm2153_vm0, %v2149_v20, 0.0 }
 0x3a3   : > { %2245 = vadd.xlane.f32.xlu1 %v2244_v45  ;;  %2239 = vadd.xlane.f32.xlu2 %v2238_v44 }
 0x3a4   : > { %v2080_v19 = vmax.f32 %v2048_v46, 0.0 }
 0x3a6   : > { %v2116_v61 = vadd.f32 %v5318_v8, %v2080_v19  ;;  %v2159_v9 = vpop.xlane.xlu0 %2158 }
 0x3a7   : > { %v2255_v10 = vadd.f32 %v5725_v53, %v2159_v9 }
 0x3a8   : > { %v2152_v62 = vmul.f32 %v5340_v58, %v2116_v61 }
 0x3a9   : > { %3271 = vtanh.f32 %v2255_v10 }
 0x3aa   : > { %v2247_v14 = vsel %vm2153_vm0, %v2152_v62, 0.0 }
 0x3ab   : > { %2248 = vadd.xlane.f32.xlu2 %v2247_v14 }
 0x3af   : > { %v3272_v23 = vpop.eup %3271 }
 0x3b0   : > { %v2320_v29 = vmul.f32 1.442695, %v3272_v23 }
 0x3be   : > { %v2171_v41 = vpop.xlane.xlu0 %2170 }
 0x3bf   : > { %v2259_v63 = vadd.f32 %v5725_v53, %v2171_v41 }
 0x3c2   : > { %v2156_v33 = vpop.xlane.xlu2 %2155 }
 0x3c3   : > { %v2254_v11 = vadd.f32 %v5725_v53, %v2156_v33 }
 0x3c5   : > { %3273 = vtanh.f32 %v2254_v11 }
 0x3c6   : > { %v2180_v25 = vpop.xlane.xlu0 %2179  ;;  %3275 = vpow2.f32 %v2320_v29 }
 0x3c7   : > { %v2262_v39 = vadd.f32 %v5725_v53, %v2180_v25 }
 0x3ca   : > { %v2165_v8 = vpop.xlane.xlu2 %2164 }
 0x3cb   : > { %v3274_v50 = vpop.eup %3273  ;;  %v2257_v58 = vadd.f32 %v5725_v53, %v2165_v8 }
 0x3cc   : > { %v2318_v49 = vmul.f32 1.442695, %v3274_v50  ;;  %v5733_v31 = vpop.eup %3275 }
 0x3cd   : > { %3277 = vtanh.f32 %v2257_v58  ;;  %v2384_v28 = vsel %vm2382_vm1, %v5733_v31, 0.0 }
 0x3ce   : > { %3279 = vpow2.f32 %v2318_v49  ;;  %v2162_v43 = vpop.xlane.xlu1 %2161  ;;  %v2189_v16 = vpop.xlane.xlu0 %2188 }
 0x3cf   : > { %v2256_v42 = vadd.f32 %v5725_v53, %v2162_v43  ;;  %v2265_v12 = vadd.f32 %v5725_v53, %v2189_v16 }
 0x3d1   : > { %3281 = vtanh.f32 %v2256_v42 }
 0x3d2   : > { %3283 = vtanh.f32 %v2259_v63 }
 0x3d3   : > { %v3278_v27 = vpop.eup %3277  ;;  %3285 = vtanh.f32 %v2262_v39 }
 0x3d4   : > { %v5736_v3 = vpop.eup %3279  ;;  %v2324_v7 = vmul.f32 1.442695, %v3278_v27  ;;  %3287 = vtanh.f32 %v2265_v12 }
 0x3d5   : > { %v2383_v60 = vsel %vm2382_vm1, %v5736_v3, 0.0 }
 0x3d6   : > { %v2385_v52 = vadd.f32 %v2384_v28, %v2383_v60  ;;  %v2174_v15 = vpop.xlane.xlu1 %2173  ;;  %v2168_v0 = vpop.xlane.xlu2 %2167  ;;  %3289 = vpow2.f32 %v2324_v7 }
 0x3d7   : > { %v3282_v21 = vpop.eup %3281  ;;  %v2260_v13 = vadd.f32 %v5725_v53, %v2174_v15  ;;  %v2198_v17 = vpop.xlane.xlu0 %2197  ;;  %v2258_v6 = vadd.f32 %v5725_v53, %v2168_v0 }
 0x3d8   : > { %v2386_v18 = vrot.slane %v2385_v52, 4  ;;  %v3284_v22 = vpop.eup %3283  ;;  %v2322_v59 = vmul.f32 1.442695, %v3282_v21  ;;  %v2268_v48 = vadd.f32 %v5725_v53, %v2198_v17 }
 0x3d9   : > { %v3286_v55 = vpop.eup %3285  ;;  %3291 = vtanh.f32 %v2260_v13  ;;  %v2328_v36 = vmul.f32 1.442695, %v3284_v22 }
 0x3da   : > { %v2387_v40 = vadd.f32 %v2386_v18, %v2385_v52  ;;  %3293 = vpow2.f32 %v2322_v59  ;;  %v3288_v54 = vpop.eup %3287  ;;  %v2334_v35 = vmul.f32 1.442695, %v3286_v55 }
 0x3db   : > { %3295 = vtanh.f32 %v2268_v48  ;;  %v2340_v34 = vmul.f32 1.442695, %v3288_v54 }
 0x3dc   : > { %v2388_v57 = vrot.slane %v2387_v40, 2  ;;  %3297 = vtanh.f32 %v2258_v6  ;;  %v5745_v56 = vpop.eup %3289 }
 0x3dd   : > { %3299 = vpow2.f32 %v2328_v36  ;;  %v2393_v20 = vsel %vm2382_vm1, %v5745_v56, 0.0 }
 0x3de   : > { %v2389_v51 = vadd.f32 %v2388_v57, %v2387_v40  ;;  %v2183_v37 = vpop.xlane.xlu1 %2182  ;;  %v2177_v4 = vpop.xlane.xlu2 %2176  ;;  %3301 = vpow2.f32 %v2334_v35 }
 0x3df   : > { %v3292_v1 = vpop.eup %3291  ;;  %v2263_v30 = vadd.f32 %v5725_v53, %v2183_v37  ;;  %v2207_v5 = vpop.xlane.xlu0 %2206  ;;  %v2261_v61 = vadd.f32 %v5725_v53, %v2177_v4 }
 0x3e0   : > { %v2390_v2 = vrot.slane %v2389_v51, 1  ;;  %v5748_v38 = vpop.eup %3293  ;;  %v2330_v32 = vmul.f32 1.442695, %v3292_v1  ;;  %v2271_v24 = vadd.f32 %v5725_v53, %v2207_v5 }
 0x3e1   : > { %v3296_v26 = vpop.eup %3295  ;;  %v2392_v46 = vsel %vm2382_vm1, %v5748_v38, 0.0  ;;  %3303 = vtanh.f32 %v2263_v30 }
 0x3e2   : > { %v2391_v47 = vadd.f32 %v2390_v2, %v2389_v51  ;;  %v2394_v45 = vadd.f32 %v2393_v20, %v2392_v46  ;;  %3305 = vpow2.f32 %v2340_v34  ;;  %v3298_v44 = vpop.eup %3297  ;;  %v2346_v14 = vmul.f32 1.442695, %v3296_v26 }
 0x3e3   : > { %3307 = vtanh.f32 %v2271_v24  ;;  %v2326_v9 = vmul.f32 1.442695, %v3298_v44  ;;  %v5758_v10 = vpop.eup %3299 }
 0x3e4   : > { %v5755_v19 = vadd.f32 1e-05, %v2391_v47  ;;  %v2395_v62 = vrot.slane %v2394_v45, 4  ;;  %3309 = vpow2.f32 %v2330_v32  ;;  %v5761_v41 = vpop.eup %3301  ;;  %v2402_v28 = vsel %vm2382_vm1, %v5758_v10, 0.0 }
 0x3e5   : > { %v2419_v15 = vsel %vm2382_vm1, %v5761_v41, 0.0 }
 0x3e6   : > { %3311 = vrcp.f32 %v5755_v19  ;;  %v2396_v33 = vadd.f32 %v2395_v62, %v2394_v45  ;;  %v2192_v11 = vpop.xlane.xlu1 %2191  ;;  %v2186_v23 = vpop.xlane.xlu2 %2185  ;;  %v2552_v60 = vand.u32 2147483647, %v5755_v19  ;;  %v2554_v7 = vand.u32 2147483648, %v5755_v19 }
 0x3e7   : > { %3313 = vpow2.f32 %v2326_v9  ;;  %v3304_v25 = vpop.eup %3303  ;;  %v2266_v29 = vadd.f32 %v5725_v53, %v2192_v11  ;;  %v2216_v8 = vpop.xlane.xlu0 %2215  ;;  %v2264_v16 = vadd.f32 %v5725_v53, %v2186_v23  ;;  %vm2548_vm2 = vweird.f32 %v5755_v19 }
 0x3e8   : > { %3315 = vtanh.f32 %v2261_v61  ;;  %v5764_v50 = vpop.eup %3305  ;;  %v2397_v58 = vrot.slane %v2396_v33, 2  ;;  %v2336_v49 = vmul.f32 1.442695, %v3304_v25  ;;  %v2274_v63 = vadd.f32 %v5725_v53, %v2216_v8 }
 0x3e9   : > { %3317 = vpow2.f32 %v2346_v14  ;;  %v3308_v43 = vpop.eup %3307  ;;  %v5784_v13 = vsel %vm2382_vm1, %v5764_v50, 0.0  ;;  %vm5793_vm4 = vcmp.eq.f32.partialorder %v2552_v60, 8.507059e+37  ;;  %v2555_v34 = vor.u32 1.1754944e-38, %v2554_v7 }
 0x3ea   : > { %3319 = vtanh.f32 %v2266_v29  ;;  %v5768_v39 = vpop.eup %3309  ;;  %v2398_v42 = vadd.f32 %v2397_v58, %v2396_v33  ;;  %v2352_v12 = vmul.f32 1.442695, %v3308_v43 }
 0x3eb   : > { %3321 = vpow2.f32 %v2336_v49  ;;  %v2410_v44 = vsel %vm2382_vm1, %v5768_v39, 0.0 }
 0x3ec   : > { %v5770_v27 = vpop.eup %3311  ;;  %3323 = vtanh.f32 %v2274_v63  ;;  %v2399_v0 = vrot.slane %v2398_v42, 1 }
 0x3ed   : > { %v5776_v52 = vpop.eup %3313  ;;  %3325 = vpow2.f32 %v2352_v12  ;;  %v2544_v21 = vmul.f32 %v5770_v27, %v5755_v19  ;;  %vm2549_vm3 = vweird.f32 %v5770_v27 }
 0x3ee   : > { %v3316_v18 = vpop.eup %3315  ;;  %v2401_v17 = vsel %vm2382_vm1, %v5776_v52, 0.0  ;;  %3327 = vtanh.f32 %v2264_v16  ;;  %v2400_v59 = vadd.f32 %v2399_v0, %v2398_v42  ;;  %v2201_v40 = vpop.xlane.xlu1 %2200  ;;  %vm2550_vm5 = vmor %vm2548_vm2, %vm2549_vm3 }
 0x3ef   : > { %v5789_v22 = vpop.eup %3317  ;;  %v2403_v48 = vadd.f32 %v2402_v28, %v2401_v17  ;;  %v2332_v55 = vmul.f32 1.442695, %v3316_v18  ;;  %v2195_v6 = vpop.xlane.xlu2 %2194  ;;  %v2545_v54 = vsub.f32 1.0, %v2544_v21  ;;  %v2269_v57 = vadd.f32 %v5725_v53, %v2201_v40 }
 0x3f0   : > { %v3320_v36 = vpop.eup %3319  ;;  %v2225_v35 = vpop.xlane.xlu0 %2224  ;;  %v5799_v4 = vadd.f32 1e-05, %v2400_v59  ;;  %v2267_v61 = vadd.f32 %v5725_v53, %v2195_v6  ;;  %v5818_v11 = vsel %vm2382_vm1, %v5789_v22, 0.0 }
 0x3f1   : > { %v5797_v37 = vpop.eup %3321  ;;  %v2404_v1 = vrot.slane %v2403_v48, 4  ;;  %3329 = vpow2.f32 %v2332_v55  ;;  %v2342_v2 = vmul.f32 1.442695, %v3320_v36  ;;  %v2277_v32 = vadd.f32 %v5725_v53, %v2225_v35 }
 0x3f2   : > { %v3324_v30 = vpop.eup %3323  ;;  %v2420_v5 = vsel %vm2382_vm1, %v5797_v37, 0.0  ;;  %3331 = vtanh.f32 %v2269_v57  ;;  %v2546_v24 = vmul.f32 %v5770_v27, %v2545_v54  ;;  %v2570_v54 = vand.u32 2147483648, %v5799_v4 }
 0x3f3   : > { %v5805_v26 = vpop.eup %3325  ;;  %3333 = vrcp.f32 %v5799_v4  ;;  %v2405_v47 = vadd.f32 %v2404_v1, %v2403_v48  ;;  %v2421_v20 = vadd.f32 %v2420_v5, %v2419_v15  ;;  %v2358_v46 = vmul.f32 1.442695, %v3324_v30 }
 0x3f4   : > { %v3328_v45 = vpop.eup %3327  ;;  %3335 = vpow2.f32 %v2342_v2  ;;  %v2547_v62 = vadd.f32 %v5770_v27, %v2546_v24  ;;  %v5822_v23 = vsel %vm2382_vm1, %v5805_v26, 0.0  ;;  %vm2564_vm6 = vweird.f32 %v5799_v4 }
 0x3f5   : > { %v2406_v14 = vrot.slane %v2405_v47, 2  ;;  %v2422_v9 = vrot.slane %v2421_v20, 4  ;;  %3337 = vpow2.f32 %v2358_v46  ;;  %v2338_v33 = vmul.f32 1.442695, %v3328_v45 }
 0x3f6   : > { %3339 = vtanh.f32 %v2277_v32  ;;  %v2551_v25 = vsel %vm2550_vm5, %v5770_v27, %v2547_v62  ;;  %v2210_v49 = vpop.xlane.xlu1 %2209  ;;  %v2568_v27 = vand.u32 2147483647, %v5799_v4 }
 0x3f7   : > { %v5825_v29 = vpop.eup %3329  ;;  %v2407_v8 = vadd.f32 %v2406_v14, %v2405_v47  ;;  %v2423_v58 = vadd.f32 %v2422_v9, %v2421_v20  ;;  %3341 = vpow2.f32 %v2338_v33  ;;  %v2204_v63 = vpop.xlane.xlu2 %2203  ;;  %v2556_v19 = vsel %vm5793_vm4, %v2555_v34, %v2551_v25 }
 0x3f8   : > { %v3332_v43 = vpop.eup %3331  ;;  %v2411_v16 = vsel %vm2382_vm1, %v5825_v29, 0.0  ;;  %3343 = vtanh.f32 %v2267_v61  ;;  %v2272_v42 = vadd.f32 %v5725_v53, %v2210_v49  ;;  %v2234_v12 = vpop.xlane.xlu0 %2233  ;;  %v2558_v17 = vmul.f32 %v5733_v31, %v2556_v19 }
 0x3f9   : > { %v5833_v28 = vpop.eup %3333  ;;  %v2408_v60 = vrot.slane %v2407_v8, 1  ;;  %v2424_v7 = vrot.slane %v2423_v58, 2  ;;  %v2412_v15 = vadd.f32 %v2411_v16, %v2410_v44  ;;  %v2348_v0 = vmul.f32 1.442695, %v3332_v43 }
 0x3fa   : > { %v5835_v21 = vpop.eup %3335  ;;  %3345 = vtanh.f32 %v2272_v42  ;;  %v2280_v18 = vadd.f32 %v5725_v53, %v2234_v12  ;;  %v2557_v59 = vmul.f32 %v5736_v3, %v2556_v19  ;;  %v2270_v35 = vadd.f32 %v5725_v53, %v2204_v63  ;;  %2806 = vperm.xlu1 %3257, %v2558_v17  }
 0x3fb   : > { %v5840_v48 = vpop.eup %3337  ;;  %v2409_v55 = vadd.f32 %v2408_v60, %v2407_v8  ;;  %v2425_v40 = vadd.f32 %v2424_v7, %v2423_v58  ;;  %v2413_v6 = vrot.slane %v2412_v15, 4  ;;  %v5845_v57 = vsel %vm2382_vm1, %v5835_v21, 0.0 }
 0x3fc   : > { %v3340_v36 = vpop.eup %3339  ;;  %3347 = vpow2.f32 %v2348_v0  ;;  %2801 = vperm.xlu0 %3256, %v2557_v59   ;;  %v2560_v31 = vmul.f32 %v5833_v28, %v5799_v4  ;;  %v5857_v5 = vsel %vm2382_vm1, %v5840_v48, 0.0  ;;  %vm2565_vm7 = vweird.f32 %v5833_v28 }
 0x3fd   : > { %v5851_v3 = vpop.eup %3341  ;;  %v5853_v51 = vadd.f32 1e-05, %v2409_v55  ;;  %v2426_v34 = vrot.slane %v2425_v40, 1  ;;  %v2414_v1 = vadd.f32 %v2413_v6, %v2412_v15  ;;  %v2364_v2 = vmul.f32 1.442695, %v3340_v36  ;;  %vm5887_vm9 = vmor %vm2564_vm6, %vm2565_vm7 }
 0x3fe   : > { %v3344_v30 = vpop.eup %3343  ;;  %v2428_v32 = vsel %vm2382_vm1, %v5851_v3, 0.0  ;;  %3349 = vtanh.f32 %v2280_v18  ;;  %v2561_v24 = vsub.f32 1.0, %v2560_v31  ;;  %v2219_v45 = vpop.xlane.xlu1 %2218  ;;  %vm5864_vm8 = vcmp.eq.f32.partialorder %v2568_v27, 8.507059e+37 }
 0x3ff   : > { %3351 = vrcp.f32 %v5853_v51  ;;  %v2427_v47 = vadd.f32 %v2426_v34, %v2425_v40  ;;  %v2415_v20 = vrot.slane %v2414_v1, 2  ;;  %v2430_v46 = vadd.f32 %v5784_v13, %v2428_v32  ;;  %v2213_v44 = vpop.xlane.xlu2 %2212 }
 0x400   : > { %v3346_v61 = vpop.eup %3345  ;;  %3353 = vpow2.f32 %v2364_v2  ;;  %v2344_v62 = vmul.f32 1.442695, %v3344_v30  ;;  %v2243_v58 = vpop.xlane.xlu0 %2242  ;;  %v2275_v13 = vadd.f32 %v5725_v53, %v2219_v45  ;;  %v2273_v63 = vadd.f32 %v5725_v53, %v2213_v44 }
 0x401   : > { %v5868_v9 = vadd.f32 1e-05, %v2427_v47  ;;  %v2416_v33 = vadd.f32 %v2415_v20, %v2414_v1  ;;  %v2431_v25 = vrot.slane %v2430_v46, 4  ;;  %v2354_v8 = vmul.f32 1.442695, %v3346_v61 }
 0x402   : > { %v5870_v49 = vpop.eup %3347  ;;  %3355 = vpow2.f32 %v2344_v62  ;;  %v2562_v19 = vmul.f32 %v5833_v28, %v2561_v24  ;;  %v2283_v60 = vadd.f32 %v5725_v53, %v2243_v58  ;;  %v2571_v6 = vor.u32 1.1754944e-38, %v2570_v54 }
 0x403   : > { %3357 = vrcp.f32 %v5868_v9  ;;  %v2417_v43 = vrot.slane %v2416_v33, 1  ;;  %v2432_v16 = vadd.f32 %v2431_v25, %v2430_v46  ;;  %v2447_v42 = vsel %vm2382_vm1, %v5870_v49, 0.0 }
 0x404   : > { %v3350_v12 = vpop.eup %3349  ;;  %v2448_v27 = vadd.f32 %v2447_v42, %v5818_v11  ;;  %3359 = vpow2.f32 %v2354_v8  ;;  %v2563_v7 = vadd.f32 %v5833_v28, %v2562_v19  ;;  %vm2580_vm10 = vweird.f32 %v5853_v51 }
 0x405   : > { %v5881_v15 = vpop.eup %3351  ;;  %v2418_v0 = vadd.f32 %v2417_v43, %v2416_v33  ;;  %v2433_v18 = vrot.slane %v2432_v16, 2  ;;  %v2370_v17 = vmul.f32 1.442695, %v3350_v12  ;;  %3361 = vtanh.f32 %v2270_v35 }
 0x406   : > { %v5891_v11 = vpop.eup %3353  ;;  %v2449_v55 = vrot.slane %v2448_v27, 4  ;;  %3363 = vtanh.f32 %v2275_v13  ;;  %v2567_v40 = vsel %vm5887_vm9, %v5833_v28, %v2563_v7  ;;  %v2228_v31 = vpop.xlane.xlu1 %2227  ;;  %v2576_v4 = vmul.f32 %v5881_v15, %v5853_v51 }
 0x407   : > { %v5896_v36 = vadd.f32 1e-05, %v2418_v0  ;;  %v2434_v35 = vadd.f32 %v2433_v18, %v2432_v16  ;;  %3365 = vpow2.f32 %v2370_v17  ;;  %v2222_v34 = vpop.xlane.xlu2 %2221  ;;  %v2572_v30 = vsel %vm5864_vm8, %v2571_v6, %v2567_v40 }
 0x408   : > { %v5900_v1 = vpop.eup %3355  ;;  %v2450_v2 = vadd.f32 %v2449_v55, %v2448_v27  ;;  %3367 = vtanh.f32 %v2283_v60  ;;  %v2278_v32 = vadd.f32 %v5725_v53, %v2228_v31  ;;  %v2574_v47 = vmul.f32 %v5745_v56, %v2572_v30 }
 0x409   : > { %v5905_v28 = vpop.eup %3357  ;;  %3369 = vrcp.f32 %v5896_v36  ;;  %v2435_v54 = vrot.slane %v2434_v35, 1  ;;  %v2438_v24 = vsel %vm2382_vm1, %v5900_v1, 0.0  ;;  %v2573_v44 = vmul.f32 %v5748_v38, %v2572_v30 }
 0x40a   : > { %v5912_v20 = vpop.eup %3359  ;;  %v2451_v46 = vrot.slane %v2450_v2, 2  ;;  %v2439_v45 = vadd.f32 %v2438_v24, %v5845_v57  ;;  %3371 = vtanh.f32 %v2273_v63  ;;  %v5918_v14 = vsel %vm2382_vm1, %v5891_v11, 0.0  ;;  %2816 = vperm.xlu1 %3257, %v2574_v47  }
 0x40b   : > { %v3362_v61 = vpop.eup %3361  ;;  %v2436_v62 = vadd.f32 %v2435_v54, %v2434_v35  ;;  %3373 = vtanh.f32 %v2278_v32  ;;  %v2276_v56 = vadd.f32 %v5725_v53, %v2222_v34  ;;  %2811 = vperm.xlu2 %3258, %v2573_v44   ;;  %v2577_v13 = vsub.f32 1.0, %v2576_v4 }
 0x40c   : > { %v3364_v33 = vpop.eup %3363  ;;  %v2452_v25 = vadd.f32 %v2451_v46, %v2450_v2  ;;  %v2440_v8 = vrot.slane %v2439_v45, 4  ;;  %v2350_v58 = vmul.f32 1.442695, %v3362_v61  ;;  %v5927_v38 = vsel %vm2382_vm1, %v5912_v20, 0.0 }
 0x40d   : > { %v5921_v57 = vpop.eup %3365  ;;  %v5923_v63 = vadd.f32 1e-05, %v2436_v62  ;;  %v2360_v19 = vmul.f32 1.442695, %v3364_v33  ;;  %3375 = vtanh.f32 %v2276_v56  ;;  %vm2581_vm11 = vweird.f32 %v5881_v15 }
 0x40e   : > { %v3368_v43 = vpop.eup %3367  ;;  %v2453_v16 = vrot.slane %v2452_v25, 1  ;;  %v2441_v42 = vadd.f32 %v2440_v8, %v2439_v45  ;;  %3377 = vpow2.f32 %v2350_v58  ;;  %v2578_v60 = vmul.f32 %v5881_v15, %v2577_v13  ;;  %v2237_v55 = vpop.xlane.xlu1 %2236  ;;  %vm2582_vm13 = vmor %vm2580_vm10, %vm2581_vm11 }
 0x40f   : > { %v5930_v12 = vpop.eup %3369  ;;  %3379 = vrcp.f32 %v5923_v63  ;;  %v2376_v27 = vmul.f32 1.442695, %v3368_v43  ;;  %v2584_v7 = vand.u32 2147483647, %v5853_v51  ;;  %v2586_v59 = vand.u32 2147483648, %v5853_v51  ;;  %v2231_v40 = vpop.xlane.xlu2 %2230 }
 0x410   : > { %v3372_v0 = vpop.eup %3371  ;;  %v2454_v18 = vadd.f32 %v2453_v16, %v2452_v25  ;;  %v2442_v17 = vrot.slane %v2441_v42, 2  ;;  %3381 = vpow2.f32 %v2360_v19  ;;  %v2579_v31 = vadd.f32 %v5881_v15, %v2578_v60 }
 0x411   : > { %v3374_v6 = vpop.eup %3373  ;;  %3383 = vpow2.f32 %v2376_v27  ;;  %v2356_v35 = vmul.f32 1.442695, %v3372_v0  ;;  %vm2585_vm12 = vcmp.eq.f32.partialorder %v2584_v7, 8.507059e+37  ;;  %v2587_v30 = vor.u32 1.1754944e-38, %v2586_v59 }
 0x412   : > { %v5937_v34 = vadd.f32 1e-05, %v2454_v18  ;;  %v2443_v4 = vadd.f32 %v2442_v17, %v2441_v42  ;;  %v2366_v2 = vmul.f32 1.442695, %v3374_v6  ;;  %v2583_v54 = vsel %vm2582_vm13, %v5881_v15, %v2579_v31 }
 0x413   : > { %v3376_v32 = vpop.eup %3375  ;;  %3385 = vpow2.f32 %v2356_v35  ;;  %v2281_v24 = vadd.f32 %v5725_v53, %v2237_v55  ;;  %v2279_v47 = vadd.f32 %v5725_v53, %v2231_v40  ;;  %v2588_v61 = vsel %vm2585_vm12, %v2587_v30, %v2583_v54 }
 0x414   : > { %v5946_v46 = vpop.eup %3377  ;;  %3387 = vrcp.f32 %v5937_v34  ;;  %v2444_v45 = vrot.slane %v2443_v4, 1  ;;  %v2362_v44 = vmul.f32 1.442695, %v3376_v32  ;;  %v2590_v56 = vmul.f32 %v5758_v10, %v2588_v61 }
 0x415   : > { %v5949_v62 = vpop.eup %3379  ;;  %v2455_v51 = vsel %vm2382_vm1, %v5946_v46, 0.0  ;;  %3389 = vpow2.f32 %v2366_v2  ;;  %v2589_v15 = vmul.f32 %v5776_v52, %v2588_v61  ;;  %v2608_v58 = vmul.f32 %v5905_v28, %v5868_v9 }
 0x416   : > { %v5955_v33 = vpop.eup %3381  ;;  %v2445_v25 = vadd.f32 %v2444_v45, %v2443_v4  ;;  %v2457_v8 = vadd.f32 %v5822_v23, %v2455_v51  ;;  %3391 = vpow2.f32 %v2362_v44  ;;  %v5964_v19 = vsel %vm2382_vm1, %v5921_v57, 0.0  ;;  %2826 = vperm.xlu1 %3257, %v2590_v56  }
 0x417   : > { %v5960_v13 = vpop.eup %3383  ;;  %v2474_v10 = vsel %vm2382_vm1, %v5955_v33, 0.0  ;;  %2821 = vperm.xlu2 %3258, %v2589_v15   ;;  %3393 = vtanh.f32 %v2281_v24  ;;  %vm2612_vm14 = vweird.f32 %v5868_v9  ;;  %vm2613_vm15 = vweird.f32 %v5905_v28 }
 0x418   : > { %v5969_v52 = vadd.f32 1e-05, %v2445_v25  ;;  %v2458_v23 = vrot.slane %v2457_v8, 4  ;;  %v2475_v43 = vadd.f32 %v2474_v10, %v5857_v5  ;;  %3395 = vtanh.f32 %v2279_v47  ;;  %vm2614_vm3 = vmor %vm2612_vm14, %vm2613_vm15 }
 0x419   : > { %v5973_v16 = vpop.eup %3385  ;;  %v2609_v42 = vsub.f32 1.0, %v2608_v58  ;;  %v2616_v27 = vand.u32 2147483647, %v5868_v9  ;;  %v2618_v60 = vand.u32 2147483648, %v5868_v9  ;;  %v5981_v17 = vsel %vm2382_vm1, %v5960_v13, 0.0 }
 0x41a   : > { %v5977_v7 = vpop.eup %3387  ;;  %v2459_v0 = vadd.f32 %v2458_v23, %v2457_v8  ;;  %v2476_v18 = vrot.slane %v2475_v43, 4  ;;  %v2465_v5 = vsel %vm2382_vm1, %v5973_v16, 0.0  ;;  %3397 = vrcp.f32 %v5969_v52  ;;  %v2240_v23 = vpop.xlane.xlu2 %2239 }
 0x41b   : > { %v5985_v59 = vpop.eup %3389  ;;  %v2466_v55 = vadd.f32 %v2465_v5, %v5927_v38  ;;  %v2610_v40 = vmul.f32 %v5905_v28, %v2609_v42  ;;  %vm5990_vm0 = vcmp.eq.f32.partialorder %v2616_v27, 8.507059e+37  ;;  %v2619_v2 = vor.u32 1.1754944e-38, %v2618_v60  ;;  %v2246_v5 = vpop.xlane.xlu1 %2245 }
 0x41c   : > { %v5994_v35 = vpop.eup %3391  ;;  %v2460_v31 = vrot.slane %v2459_v0, 2  ;;  %v2477_v4 = vadd.f32 %v2476_v18, %v2475_v43  ;;  %v2592_v30 = vmul.f32 %v5930_v12, %v5896_v36  ;;  %vm2596_vm2 = vweird.f32 %v5896_v36 }
 0x41d   : > { %v3394_v32 = vpop.eup %3393  ;;  %v2467_v54 = vrot.slane %v2466_v55, 4  ;;  %v2482_v24 = vsel %vm2382_vm1, %v5994_v35, 0.0  ;;  %v2611_v38 = vadd.f32 %v5905_v28, %v2610_v40  ;;  %vm2597_vm4 = vweird.f32 %v5930_v12 }
 0x41e   : > { %v2461_v47 = vadd.f32 %v2460_v31, %v2459_v0  ;;  %v2478_v45 = vrot.slane %v2477_v4, 2  ;;  %v2484_v44 = vadd.f32 %v5918_v14, %v2482_v24  ;;  %v2372_v61 = vmul.f32 1.442695, %v3394_v32  ;;  %v3396_v51 = vpop.eup %3395  ;;  %vm6023_vm5 = vmor %vm2596_vm2, %vm2597_vm4 }
 0x41f   : > { %v2468_v56 = vadd.f32 %v2467_v54, %v2466_v55  ;;  %v2615_v15 = vsel %vm2614_vm3, %v5905_v28, %v2611_v38  ;;  %v2593_v25 = vsub.f32 1.0, %v2592_v30  ;;  %v2368_v42 = vmul.f32 1.442695, %v3396_v51 }
 0x420   : > { %v2462_v8 = vrot.slane %v2461_v47, 1  ;;  %v2479_v58 = vadd.f32 %v2478_v45, %v2477_v4  ;;  %v2485_v10 = vrot.slane %v2484_v44, 4  ;;  %3399 = vpow2.f32 %v2372_v61  ;;  %v6009_v43 = vpop.eup %3397 }
 0x421   : > { %v2469_v14 = vrot.slane %v2468_v56, 2  ;;  %v2620_v9 = vsel %vm5990_vm0, %v2619_v2, %v2615_v15  ;;  %v2594_v27 = vmul.f32 %v5930_v12, %v2593_v25  ;;  %3401 = vpow2.f32 %v2368_v42 }
 0x422   : > { %v2463_v60 = vadd.f32 %v2462_v8, %v2461_v47  ;;  %v2480_v0 = vrot.slane %v2479_v58, 1  ;;  %v2486_v28 = vadd.f32 %v2485_v10, %v2484_v44  ;;  %v2621_v18 = vmul.f32 %v5761_v41, %v2620_v9 }
 0x423   : > { %v2470_v55 = vadd.f32 %v2469_v14, %v2468_v56  ;;  %v2595_v40 = vadd.f32 %v5930_v12, %v2594_v27  ;;  %v2600_v31 = vand.u32 2147483647, %v5896_v36  ;;  %v2602_v41 = vand.u32 2147483648, %v5896_v36 }
 0x424   : > { %v6017_v4 = vadd.f32 1e-05, %v2463_v60  ;;  %v2481_v30 = vadd.f32 %v2480_v0, %v2479_v58  ;;  %v2487_v32 = vrot.slane %v2486_v28, 2  ;;  %2841 = vperm.xlu1 %3257, %v2621_v18   ;;  %v2491_v54 = vsel %vm2382_vm1, %v5985_v59, 0.0  ;;  %v2249_v60 = vpop.xlane.xlu2 %2248 }
 0x425   : > { %v2471_v2 = vrot.slane %v2470_v55, 1  ;;  %v2599_v24 = vsel %vm6023_vm5, %v5930_v12, %v2595_v40  ;;  %v2284_v38 = vadd.f32 %v5725_v53, %v2246_v5  ;;  %vm2601_vm6 = vcmp.eq.f32.partialorder %v2600_v31, 8.507059e+37 }
 0x426   : > { %v6034_v47 = vpop.eup %3399  ;;  %v6036_v45 = vadd.f32 1e-05, %v2481_v30  ;;  %v2488_v44 = vadd.f32 %v2487_v32, %v2486_v28  ;;  %v2603_v61 = vor.u32 1.1754944e-38, %v2602_v41  ;;  %v2282_v56 = vadd.f32 %v5725_v53, %v2240_v23 }
 0x427   : > { %v2472_v51 = vadd.f32 %v2471_v2, %v2470_v55  ;;  %v2501_v36 = vsel %vm2382_vm1, %v6034_v47, 0.0  ;;  %3403 = vtanh.f32 %v2284_v38  ;;  %v6043_v8 = vpop.eup %3401  ;;  %v2622_v0 = vmul.f32 %v5797_v37, %v2620_v9 }
 0x428   : > { %3405 = vrcp.f32 %v6017_v4  ;;  %v2489_v15 = vrot.slane %v2488_v44, 1  ;;  %v2502_v12 = vadd.f32 %v2501_v36, %v5964_v19  ;;  %v2604_v25 = vsel %vm2601_vm6, %v2603_v61, %v2599_v24 }
 0x429   : > { %v6045_v58 = vadd.f32 1e-05, %v2472_v51  ;;  %v2606_v10 = vmul.f32 %v5825_v29, %v2604_v25  ;;  %v2605_v14 = vmul.f32 %v5768_v39, %v2604_v25  ;;  %3407 = vtanh.f32 %v2282_v56 }
 0x42a   : > { %3409 = vrcp.f32 %v6036_v45  ;;  %v2490_v42 = vadd.f32 %v2489_v15, %v2488_v44  ;;  %v2503_v27 = vrot.slane %v2502_v12, 4  ;;  %v2492_v23 = vsel %vm2382_vm1, %v6043_v8, 0.0 }
 0x42b   : > { %3411 = vrcp.f32 %v6045_v58  ;;  %v2493_v19 = vadd.f32 %v2492_v23, %v2491_v54  ;;  %2836 = vperm.xlu0 %3256, %v2606_v10   ;;  %2831 = vperm.xlu2 %3258, %v2605_v14   ;;  %v2624_v29 = vmul.f32 %v5949_v62, %v5923_v63  ;;  %vm2628_vm7 = vweird.f32 %v5923_v63 }
 0x42c   : > { %v6056_v39 = vadd.f32 1e-05, %v2490_v42  ;;  %v2504_v28 = vadd.f32 %v2503_v27, %v2502_v12  ;;  %v2632_v18 = vand.u32 2147483647, %v5923_v63  ;;  %v2634_v31 = vand.u32 2147483648, %v5923_v63 }
 0x42d   : > { %v3404_v5 = vpop.eup %3403  ;;  %v2494_v55 = vrot.slane %v2493_v19, 4  ;;  %v2625_v40 = vsub.f32 1.0, %v2624_v29  ;;  %v2285_v30 = vadd.f32 %v5725_v53, %v2249_v60  ;;  %vm2629_vm8 = vweird.f32 %v5949_v62 }
 0x42e   : > { %v6062_v32 = vpop.eup %3405  ;;  %3413 = vrcp.f32 %v6056_v39  ;;  %v2505_v37 = vrot.slane %v2504_v28, 2  ;;  %v2378_v9 = vmul.f32 1.442695, %v3404_v5  ;;  %vm6067_vm9 = vcmp.eq.f32.partialorder %v2632_v18, 8.507059e+37  ;;  %vm2630_vm11 = vmor %vm2628_vm7, %vm2629_vm8 }
 0x42f   : > { %v3408_v6 = vpop.eup %3407  ;;  %v2495_v41 = vadd.f32 %v2494_v55, %v2493_v19  ;;  %v2626_v2 = vmul.f32 %v5949_v62, %v2625_v40  ;;  %3415 = vtanh.f32 %v2285_v30  ;;  %v2656_v44 = vmul.f32 %v5977_v7, %v5937_v34 }
 0x430   : > { %v6071_v24 = vpop.eup %3409  ;;  %v2506_v53 = vadd.f32 %v2505_v37, %v2504_v28  ;;  %3417 = vpow2.f32 %v2378_v9  ;;  %v2374_v38 = vmul.f32 1.442695, %v3408_v6  ;;  %v2635_v56 = vor.u32 1.1754944e-38, %v2634_v31 }
 0x431   : > { %v6075_v61 = vpop.eup %3411  ;;  %v2496_v51 = vrot.slane %v2495_v41, 2  ;;  %v2627_v36 = vadd.f32 %v5949_v62, %v2626_v2  ;;  %vm2660_vm10 = vweird.f32 %v5937_v34  ;;  %v2657_v12 = vsub.f32 1.0, %v2656_v44 }
 0x432   : > { %v2507_v15 = vrot.slane %v2506_v53, 1  ;;  %3419 = vpow2.f32 %v2374_v38  ;;  %v2664_v25 = vand.u32 2147483647, %v5937_v34  ;;  %v2666_v42 = vand.u32 2147483648, %v5937_v34 }
 0x433   : > { %v2497_v10 = vadd.f32 %v2496_v51, %v2495_v41  ;;  %2846 = vperm.xlu2 %3258, %v2622_v0   ;;  %v2631_v14 = vsel %vm2630_vm11, %v5949_v62, %v2627_v36  ;;  %v2640_v27 = vmul.f32 %v6009_v43, %v5969_v52  ;;  %v2658_v63 = vmul.f32 %v5977_v7, %v2657_v12 }
 0x434   : > { %v6088_v23 = vpop.eup %3413  ;;  %v2508_v60 = vadd.f32 %v2507_v15, %v2506_v53  ;;  %v2636_v19 = vsel %vm6067_vm9, %v2635_v56, %v2631_v14  ;;  %vm2661_vm12 = vweird.f32 %v5977_v7  ;;  %vm6096_vm13 = vcmp.eq.f32.partialorder %v2664_v25, 8.507059e+37 }
 0x435   : > { %v3416_v29 = vpop.eup %3415  ;;  %v2498_v28 = vrot.slane %v2497_v10, 1  ;;  %v2638_v0 = vmul.f32 %v5764_v50, %v2636_v19  ;;  %v2637_v62 = vmul.f32 %v5851_v3, %v2636_v19  ;;  %v2659_v31 = vadd.f32 %v5977_v7, %v2658_v63  ;;  %vm2662_vm14 = vmor %vm2660_vm10, %vm2661_vm12 }
 0x436   : > { %v6100_v5 = vpop.eup %3417  ;;  %v6102_v55 = vadd.f32 1e-05, %v2508_v60  ;;  %v2380_v40 = vmul.f32 1.442695, %v3416_v29  ;;  %v2641_v30 = vsub.f32 1.0, %v2640_v27  ;;  %v2667_v50 = vor.u32 1.1754944e-38, %v2666_v42 }
 0x437   : > { %v2499_v37 = vadd.f32 %v2498_v28, %v2497_v10  ;;  %v2518_v9 = vsel %vm2382_vm1, %v6100_v5, 0.0  ;;  %2856 = vperm.xlu1 %3257, %v2638_v0   ;;  %2851 = vperm.xlu0 %3256, %v2637_v62   ;;  %vm2644_vm15 = vweird.f32 %v5969_v52  ;;  %v2663_v6 = vsel %vm2662_vm14, %v5977_v7, %v2659_v31 }
 0x438   : > { %v6112_v3 = vpop.eup %3419  ;;  %v2642_v41 = vmul.f32 %v6009_v43, %v2641_v30  ;;  %vm2645_vm0 = vweird.f32 %v6009_v43  ;;  %v2648_v2 = vand.u32 2147483647, %v5969_v52  ;;  %3421 = vpow2.f32 %v2380_v40 }
 0x439   : > { %v6118_v54 = vadd.f32 1e-05, %v2499_v37  ;;  %v2509_v53 = vsel %vm2382_vm1, %v6112_v3, 0.0  ;;  %v2668_v34 = vsel %vm6096_vm13, %v2667_v50, %v2663_v6  ;;  %3423 = vrcp.f32 %v6102_v55  ;;  %vm6131_vm2 = vmor %vm2644_vm15, %vm2645_vm0 }
 0x43a   : > { %v2511_v38 = vadd.f32 %v5981_v17, %v2509_v53  ;;  %v2669_v7 = vmul.f32 %v5789_v22, %v2668_v34  ;;  %v2643_v44 = vadd.f32 %v6009_v43, %v2642_v41  ;;  %vm6135_vm3 = vcmp.eq.f32.partialorder %v2648_v2, 8.507059e+37 }
 0x43b   : > { %3425 = vrcp.f32 %v6118_v54  ;;  %v2650_v56 = vand.u32 2147483648, %v5969_v52  ;;  %v2672_v17 = vmul.f32 %v6062_v32, %v6017_v4  ;;  %v2670_v12 = vmul.f32 %v5870_v49, %v2668_v34 }
 0x43c   : > { %v2512_v22 = vrot.slane %v2511_v38, 4  ;;  %v2647_v15 = vsel %vm6131_vm2, %v6009_v43, %v2643_v44  ;;  %vm2676_vm4 = vweird.f32 %v6017_v4  ;;  %vm2677_vm5 = vweird.f32 %v6062_v32 }
 0x43d   : > { %v2651_v25 = vor.u32 1.1754944e-38, %v2650_v56  ;;  %v2673_v10 = vsub.f32 1.0, %v2672_v17  ;;  %v2680_v14 = vand.u32 2147483647, %v6017_v4  ;;  %v2682_v52 = vand.u32 2147483648, %v6017_v4 }
 0x43e   : > { %v2513_v42 = vadd.f32 %v2512_v22, %v2511_v38  ;;  %v2704_v27 = vmul.f32 %v6071_v24, %v6036_v45  ;;  %vm2708_vm6 = vweird.f32 %v6036_v45  ;;  %v6153_v60 = vpop.eup %3421  ;;  %vm2709_vm8 = vweird.f32 %v6071_v24 }
 0x43f   : > { %2871 = vperm.xlu1 %3257, %v2669_v7   ;;  %v2652_v49 = vsel %vm6135_vm3, %v2651_v25, %v2647_v15  ;;  %v2674_v43 = vmul.f32 %v6062_v32, %v2673_v10  ;;  %vm6158_vm7 = vcmp.eq.f32.partialorder %v2680_v14, 8.507059e+37  ;;  %v6163_v63 = vpop.eup %3423  ;;  %v2519_v28 = vsel %vm2382_vm1, %v6153_v60, 0.0  ;;  %vm2678_vm1 = vmor %vm2676_vm4, %vm2677_vm5 }
 0x440   : > { %v2514_v29 = vrot.slane %v2513_v42, 2  ;;  %v2654_v0 = vmul.f32 %v5900_v1, %v2652_v49  ;;  %v2653_v62 = vmul.f32 %v5835_v21, %v2652_v49  ;;  %v2520_v40 = vadd.f32 %v2519_v28, %v2518_v9  ;;  %vm2710_vm10 = vmor %vm2708_vm6, %vm2709_vm8 }
 0x441   : > { %v6169_v18 = vpop.eup %3425  ;;  %v2675_v31 = vadd.f32 %v6062_v32, %v2674_v43  ;;  %v2705_v30 = vsub.f32 1.0, %v2704_v27  ;;  %v2712_v37 = vand.u32 2147483647, %v6036_v45  ;;  %v2683_v6 = vor.u32 1.1754944e-38, %v2682_v52 }
 0x442   : > { %v2515_v50 = vadd.f32 %v2514_v29, %v2513_v42  ;;  %2866 = vperm.xlu0 %3256, %v2654_v0   ;;  %2861 = vperm.xlu2 %3258, %v2653_v62   ;;  %v2714_v1 = vand.u32 2147483648, %v6036_v45  ;;  %v2688_v21 = vmul.f32 %v6075_v61, %v6045_v58  ;;  %v2521_v9 = vrot.slane %v2520_v40, 4 }
 0x443   : > { %v2679_v41 = vsel %vm2678_vm1, %v6062_v32, %v2675_v31  ;;  %v2706_v2 = vmul.f32 %v6071_v24, %v2705_v30  ;;  %vm6182_vm9 = vcmp.eq.f32.partialorder %v2712_v37, 8.507059e+37  ;;  %vm2693_vm11 = vweird.f32 %v6075_v61 }
 0x444   : > { %v2516_v34 = vrot.slane %v2515_v50, 1  ;;  %v2684_v4 = vsel %vm6158_vm7, %v2683_v6, %v2679_v41  ;;  %v2715_v38 = vor.u32 1.1754944e-38, %v2714_v1  ;;  %v2689_v7 = vsub.f32 1.0, %v2688_v21 }
 0x445   : > { %v2522_v44 = vadd.f32 %v2521_v9, %v2520_v40  ;;  %v2686_v51 = vmul.f32 %v5805_v26, %v2684_v4  ;;  %v2685_v36 = vmul.f32 %v5946_v46, %v2684_v4  ;;  %v2707_v56 = vadd.f32 %v6071_v24, %v2706_v2 }
 0x446   : > { %v2517_v32 = vadd.f32 %v2516_v34, %v2515_v50  ;;  %v2690_v17 = vmul.f32 %v6075_v61, %v2689_v7  ;;  %v2696_v22 = vand.u32 2147483647, %v6045_v58  ;;  %v2698_v46 = vand.u32 2147483648, %v6045_v58 }
 0x447   : > { %v2523_v15 = vrot.slane %v2522_v44, 2  ;;  %2886 = vperm.xlu1 %3257, %v2686_v51   ;;  %v2711_v26 = vsel %vm2710_vm10, %v6071_v24, %v2707_v56  ;;  %v2720_v25 = vmul.f32 %v6088_v23, %v6056_v39  ;;  %vm2692_vm12 = vweird.f32 %v6045_v58 }
 0x448   : > { %v6202_v10 = vadd.f32 1e-05, %v2517_v32  ;;  %v6206_v45 = vsel %vm6182_vm9, %v2715_v38, %v2711_v26  ;;  %v2691_v14 = vadd.f32 %v6075_v61, %v2690_v17  ;;  %vm2694_vm13 = vmor %vm2692_vm12, %vm2693_vm11  ;;  %v2699_v52 = vor.u32 1.1754944e-38, %v2698_v46 }
 0x449   : > { %v2524_v42 = vadd.f32 %v2523_v15, %v2522_v44  ;;  %vm2697_vm14 = vcmp.eq.f32.partialorder %v2696_v22, 8.507059e+37  ;;  %v2721_v27 = vsub.f32 1.0, %v2720_v25  ;;  %v2717_v43 = vmul.f32 %v5840_v48, %v6206_v45 }
 0x44a   : > { %3427 = vrcp.f32 %v6202_v10  ;;  %2876 = vperm.xlu2 %3258, %v2670_v12   ;;  %2881 = vperm.xlu0 %3256, %v2685_v36   ;;  %v2695_v24 = vsel %vm2694_vm13, %v6075_v61, %v2691_v14  ;;  %vm2725_vm15 = vweird.f32 %v6088_v23  ;;  %v2728_v58 = vand.u32 2147483647, %v6056_v39 }
 0x44b   : > { %v2525_v49 = vrot.slane %v2524_v42, 1  ;;  %v2700_v19 = vsel %vm2697_vm14, %v2699_v52, %v2695_v24  ;;  %v2722_v29 = vmul.f32 %v6088_v23, %v2721_v27  ;;  %v2730_v28 = vand.u32 2147483648, %v6056_v39 }
 0x44c   : > { %v2752_v12 = vmul.f32 %v6163_v63, %v6102_v55  ;;  %v2702_v61 = vmul.f32 %v5973_v16, %v2700_v19  ;;  %v2701_v62 = vmul.f32 %v5912_v20, %v2700_v19  ;;  %vm2724_vm0 = vweird.f32 %v6056_v39 }
 0x44d   : > { %v2526_v0 = vadd.f32 %v2525_v49, %v2524_v42  ;;  %v2723_v40 = vadd.f32 %v6088_v23, %v2722_v29  ;;  %vm2726_vm2 = vmor %vm2724_vm0, %vm2725_vm15  ;;  %v2731_v31 = vor.u32 1.1754944e-38, %v2730_v28  ;;  %v2736_v37 = vmul.f32 %v6169_v18, %v6118_v54  ;;  %v3457_v49 = vld [vmem:[%s3582_s26 + $0x10] sm:$0xff] }
 0x44e   : > { %v2753_v30 = vsub.f32 1.0, %v2752_v12  ;;  %vm2729_vm3 = vcmp.eq.f32.partialorder %v2728_v58, 8.507059e+37  ;;  %vm2757_vm4 = vweird.f32 %v6163_v63  ;;  %vm2756_vm5 = vweird.f32 %v6102_v55 }
 0x44f   : > { %v6224_v48 = vadd.f32 1e-05, %v2526_v0  ;;  %2901 = vperm.xlu1 %3257, %v2717_v43   ;;  %v2727_v6 = vsel %vm2726_vm2, %v6088_v23, %v2723_v40  ;;  %v2762_v39 = vand.u32 2147483648, %v6102_v55  ;;  %v2737_v1 = vsub.f32 1.0, %v2736_v37  ;;  %vm6238_vm6 = vmor %vm2756_vm5, %vm2757_vm4 }
 0x450   : > { %v3428_v50 = vpop.eup %3427  ;;  %v2732_v20 = vsel %vm2729_vm3, %v2731_v31, %v2727_v6  ;;  %v2754_v16 = vmul.f32 %v6163_v63, %v2753_v30  ;;  %v2760_v23 = vand.u32 2147483647, %v6102_v55  ;;  %vm2741_vm7 = vweird.f32 %v6169_v18  ;;  %v3460_v6 = vld [vmem:[%s3582_s26 + $0x20] sm:$0xff] }
 0x451   : > { %3429 = vrcp.f32 %v6224_v48  ;;  %v2734_v21 = vmul.f32 %v5891_v11, %v2732_v20  ;;  %v2768_v41 = vmul.f32 %v3428_v50, %v6202_v10  ;;  %v2738_v53 = vmul.f32 %v6169_v18, %v2737_v1 }
 0x452   : > { %2896 = vperm.xlu0 %3256, %v2702_v61   ;;  %2891 = vperm.xlu2 %3258, %v2701_v62   ;;  %v2755_v9 = vadd.f32 %v6163_v63, %v2754_v16  ;;  %vm2740_vm8 = vweird.f32 %v6118_v54  ;;  %v2746_v11 = vand.u32 2147483648, %v6118_v54  ;;  %v2733_v55 = vmul.f32 %v5994_v35, %v2732_v20  ;;  %v3458_v62 = vld [vmem:[%s3582_s26 + $0x8] sm:$0xff] }
 0x453   : > { %v2769_v4 = vsub.f32 1.0, %v2768_v41  ;;  %v2763_v38 = vor.u32 1.1754944e-38, %v2762_v39  ;;  %v2739_v7 = vadd.f32 %v6169_v18, %v2738_v53  ;;  %v2744_v44 = vand.u32 2147483647, %v6118_v54  ;;  %vm2742_vm9 = vmor %vm2740_vm8, %vm2741_vm7  ;;  %v3462_v53 = vld [vmem:[%s3582_s26 + $0x30] sm:$0xff] }
 0x454   : > { %v2759_v34 = vsel %vm6238_vm6, %v6163_v63, %v2755_v9  ;;  %vm2761_vm1 = vcmp.eq.f32.partialorder %v2760_v23, 8.507059e+37  ;;  %v2718_v63 = vmul.f32 %v5955_v33, %v6206_v45  ;;  %v2747_v22 = vor.u32 1.1754944e-38, %v2746_v11 }
 0x455   : > { %v2770_v36 = vmul.f32 %v3428_v50, %v2769_v4  ;;  %v2764_v56 = vsel %vm2761_vm1, %v2763_v38, %v2759_v34  ;;  %v2743_v32 = vsel %vm2742_vm9, %v6169_v18, %v2739_v7  ;;  %vm2773_vm10 = vweird.f32 %v3428_v50  ;;  %v3463_v38 = vld [vmem:[%s3582_s26 + $0x28] sm:$0xff] }
 0x456   : > { %vm2745_vm11 = vcmp.eq.f32.partialorder %v2744_v44, 8.507059e+37  ;;  %v2778_v54 = vand.u32 2147483648, %v6202_v10  ;;  %v2765_v15 = vmul.f32 %v5921_v57, %v2764_v56  ;;  %vm2772_vm12 = vweird.f32 %v6202_v10 }
 0x457   : > { %v3430_v51 = vpop.eup %3429  ;;  %2916 = vperm.xlu1 %3257, %v2734_v21   ;;  %v2771_v35 = vadd.f32 %v3428_v50, %v2770_v36  ;;  %v2748_v26 = vsel %vm2745_vm11, %v2747_v22, %v2743_v32  ;;  %v2776_v33 = vand.u32 2147483647, %v6202_v10  ;;  %vm2774_vm13 = vmor %vm2772_vm12, %vm2773_vm10  ;;  %v2794_v10 = vand.u32 2147483648, %v6224_v48  ;;  %v3461_v21 = vld [vmem:[%s3582_s26 + $0x18] sm:$0xff]  ;;  %v3464_v36 = vld [vmem:[%s3582_s26 + $0x48] sm:$0xff] }
 0x458   : > { %v2784_v17 = vmul.f32 %v3430_v51, %v6224_v48  ;;  %v2750_v25 = vmul.f32 %v6043_v8, %v2748_v26  ;;  %v2749_v45 = vmul.f32 %v5985_v59, %v2748_v26  ;;  %v2779_v14 = vor.u32 1.1754944e-38, %v2778_v54 }
 0x459   : > { %v2775_v18 = vsel %vm2774_vm13, %v3428_v50, %v2771_v35  ;;  %vm2777_vm14 = vcmp.eq.f32.partialorder %v2776_v33, 8.507059e+37  ;;  %vm2789_vm15 = vweird.f32 %v3430_v51  ;;  %vm2788_vm0 = vweird.f32 %v6224_v48  ;;  %v3465_v35 = vld [vmem:[%s3582_s26 + $0x40] sm:$0xff] }
 0x45a   : > { %2906 = vperm.xlu2 %3258, %v2718_v63   ;;  %2911 = vperm.xlu0 %3256, %v2733_v55   ;;  %v2785_v46 = vsub.f32 1.0, %v2784_v17  ;;  %v2780_v42 = vsel %vm2777_vm14, %v2779_v14, %v2775_v18  ;;  %v2792_v59 = vand.u32 2147483647, %v6224_v48  ;;  %vm2790_vm2 = vmor %vm2788_vm0, %vm2789_vm15  ;;  %v2766_v19 = vmul.f32 %v6034_v47, %v2764_v56  ;;  %v3459_v48 = vld [vmem:[%s3582_s26] sm:$0xff] }
 0x45b   : > { %v2782_v57 = vmul.f32 %v5960_v13, %v2780_v42  ;;  %v2781_v27 = vmul.f32 %v6112_v3, %v2780_v42  ;;  %v2795_v29 = vor.u32 1.1754944e-38, %v2794_v10  ;;  %vm3055_vm4 = vcmask 68608  }
 0x45c   : > { %v2786_v52 = vmul.f32 %v3430_v51, %v2785_v46  ;;  %vm2793_vm3 = vcmp.eq.f32.partialorder %v2792_v59, 8.507059e+37  ;;  %v3466_v46 = vld [vmem:[%s3582_s26 + $0x60] sm:$0xff] }
 0x45e   : > { %v2787_v24 = vadd.f32 %v3430_v51, %v2786_v52 }
 0x45f   : > { %2931 = vperm.xlu1 %3257, %v2765_v15  }
 0x460   : > { %v2791_v13 = vsel %vm2790_vm2, %v3430_v51, %v2787_v24 }
 0x461   : > { %v2796_v3 = vsel %vm2793_vm3, %v2795_v29, %v2791_v13  ;;  %v3469_v13 = vld [vmem:[%s3582_s26 + $0x58] sm:$0xff] }
 0x462   : > { %2926 = vperm.xlu0 %3256, %v2750_v25   ;;  %2921 = vperm.xlu2 %3258, %v2749_v45   ;;  %v2798_v47 = vmul.f32 %v6153_v60, %v2796_v3  ;;  %v2797_v0 = vmul.f32 %v6100_v5, %v2796_v3  ;;  %v3467_v45 = vld [vmem:[%s3582_s26 + $0x38] sm:$0xff] }
 0x465   : > { %v2812_v8 = vpop.permute.xlu2 %2811 }
 0x466   : > { %v2961_v43 = vmul.f32 %v3457_v49, %v2812_v8 }
 0x467   : > { %2946 = vperm.xlu1 %3257, %v2782_v57  }
 0x468   : > { %v2993_v58 = vadd.f32 %v3457_v49, %v2961_v43 }
 0x46a   : > { %2936 = vperm.xlu2 %3258, %v2766_v19   ;;  %2941 = vperm.xlu0 %3256, %v2781_v27   ;;  %v3025_v28 = vpack.c.bf16 %v2993_v58, %v2993_v58  ;;  %v3468_v27 = vld [vmem:[%s3582_s26 + $0x78] sm:$0xff]  ;;  %v3470_v58 = vld [vmem:[%s3582_s26 + $0x50] sm:$0xff] }
 0x46c   : > { %3058 = vst.msk [vmem:[%s6273_s8 + $0x8] sm:$0xf] %vm3055_vm4, %v3025_v28  ;;  %v2807_v12 = vpop.permute.xlu1 %2806 }
 0x46d   : > { %v2960_v40 = vmul.f32 %v3458_v62, %v2807_v12  ;;  %v3471_v12 = vld [vmem:[%s3582_s26 + $0x90] sm:$0xff] }
 0x46e   : > { %v2802_v61 = vpop.permute.xlu0 %2801 }
 0x46f   : > { %v2959_v31 = vmul.f32 %v3459_v48, %v2802_v61  ;;  %v2992_v37 = vadd.f32 %v3458_v62, %v2960_v40 }
 0x471   : > { %v2822_v30 = vpop.permute.xlu2 %2821  ;;  %v2991_v50 = vadd.f32 %v3459_v48, %v2959_v31  ;;  %v3024_v5 = vpack.c.bf16 %v2992_v37, %v2992_v37  ;;  %v3472_v37 = vld [vmem:[%s3582_s26 + $0x70] sm:$0xff] }
 0x472   : > { %2956 = vperm.xlu0 %3256, %v2798_v47   ;;  %2951 = vperm.xlu2 %3258, %v2797_v0   ;;  %v2963_v60 = vmul.f32 %v3460_v6, %v2822_v30 }
 0x473   : > { %v3023_v20 = vpack.c.bf16 %v2991_v50, %v2991_v50  ;;  %3057 = vst.msk [vmem:[%s6273_s8 + $0x4] sm:$0xf] %vm3055_vm4, %v3024_v5 }
 0x474   : > { %v2995_v16 = vadd.f32 %v3460_v6, %v2963_v60 }
 0x475   : > { %3056 = vst.msk [vmem:[%s6273_s8] sm:$0xf] %vm3055_vm4, %v3023_v20  ;;  %v3473_v20 = vld [vmem:[%s3582_s26 + $0x68] sm:$0xff] }
 0x476   : > { %v3027_v39 = vpack.c.bf16 %v2995_v16, %v2995_v16 }
 0x478   : > { %3060 = vst.msk [vmem:[%s6273_s8 + $0x10] sm:$0xf] %vm3055_vm4, %v3027_v39  ;;  %v3474_v39 = vld [vmem:[%s3582_s26 + $0xa8] sm:$0xff] }
 0x47c   : > { %v2817_v1 = vpop.permute.xlu1 %2816 }
 0x47d   : > { %v2962_v9 = vmul.f32 %v3461_v21, %v2817_v1 }
 0x47f   : > { %v2994_v23 = vadd.f32 %v3461_v21, %v2962_v9 }
 0x481   : > { %v3026_v41 = vpack.c.bf16 %v2994_v23, %v2994_v23 }
 0x483   : > { %3059 = vst.msk [vmem:[%s6273_s8 + $0xc] sm:$0xf] %vm3055_vm4, %v3026_v41 }
 0x485   : > { %v2832_v2 = vpop.permute.xlu2 %2831 }
 0x486   : > { %v2965_v34 = vmul.f32 %v3462_v53, %v2832_v2 }
 0x488   : > { %v2997_v11 = vadd.f32 %v3462_v53, %v2965_v34  ;;  %v2827_v4 = vpop.permute.xlu1 %2826  ;;  %v3475_v34 = vld [vmem:[%s3582_s26 + $0x88] sm:$0xff] }
 0x489   : > { %v2964_v7 = vmul.f32 %v3463_v38, %v2827_v4 }
 0x48a   : > { %v3029_v55 = vpack.c.bf16 %v2997_v11, %v2997_v11 }
 0x48b   : > { %v2996_v44 = vadd.f32 %v3463_v38, %v2964_v7  ;;  %v3476_v7 = vld [vmem:[%s3582_s26 + $0x80] sm:$0xff] }
 0x48c   : > { %3062 = vst.msk [vmem:[%s6273_s8 + $0x18] sm:$0xf] %vm3055_vm4, %v3029_v55 }
 0x48d   : > { %v2847_v51 = vpop.permute.xlu2 %2846  ;;  %v3028_v56 = vpack.c.bf16 %v2996_v44, %v2996_v44 }
 0x48e   : > { %v2968_v63 = vmul.f32 %v3464_v36, %v2847_v51  ;;  %v3477_v51 = vld [vmem:[%s3582_s26 + $0xc0] sm:$0xff] }
 0x48f   : > { %3061 = vst.msk [vmem:[%s6273_s8 + $0x14] sm:$0xf] %vm3055_vm4, %v3028_v56 }
 0x490   : > { %v3000_v32 = vadd.f32 %v3464_v36, %v2968_v63 }
 0x492   : > { %v3032_v17 = vpack.c.bf16 %v3000_v32, %v3000_v32 }
 0x494   : > { %3065 = vst.msk [vmem:[%s6273_s8 + $0x24] sm:$0xf] %vm3055_vm4, %v3032_v17 }
 0x496   : > { %v2842_v22 = vpop.permute.xlu1 %2841 }
 0x497   : > { %v2967_v54 = vmul.f32 %v3465_v35, %v2842_v22 }
 0x499   : > { %v2999_v15 = vadd.f32 %v3465_v35, %v2967_v54  ;;  %v3478_v54 = vld [vmem:[%s3582_s26 + $0xa0] sm:$0xff] }
 0x49b   : > { %v3031_v26 = vpack.c.bf16 %v2999_v15, %v2999_v15 }
 0x49c   : > { %v2862_v33 = vpop.permute.xlu2 %2861 }
 0x49d   : > { %v2971_v18 = vmul.f32 %v3466_v46, %v2862_v33  ;;  %3064 = vst.msk [vmem:[%s6273_s8 + $0x20] sm:$0xf] %vm3055_vm4, %v3031_v26  ;;  %v2837_v25 = vpop.permute.xlu0 %2836 }
 0x49e   : > { %v2966_v14 = vmul.f32 %v3467_v45, %v2837_v25 }
 0x49f   : > { %v3003_v42 = vadd.f32 %v3466_v46, %v2971_v18  ;;  %v3479_v18 = vld [vmem:[%s3582_s26 + $0x98] sm:$0xff] }
 0x4a0   : > { %v2998_v52 = vadd.f32 %v3467_v45, %v2966_v14  ;;  %v3480_v45 = vld [vmem:[%s3582_s26 + $0xd8] sm:$0xff] }
 0x4a1   : > { %v3035_v57 = vpack.c.bf16 %v3003_v42, %v3003_v42 }
 0x4a2   : > { %v3030_v24 = vpack.c.bf16 %v2998_v52, %v2998_v52 }
 0x4a3   : > { %3068 = vst.msk [vmem:[%s6273_s8 + $0x30] sm:$0xf] %vm3055_vm4, %v3035_v57 }
 0x4a4   : > { %3063 = vst.msk [vmem:[%s6273_s8 + $0x1c] sm:$0xf] %vm3055_vm4, %v3030_v24  ;;  %v2877_v10 = vpop.permute.xlu2 %2876 }
 0x4a5   : > { %v2974_v59 = vmul.f32 %v3468_v27, %v2877_v10 }
 0x4a7   : > { %v3006_v8 = vadd.f32 %v3468_v27, %v2974_v59  ;;  %v3481_v59 = vld [vmem:[%s3582_s26 + $0xb8] sm:$0xff] }
 0x4a9   : > { %v3038_v49 = vpack.c.bf16 %v3006_v8, %v3006_v8  ;;  %v2857_v43 = vpop.permute.xlu1 %2856  ;;  %v2852_v19 = vpop.permute.xlu0 %2851 }
 0x4aa   : > { %v2970_v29 = vmul.f32 %v3469_v13, %v2857_v43  ;;  %v2969_v3 = vmul.f32 %v3470_v58, %v2852_v19 }
 0x4ab   : > { %3071 = vst.msk [vmem:[%s6273_s8 + $0x3c] sm:$0xf] %vm3055_vm4, %v3038_v49 }
 0x4ac   : > { %v3002_v28 = vadd.f32 %v3469_v13, %v2970_v29  ;;  %v3001_v47 = vadd.f32 %v3470_v58, %v2969_v3  ;;  %v2892_v0 = vpop.permute.xlu2 %2891  ;;  %v3482_v13 = vld [vmem:[%s3582_s26 + $0xb0] sm:$0xff] }
 0x4ad   : > { %v2977_v61 = vmul.f32 %v3471_v12, %v2892_v0  ;;  %v3483_v58 = vld [vmem:[%s3582_s26 + $0xf0] sm:$0xff] }
 0x4ae   : > { %v3034_v62 = vpack.c.bf16 %v3002_v28, %v3002_v28  ;;  %v3033_v40 = vpack.c.bf16 %v3001_v47, %v3001_v47 }
 0x4af   : > { %v3009_v48 = vadd.f32 %v3471_v12, %v2977_v61 }
 0x4b0   : > { %3067 = vst.msk [vmem:[%s6273_s8 + $0x2c] sm:$0xf] %vm3055_vm4, %v3034_v62 }
 0x4b1   : > { %3066 = vst.msk [vmem:[%s6273_s8 + $0x28] sm:$0xf] %vm3055_vm4, %v3033_v40  ;;  %v3041_v31 = vpack.c.bf16 %v3009_v48, %v3009_v48  ;;  %v2872_v30 = vpop.permute.xlu1 %2871  ;;  %v3484_v40 = vld [vmem:[%s3582_s26 + $0xd0] sm:$0xff] }
 0x4b2   : > { %v2973_v50 = vmul.f32 %v3472_v37, %v2872_v30 }
 0x4b3   : > { %3074 = vst.msk [vmem:[%s6273_s8 + $0x48] sm:$0xf] %vm3055_vm4, %v3041_v31 }
 0x4b4   : > { %v3005_v6 = vadd.f32 %v3472_v37, %v2973_v50  ;;  %v2867_v60 = vpop.permute.xlu0 %2866  ;;  %v2907_v5 = vpop.permute.xlu2 %2906  ;;  %v3485_v37 = vld [vmem:[%s3582_s26 + $0xc8] sm:$0xff] }
 0x4b5   : > { %v2972_v16 = vmul.f32 %v3473_v20, %v2867_v60  ;;  %v2980_v1 = vmul.f32 %v3474_v39, %v2907_v5 }
 0x4b6   : > { %v3037_v21 = vpack.c.bf16 %v3005_v6, %v3005_v6 }
 0x4b7   : > { %v3004_v9 = vadd.f32 %v3473_v20, %v2972_v16  ;;  %v3012_v23 = vadd.f32 %v3474_v39, %v2980_v1  ;;  %v3486_v16 = vld [vmem:[%s3582_s26 + $0xe8] sm:$0xff] }
 0x4b8   : > { %3070 = vst.msk [vmem:[%s6273_s8 + $0x38] sm:$0xf] %vm3055_vm4, %v3037_v21 }
 0x4b9   : > { %v3036_v41 = vpack.c.bf16 %v3004_v9, %v3004_v9  ;;  %v3044_v2 = vpack.c.bf16 %v3012_v23, %v3012_v23  ;;  %v2887_v53 = vpop.permute.xlu1 %2886  ;;  %v3487_v9 = vld [vmem:[%s3582_s26 + $0xe0] sm:$0xff] }
 0x4ba   : > { %v2976_v11 = vmul.f32 %v3475_v34, %v2887_v53 }
 0x4bb   : > { %3069 = vst.msk [vmem:[%s6273_s8 + $0x34] sm:$0xf] %vm3055_vm4, %v3036_v41 }
 0x4bc   : > { %3077 = vst.msk [vmem:[%s6273_s8 + $0x54] sm:$0xf] %vm3055_vm4, %v3044_v2  ;;  %v3008_v4 = vadd.f32 %v3475_v34, %v2976_v11  ;;  %v2882_v55 = vpop.permute.xlu0 %2881  ;;  %v2922_v38 = vpop.permute.xlu2 %2921  ;;  %v3488_v11 = vld [vmem:[%s3582_s26 + $0xf8] sm:$0xff] }
 0x4bd   : > { %v2975_v44 = vmul.f32 %v3476_v7, %v2882_v55  ;;  %v2983_v36 = vmul.f32 %v3477_v51, %v2922_v38 }
 0x4be   : > { %v3040_v63 = vpack.c.bf16 %v3008_v4, %v3008_v4 }
 0x4bf   : > { %v3007_v56 = vadd.f32 %v3476_v7, %v2975_v44  ;;  %v3015_v32 = vadd.f32 %v3477_v51, %v2983_v36 }
 0x4c0   : > { %3073 = vst.msk [vmem:[%s6273_s8 + $0x44] sm:$0xf] %vm3055_vm4, %v3040_v63 }
 0x4c1   : > { %v3039_v17 = vpack.c.bf16 %v3007_v56, %v3007_v56  ;;  %v3047_v22 = vpack.c.bf16 %v3015_v32, %v3015_v32  ;;  %v2902_v35 = vpop.permute.xlu1 %2901 }
 0x4c2   : > { %v2979_v15 = vmul.f32 %v3478_v54, %v2902_v35 }
 0x4c3   : > { %3072 = vst.msk [vmem:[%s6273_s8 + $0x40] sm:$0xf] %vm3055_vm4, %v3039_v17 }
 0x4c4   : > { %3080 = vst.msk [vmem:[%s6273_s8 + $0x60] sm:$0xf] %vm3055_vm4, %v3047_v22  ;;  %v3011_v26 = vadd.f32 %v3478_v54, %v2979_v15  ;;  %v2897_v33 = vpop.permute.xlu0 %2896  ;;  %v2937_v46 = vpop.permute.xlu2 %2936 }
 0x4c5   : > { %v2978_v25 = vmul.f32 %v3479_v18, %v2897_v33  ;;  %v2986_v14 = vmul.f32 %v3480_v45, %v2937_v46 }
 0x4c6   : > { %v3043_v42 = vpack.c.bf16 %v3011_v26, %v3011_v26 }
 0x4c7   : > { %v3010_v52 = vadd.f32 %v3479_v18, %v2978_v25  ;;  %v3018_v57 = vadd.f32 %v3480_v45, %v2986_v14 }
 0x4c8   : > { %3076 = vst.msk [vmem:[%s6273_s8 + $0x50] sm:$0xf] %vm3055_vm4, %v3043_v42 }
 0x4c9   : > { %v3042_v24 = vpack.c.bf16 %v3010_v52, %v3010_v52  ;;  %v3050_v10 = vpack.c.bf16 %v3018_v57, %v3018_v57  ;;  %v2917_v27 = vpop.permute.xlu1 %2916 }
 0x4ca   : > { %v2982_v8 = vmul.f32 %v3481_v59, %v2917_v27 }
 0x4cb   : > { %3075 = vst.msk [vmem:[%s6273_s8 + $0x4c] sm:$0xf] %vm3055_vm4, %v3042_v24 }
 0x4cc   : > { %3083 = vst.msk [vmem:[%s6273_s8 + $0x6c] sm:$0xf] %vm3055_vm4, %v3050_v10  ;;  %v3014_v49 = vadd.f32 %v3481_v59, %v2982_v8  ;;  %v2912_v43 = vpop.permute.xlu0 %2911  ;;  %v2952_v19 = vpop.permute.xlu2 %2951 }
 0x4cd   : > { %v2981_v29 = vmul.f32 %v3482_v13, %v2912_v43  ;;  %v2989_v3 = vmul.f32 %v3483_v58, %v2952_v19 }
 0x4ce   : > { %v3046_v28 = vpack.c.bf16 %v3014_v49, %v3014_v49 }
 0x4cf   : > { %v3013_v47 = vadd.f32 %v3482_v13, %v2981_v29  ;;  %v3021_v0 = vadd.f32 %v3483_v58, %v2989_v3 }
 0x4d0   : > { %3079 = vst.msk [vmem:[%s6273_s8 + $0x5c] sm:$0xf] %vm3055_vm4, %v3046_v28 }
 0x4d1   : > { %v3045_v12 = vpack.c.bf16 %v3013_v47, %v3013_v47  ;;  %v3053_v61 = vpack.c.bf16 %v3021_v0, %v3021_v0  ;;  %v2932_v62 = vpop.permute.xlu1 %2931 }
 0x4d2   : > { %v2985_v48 = vmul.f32 %v3484_v40, %v2932_v62 }
 0x4d3   : > { %3078 = vst.msk [vmem:[%s6273_s8 + $0x58] sm:$0xf] %vm3055_vm4, %v3045_v12 }
 0x4d4   : > { %3086 = vst.msk [vmem:[%s6273_s8 + $0x78] sm:$0xf] %vm3055_vm4, %v3053_v61  ;;  %v3017_v31 = vadd.f32 %v3484_v40, %v2985_v48  ;;  %v2927_v30 = vpop.permute.xlu0 %2926 }
 0x4d5   : > { %v2984_v50 = vmul.f32 %v3485_v37, %v2927_v30 }
 0x4d6   : > { %v3049_v6 = vpack.c.bf16 %v3017_v31, %v3017_v31 }
 0x4d7   : > { %v3016_v60 = vadd.f32 %v3485_v37, %v2984_v50 }
 0x4d8   : > { %3082 = vst.msk [vmem:[%s6273_s8 + $0x68] sm:$0xf] %vm3055_vm4, %v3049_v6 }
 0x4d9   : > { %v3048_v5 = vpack.c.bf16 %v3016_v60, %v3016_v60  ;;  %v2947_v20 = vpop.permute.xlu1 %2946 }
 0x4da   : > { %v2988_v39 = vmul.f32 %v3486_v16, %v2947_v20 }
 0x4db   : > { %3081 = vst.msk [vmem:[%s6273_s8 + $0x64] sm:$0xf] %vm3055_vm4, %v3048_v5 }
 0x4dc   : > { %v3020_v1 = vadd.f32 %v3486_v16, %v2988_v39  ;;  %v2942_v21 = vpop.permute.xlu0 %2941 }
 0x4dd   : > { %v2987_v23 = vmul.f32 %v3487_v9, %v2942_v21 }
 0x4de   : > { %v3052_v41 = vpack.c.bf16 %v3020_v1, %v3020_v1 }
 0x4df   : > { %v3019_v2 = vadd.f32 %v3487_v9, %v2987_v23 }
 0x4e0   : > { %3085 = vst.msk [vmem:[%s6273_s8 + $0x74] sm:$0xf] %vm3055_vm4, %v3052_v41 }
 0x4e1   : > { %v3051_v53 = vpack.c.bf16 %v3019_v2, %v3019_v2 }
 0x4e3   : > { %3084 = vst.msk [vmem:[%s6273_s8 + $0x70] sm:$0xf] %vm3055_vm4, %v3051_v53 }
 0x4e4   : > { %v2957_v34 = vpop.permute.xlu0 %2956 }
 0x4e5   : > { %v2990_v4 = vmul.f32 %v3488_v11, %v2957_v34 }
 0x4e7   : > { %v3022_v55 = vadd.f32 %v3488_v11, %v2990_v4 }
 0x4e9   : > { %v3054_v38 = vpack.c.bf16 %v3022_v55, %v3022_v55 }
 0x4eb   : > { %3087 = vst.msk [vmem:[%s6273_s8 + $0x7c] sm:$0xf] %vm3055_vm4, %v3054_v38 }
 0x4ec PF: > { %s17_s22 = sadd.s32 1, %s3511_s22   ;;  %s6948_s20 = smov %s3507_s21 }
 0x4ed   : > { %p14_p5 = scmp.ge.s32.totalorder %s17_s22, 4   ;;  %s6949_s21 = smov %s6951_s4 }
 0x4ef   :  { %16 = sbr.rel (!%p14_p5) target bundleno = 3 (0x3), region = 70 }

</bundles_post_ra>
